<compile_context>
chip_gen: v5e
topology: v5e:2x2
jax: 0.10.0
libtpu: 0.0.40
codegen_flags: <defaults>
</compile_context>

<pallas_src>
import functools
import math

import jax
import jax.numpy as jnp
import numpy as np
from jax.experimental import pallas as pl
from jax.experimental.pallas import tpu as pltpu

_LAYER_WEIGHT_ORDER = (
    "sa_wq", "sa_bq", "sa_wk", "sa_bk", "sa_wv", "sa_bv", "sa_wo", "sa_bo",
    "ca_wq", "ca_bq", "ca_wk", "ca_bk", "ca_wv", "ca_bv", "ca_wo", "ca_bo",
    "ff_w1", "ff_b1", "ff_w2", "ff_b2",
)

_VMEM_LIMIT_CACHE = None


def _vmem_limit_bytes():
    """Generation-aware scoped VMEM limit (computed once, cached)."""
    global _VMEM_LIMIT_CACHE
    if _VMEM_LIMIT_CACHE is None:
        try:
            cap = int(pltpu.get_tpu_info().vmem_capacity_bytes)
        except Exception:
            cap = 64 * 1024 * 1024          # conservative (v7x per-TC) fallback
        # ~100 MiB on v5e/v6e (128 MiB physical), ~51 MiB on v7x (64 MiB),
        # always leaving headroom for compiler-internal scratch.
        _VMEM_LIMIT_CACHE = min(int(cap * 0.8), 100 * 1024 * 1024)
    return _VMEM_LIMIT_CACHE


def _pick_vocab_tile(V, target=1024):
    """Largest lane-aligned (multiple of 128) divisor of V that is <= target."""
    if V <= target:
        return V
    for t in range(target, 127, -1):
        if V % t == 0 and t % 128 == 0:
            return t
    return V


# ---------------------------------------------------------------------------
# Decoder layer kernel: one grid step = one batch element, whole sequence.
# ---------------------------------------------------------------------------
def decoder_layer_kernel(
    dec_ref, enc_ref, tbias_ref, sbias_ref,
    sa_wq, sa_bq, sa_wk, sa_bk, sa_wv, sa_bv, sa_wo, sa_bo,
    ca_wq, ca_bq, ca_wk, ca_bk, ca_wv, ca_bv, ca_wo, ca_bo,
    ff_w1, ff_b1, ff_w2, ff_b2,
    out_ref, ctx_ref,
    *, n_heads, head_dim, scale, eps, mxu_dtype,
):
    f32 = jnp.float32

    def lo(x):                       # MXU feed dtype (bf16 in production mode)
        return x.astype(mxu_dtype)

    def layernorm(x):
        mean = jnp.mean(x, axis=-1, keepdims=True)
        c = x - mean
        var = jnp.mean(c * c, axis=-1, keepdims=True)
        return c * jax.lax.rsqrt(var + eps)          # rsqrt -> EUP slot

    def softmax_rows(s):
        m = jnp.max(s, axis=-1, keepdims=True)
        e = jnp.exp(s - m)
        denom = jnp.sum(e, axis=-1, keepdims=True)
        # approx reciprocal -> EUP slot, no f32 VPU divide per row.
        return e * pl.reciprocal(denom, approx=True)

    def mha(q_in_f32, kv_lo, bias_f32, wq, bq, wk, bk, wv, bv, wo, bo):
        # Full-sequence projections, computed exactly once per layer per batch
        # element (no per-q-tile recomputation).
        q = jnp.dot(lo(q_in_f32), wq[...], preferred_element_type=f32) + bq[...]
        k = jnp.dot(kv_lo, wk[...], preferred_element_type=f32) + bk[...]
        v = jnp.dot(kv_lo, wv[...], preferred_element_type=f32) + bv[...]
        # Fold 1/sqrt(d_k/n_heads) into q once (S*D mults, not H*S*Skv).
        q = lo(q * scale)
        k = lo(k)
        v = lo(v)
        # TODO(synk): for head_dim < 128 these are sub-lane-tile slices; a
        # sublane-batched head layout would avoid the per-head relayouts.
        for h in range(n_heads):                     # static unroll over heads
            c0 = h * head_dim
            qh = q[:, c0:c0 + head_dim]
            kh = k[:, c0:c0 + head_dim]
            vh = v[:, c0:c0 + head_dim]
            # Contract the last dim of BOTH operands: no explicit K transpose.
            s = jax.lax.dot_general(qh, kh, (((1,), (1,)), ((), ())),
                                    preferred_element_type=f32)
            p = softmax_rows(s + bias_f32)           # additive mask bias
            # Per-head context lands in the shared (S, D) f32 scratch ...
            ctx_ref[:, c0:c0 + head_dim] = jnp.dot(
                lo(p), vh, preferred_element_type=f32)
        # ... so W_o is ONE full-depth (S, D) @ (D, D) MXU matmul.
        return (jnp.dot(lo(ctx_ref[...]), wo[...], preferred_element_type=f32)
                + bo[...])

    x0 = dec_ref[...].astype(f32)        # (S, D) f32 residual stream
    dec_lo = lo(x0)                      # self-attn K/V feed (single cast)
    enc_lo = enc_ref[...]                # cross-attn K/V feed (already bf16)
    tbias = tbias_ref[...]               # (S, S)     f32 additive bias
    sbias = sbias_ref[...]               # (S, S_enc) f32 additive bias

    # masked self-attention + residual + LayerNorm (dropout1 = identity)
    x = layernorm(mha(x0, dec_lo, tbias,
                      sa_wq, sa_bq, sa_wk, sa_bk, sa_wv, sa_bv, sa_wo, sa_bo)
                  + x0)
    # encoder-decoder cross-attention + residual + LayerNorm (dropout2 = id)
    x = layernorm(mha(x, enc_lo, sbias,
                      ca_wq, ca_bq, ca_wk, ca_bk, ca_wv, ca_bv, ca_wo, ca_bo)
                  + x)
    # position-wise FFN + residual + LayerNorm (dropout3 = identity)
    hdn = jnp.maximum(
        jnp.dot(lo(x), ff_w1[...], preferred_element_type=f32) + ff_b1[...], 0.0)
    y = jnp.dot(lo(hdn), ff_w2[...], preferred_element_type=f32) + ff_b2[...]
    x = layernorm(y + x)

    out_ref[...] = x.astype(out_ref.dtype)


def make_decoder_layer(B, S, S_enc, D, F, *, n_heads, d_k, eps=1e-12,
                       mxu_dtype=jnp.bfloat16):
    assert D % n_heads == 0
    head_dim = D // n_heads
    scale = 1.0 / math.sqrt(d_k / n_heads)

    kernel = functools.partial(
        decoder_layer_kernel, n_heads=n_heads, head_dim=head_dim, scale=scale,
        eps=eps, mxu_dtype=mxu_dtype)

    attn_shapes = [(D, D), (1, D)] * 4
    weight_shapes = attn_shapes * 2 + [(D, F), (1, F), (F, D), (1, D)]
    weight_dtypes = [mxu_dtype if i % 2 == 0 else jnp.float32
                     for i in range(len(weight_shapes))]

    def build(single_buffer_weights):
        def wspec(shape):
            idx = lambda b: (0,) * len(shape)
            if single_buffer_weights:
                # Constant index_map -> the second pipeline buffer is pure
                # VMEM waste (matters most on v7x's 64 MiB VMEM).
                return pl.BlockSpec(shape, idx, pipeline_mode=pl.Buffered(1))
            return pl.BlockSpec(shape, idx)

        in_specs = [
            # f32 residual stream (also self-attn K/V after one in-kernel cast)
            pl.BlockSpec((None, S, D), lambda b: (b, 0, 0)),
            # Encoder memory, already bf16: cross-attn K/V only (never residual)
            pl.BlockSpec((None, S_enc, D), lambda b: (b, 0, 0)),
            # Additive attention-bias blocks (f32, 0 keep / -1e9 drop)
            pl.BlockSpec((None, S, S), lambda b: (b, 0, 0)),
            pl.BlockSpec((None, S, S_enc), lambda b: (b, 0, 0)),
        ] + [wspec(s) for s in weight_shapes]

        return pl.pallas_call(
            kernel,
            out_shape=jax.ShapeDtypeStruct((B, S, D), jnp.float32),
            grid=(B,),   # whole batch elements only: K/V DMA'd once each,
                         # and v7x's two TCs split along whole batch elements.
            in_specs=in_specs,
            out_specs=pl.BlockSpec((None, S, D), lambda b: (b, 0, 0)),
            scratch_shapes=[pltpu.VMEM((S, D), jnp.float32)],  # per-head ctx
            compiler_params=pltpu.CompilerParams(
                dimension_semantics=("parallel",),
                vmem_limit_bytes=_vmem_limit_bytes()),
        )

    arg_shapes = (
        jax.ShapeDtypeStruct((B, S, D), jnp.float32),
        jax.ShapeDtypeStruct((B, S_enc, D), mxu_dtype),
        jax.ShapeDtypeStruct((B, S, S), jnp.float32),
        jax.ShapeDtypeStruct((B, S, S_enc), jnp.float32),
    ) + tuple(jax.ShapeDtypeStruct(s, dt)
              for s, dt in zip(weight_shapes, weight_dtypes))

    # Loud, build-time feature detection of single-buffered weight specs:
    # AOT-compile the actual layer call once; on rejection fall back and say so.
    try:
        layer_call = build(True)
        jax.jit(layer_call).lower(*arg_shapes).compile()
        return layer_call
    except Exception as e:  # noqa: BLE001 - any construction/lowering rejection
        msg = str(e).splitlines()[0][:160] if str(e) else ""
        print("[decoder-pallas] WARNING: single-buffered weight specs "
              f"(pl.Buffered(1)) rejected at build time ({type(e).__name__}: {msg}); "
              "falling back to double-buffered weights (2x weight VMEM).")
        return build(False)


# ---------------------------------------------------------------------------
# Final vocab projection kernel (V-tiled weight stream).
# ---------------------------------------------------------------------------
def output_linear_kernel(x_ref, w_ref, b_ref, out_ref, *, mxu_dtype):
    y = jnp.dot(x_ref[...].astype(mxu_dtype), w_ref[...],
                preferred_element_type=jnp.float32) + b_ref[...]
    out_ref[...] = y.astype(out_ref.dtype)


def make_output_linear(B, S, D, V, *, v_tile, mxu_dtype=jnp.bfloat16):
    assert V % v_tile == 0
    n_v = V // v_tile
    kernel = functools.partial(output_linear_kernel, mxu_dtype=mxu_dtype)
    # TODO(synk): at long S the (None, S, D) activation block should also be
    # row-tiled; fine for S <= a few hundred.
    return pl.pallas_call(
        kernel,
        out_shape=jax.ShapeDtypeStruct((B, S, V), jnp.float32),
        grid=(B, n_v),
        in_specs=[
            pl.BlockSpec((None, S, D), lambda b, vi: (b, 0, 0)),
            pl.BlockSpec((D, v_tile), lambda b, vi: (0, vi)),   # streams over V
            pl.BlockSpec((1, v_tile), lambda b, vi: (0, vi)),
        ],
        out_specs=pl.BlockSpec((None, S, v_tile), lambda b, vi: (b, 0, vi)),
        compiler_params=pltpu.CompilerParams(
            dimension_semantics=("parallel", "parallel"),
            vmem_limit_bytes=_vmem_limit_bytes()),
    )


# ---------------------------------------------------------------------------
# Embedding (sinusoidal positional encoding + token embedding).
# ---------------------------------------------------------------------------
def sinusoid_encoding(max_len, d_model):
    pos = np.arange(max_len, dtype=np.float32)[:, None]
    two_i = np.arange(0, d_model, 2, dtype=np.float32)[None, :]
    div = np.power(10000.0, two_i / d_model)
    enc = np.zeros((max_len, d_model), dtype=np.float32)
    enc[:, 0::2] = np.sin(pos / div)
    enc[:, 1::2] = np.cos(pos / div)
    return jnp.asarray(enc)


def transformer_embedding(tokens, emb_table, pos_encoding):
    # TODO(synk): the token-id gather stays in XLA (jnp.take); a Pallas version
    # would need PrefetchScalarGridSpec + pl.Element row gathers -- overkill.
    seq_len = tokens.shape[1]
    tok = jnp.take(emb_table, tokens.astype(jnp.int32), axis=0).astype(jnp.float32)
    return tok + pos_encoding[:seq_len][None, :, :]


# ---------------------------------------------------------------------------
# Full Decoder_torch forward (Pallas path).  pallas_calls built once, whole
# forward jit-ted: no per-layer host syncs, layers overlap writeback/prefetch.
# ---------------------------------------------------------------------------
def _layer_weights(lp, mxu_dtype):
    ws = []
    for name in _LAYER_WEIGHT_ORDER:
        w = lp[name]
        if name[3] == "w":           # 2-D weight matrices -> MXU dtype (bf16)
            w = w.astype(mxu_dtype)
        ws.append(w)                 # 1-row linear biases stay f32
    return ws


def build_decoder_forward(params, B, S, S_enc, *, n_heads, d_k, eps=1e-12,
                          mxu_dtype=jnp.bfloat16):
    D = params["emb_table"].shape[1]
    F = params["layers"][0]["ff_w1"].shape[1]
    V = params["out_w"].shape[1]

    layer_call = make_decoder_layer(B, S, S_enc, D, F, n_heads=n_heads, d_k=d_k,
                                    eps=eps, mxu_dtype=mxu_dtype)
    out_call = make_output_linear(B, S, D, V, v_tile=_pick_vocab_tile(V),
                                  mxu_dtype=mxu_dtype)

    @jax.jit
    def forward(trg_tokens, enc_src, trg_mask, src_mask, params):
        x = transformer_embedding(trg_tokens, params["emb_table"],
                                  params["pos_encoding"])
        # masked_fill(mask==0, -1e9) -> additive f32 bias (exact, no bf16 trip).
        neg = jnp.float32(-1e9)
        trg_bias = jnp.where(trg_mask == 0, neg, jnp.float32(0.0))
        src_bias = jnp.where(src_mask == 0, neg, jnp.float32(0.0))
        enc_lo = enc_src.astype(mxu_dtype)   # bf16 K/V input: half HBM bytes
        for lp in params["layers"]:
            x = layer_call(x, enc_lo, trg_bias, src_bias,
                           *_layer_weights(lp, mxu_dtype))
        return out_call(x, params["out_w"].astype(mxu_dtype), params["out_b"])

    return forward


# ---------------------------------------------------------------------------
# Pure-JAX reference.  mxu_dtype=float32 mirrors the PyTorch forward exactly;
# mxu_dtype=bfloat16 applies the same operand casts as the kernel (f32 accum),
# giving a tight "cast-matched" check of the kernel logic.
# ---------------------------------------------------------------------------
def decoder_layer_ref(dec, enc, trg_mask, src_mask, p, *, n_heads, d_k, eps,
                      mxu_dtype):
    D = dec.shape[-1]
    Dh = D // n_heads
    scale = 1.0 / math.sqrt(d_k / n_heads)
    f32 = jnp.float32
    prec = jax.lax.Precision.HIGHEST
    lo = lambda t: t.astype(mxu_dtype)

    def ln(x):
        mean = jnp.mean(x, -1, keepdims=True)
        var = jnp.mean(jnp.square(x - mean), -1, keepdims=True)
        return (x - mean) / jnp.sqrt(var + eps)

    def mm(a, b):
        return jnp.matmul(lo(a), lo(b), precision=prec, preferred_element_type=f32)

    def mha(q_in, kv_in, mask, wq, bq, wk, bk, wv, bv, wo, bo):
        q = (mm(q_in, wq) + bq) * scale
        k = mm(kv_in, wk) + bk
        v = mm(kv_in, wv) + bv

        def split(t):
            return t.reshape(t.shape[0], t.shape[1], n_heads, Dh).transpose(0, 2, 1, 3)

        qh, kh, vh = split(lo(q)), split(lo(k)), split(lo(v))
        s = jnp.einsum("bhqd,bhkd->bhqk", qh, kh, precision=prec,
                       preferred_element_type=f32)
        s = jnp.where(mask[:, None, :, :] == 0, f32(-1e9), s)
        pr = jax.nn.softmax(s, axis=-1)
        ctx = jnp.einsum("bhqk,bhkd->bhqd", lo(pr), vh, precision=prec,
                         preferred_element_type=f32)
        ctx = ctx.transpose(0, 2, 1, 3).reshape(q_in.shape[0], q_in.shape[1], D)
        return mm(ctx, wo) + bo

    x = ln(mha(dec, dec, trg_mask, p["sa_wq"], p["sa_bq"], p["sa_wk"], p["sa_bk"],
               p["sa_wv"], p["sa_bv"], p["sa_wo"], p["sa_bo"]) + dec)
    x = ln(mha(x, enc, src_mask, p["ca_wq"], p["ca_bq"], p["ca_wk"], p["ca_bk"],
               p["ca_wv"], p["ca_bv"], p["ca_wo"], p["ca_bo"]) + x)
    h = jnp.maximum(mm(x, p["ff_w1"]) + p["ff_b1"], 0.0)
    y = mm(h, p["ff_w2"]) + p["ff_b2"]
    return ln(y + x)


def decoder_ref(trg_tokens, enc_src, trg_mask, src_mask, params, *, n_heads, d_k,
                eps=1e-12, mxu_dtype=jnp.float32):
    x = transformer_embedding(trg_tokens, params["emb_table"],
                              params["pos_encoding"])
    for lp in params["layers"]:
        x = decoder_layer_ref(x, enc_src, trg_mask, src_mask, lp, n_heads=n_heads,
                              d_k=d_k, eps=eps, mxu_dtype=mxu_dtype)
    lo = lambda t: t.astype(mxu_dtype)
    return jnp.matmul(lo(x), lo(params["out_w"]),
                      precision=jax.lax.Precision.HIGHEST,
                      preferred_element_type=jnp.float32) + params["out_b"]


# ---------------------------------------------------------------------------
if __name__ == "__main__":
    B, S, S_ENC = 2, 32, 32
    D, H, F, V = 128, 4, 256, 128       # D and V multiples of 128 -> lane-dense
    N_LAYERS, MAX_LEN, D_K = 2, 64, 128

    key = jax.random.PRNGKey(0)
    keys = iter(jax.random.split(key, 64))

    def nrm(k, shape, scale=1.0):
        return scale * jax.random.normal(k, shape, jnp.float32)

    def linear_params(in_f, out_f):
        w = nrm(next(keys), (in_f, out_f), 1.0 / math.sqrt(in_f))
        b = nrm(next(keys), (1, out_f), 0.02)
        return w, b

    layers = []
    for _ in range(N_LAYERS):
        lp = {}
        for pref in ("sa", "ca"):
            for nm in ("q", "k", "v", "o"):
                w, b = linear_params(D, D)
                lp[f"{pref}_w{nm}"] = w
                lp[f"{pref}_b{nm}"] = b
        lp["ff_w1"], lp["ff_b1"] = linear_params(D, F)
        lp["ff_w2"], lp["ff_b2"] = linear_params(F, D)
        layers.append(lp)

    out_w, out_b = linear_params(D, V)
    params = {
        "emb_table": nrm(next(keys), (V, D)),          # dec_voc_size = V
        "pos_encoding": sinusoid_encoding(MAX_LEN, D),
        "layers": layers,
        "out_w": out_w,
        "out_b": out_b,
    }

    trg_tokens = jax.random.randint(next(keys), (B, S), 0, V, dtype=jnp.int32)
    enc_src = nrm(next(keys), (B, S_ENC, D))
    trg_mask = jnp.broadcast_to(jnp.tril(jnp.ones((S, S), jnp.float32)), (B, S, S))
    src_mask = jnp.ones((B, S, S_ENC), jnp.float32)

    forward = build_decoder_forward(params, B, S, S_ENC, n_heads=H, d_k=D_K,
                                    mxu_dtype=jnp.bfloat16)
    out = jax.block_until_ready(
        forward(trg_tokens, enc_src, trg_mask, src_mask, params))

    # (a) Tight check of kernel logic against a cast-matched reference
    #     (same bf16 MXU feeds, f32 accumulation / softmax / LayerNorm).
    ref_matched = decoder_ref(trg_tokens, enc_src, trg_mask, src_mask, params,
                              n_heads=H, d_k=D_K, mxu_dtype=jnp.bfloat16)
    np.testing.assert_allclose(np.asarray(out), np.asarray(ref_matched),
                               rtol=3e-2, atol=3e-2)

    # (b) Sanity bound against the exact float32 PyTorch-equivalent reference
    #     (covers the expected bf16-MXU-feed mixed-precision drift).
    ref_exact = decoder_ref(trg_tokens, enc_src, trg_mask, src_mask, params,
                            n_heads=H, d_k=D_K, mxu_dtype=jnp.float32)
    np.testing.assert_allclose(np.asarray(out), np.asarray(ref_exact),
                               rtol=2e-1, atol=2e-1)

    print("KERNEL_OK")
</pallas_src>

<mosaic_0001>
module attributes {stable_mosaic.version = 11 : i64} {
  func.func @output_linear_kernel(%arg0: i32, %arg1: i32, %arg2: memref<1x32x128xf32, #tpu.memory_space<vmem>>, %arg3: memref<128x128xbf16, #tpu.memory_space<vmem>>, %arg4: memref<1x128xf32, #tpu.memory_space<vmem>>, %arg5: memref<1x32x128xf32, #tpu.memory_space<vmem>>) attributes {dimension_semantics = [#tpu.dimension_semantics<parallel>, #tpu.dimension_semantics<parallel>], iteration_bounds = array<i64: 2, 1>, scalar_prefetch = 0 : i64, scratch_operands = 0 : i64, tpu.core_type = #tpu.core_type<tc>, window_params = [{transform_indices = @transform_0, window_bounds = array<i64: 1, 32, 128>}, {transform_indices = @transform_1, window_bounds = array<i64: 128, 128>}, {transform_indices = @transform_2, window_bounds = array<i64: 1, 128>}, {transform_indices = @transform_3, window_bounds = array<i64: 1, 32, 128>}]} {
    %c0 = arith.constant 0 : index
    %c0_0 = arith.constant 0 : index
    %c0_1 = arith.constant 0 : index
    %0 = vector.load %arg2[%c0, %c0_0, %c0_1] : memref<1x32x128xf32, #tpu.memory_space<vmem>>, vector<1x32x128xf32>
    %1 = vector.shape_cast %0 : vector<1x32x128xf32> to vector<32x128xf32>
    %2 = arith.truncf %1 : vector<32x128xf32> to vector<32x128xbf16>
    %c0_2 = arith.constant 0 : index
    %c0_3 = arith.constant 0 : index
    %3 = vector.load %arg3[%c0_2, %c0_3] : memref<128x128xbf16, #tpu.memory_space<vmem>>, vector<128x128xbf16>
    %cst = arith.constant dense<0.000000e+00> : vector<32x128xf32>
    %4 = tpu.matmul %2, %3, %cst {dimension_numbers = #tpu.dot_dimension_numbers<[1], [0], [0], [1], [0, 0, 1, 1], [], []>} : vector<32x128xbf16>, vector<128x128xbf16>, vector<32x128xf32> -> vector<32x128xf32>
    %c0_4 = arith.constant 0 : index
    %c0_5 = arith.constant 0 : index
    %5 = vector.load %arg4[%c0_4, %c0_5] : memref<1x128xf32, #tpu.memory_space<vmem>>, vector<1x128xf32>
    %6 = vector.broadcast %5 : vector<1x128xf32> to vector<32x128xf32>
    %7 = arith.addf %4, %6 : vector<32x128xf32>
    %c0_6 = arith.constant 0 : index
    %c0_7 = arith.constant 0 : index
    %c0_8 = arith.constant 0 : index
    %8 = vector.load %arg5[%c0_6, %c0_7, %c0_8] : memref<1x32x128xf32, #tpu.memory_space<vmem>>, vector<1x32x128xf32>
    %9 = vector.shape_cast %8 : vector<1x32x128xf32> to vector<32x128xf32>
    %10 = vector.shape_cast %7 : vector<32x128xf32> to vector<1x32x128xf32>
    tpu.vector_store %arg5[%c0_6, %c0_7, %c0_8], %10 {strides = array<i32>} : memref<1x32x128xf32, #tpu.memory_space<vmem>>, vector<1x32x128xf32>,
    return
  }
  func.func @transform_0(%arg0: i32, %arg1: i32) -> (i32, i32, i32) {
    %c0_i32 = arith.constant 0 : i32
    %c0_i32_0 = arith.constant 0 : i32
    %c0_i32_1 = arith.constant 0 : i32
    return %arg0, %c0_i32, %c0_i32_0 : i32, i32, i32
  }
  func.func @transform_1(%arg0: i32, %arg1: i32) -> (i32, i32) {
    %c0_i32 = arith.constant 0 : i32
    %c0_i32_0 = arith.constant 0 : i32
    return %c0_i32, %arg1 : i32, i32
  }
  func.func @transform_2(%arg0: i32, %arg1: i32) -> (i32, i32) {
    %c0_i32 = arith.constant 0 : i32
    %c0_i32_0 = arith.constant 0 : i32
    return %c0_i32, %arg1 : i32, i32
  }
  func.func @transform_3(%arg0: i32, %arg1: i32) -> (i32, i32, i32) {
    %c0_i32 = arith.constant 0 : i32
    %c0_i32_0 = arith.constant 0 : i32
    return %arg0, %c0_i32, %arg1 : i32, i32, i32
  }
}

module attributes {stable_mosaic.version = 11 : i64} {
  func.func @decoder_layer_kernel(%arg0: i32, %arg1: memref<1x32x128xf32, #tpu.memory_space<vmem>>, %arg2: memref<1x32x128xbf16, #tpu.memory_space<vmem>>, %arg3: memref<1x32x32xf32, #tpu.memory_space<vmem>>, %arg4: memref<1x32x32xf32, #tpu.memory_space<vmem>>, %arg5: memref<128x128xbf16, #tpu.memory_space<vmem>>, %arg6: memref<1x128xf32, #tpu.memory_space<vmem>>, %arg7: memref<128x128xbf16, #tpu.memory_space<vmem>>, %arg8: memref<1x128xf32, #tpu.memory_space<vmem>>, %arg9: memref<128x128xbf16, #tpu.memory_space<vmem>>, %arg10: memref<1x128xf32, #tpu.memory_space<vmem>>, %arg11: memref<128x128xbf16, #tpu.memory_space<vmem>>, %arg12: memref<1x128xf32, #tpu.memory_space<vmem>>, %arg13: memref<128x128xbf16, #tpu.memory_space<vmem>>, %arg14: memref<1x128xf32, #tpu.memory_space<vmem>>, %arg15: memref<128x128xbf16, #tpu.memory_space<vmem>>, %arg16: memref<1x128xf32, #tpu.memory_space<vmem>>, %arg17: memref<128x128xbf16, #tpu.memory_space<vmem>>, %arg18: memref<1x128xf32, #tpu.memory_space<vmem>>, %arg19: memref<128x128xbf16, #tpu.memory_space<vmem>>, %arg20: memref<1x128xf32, #tpu.memory_space<vmem>>, %arg21: memref<128x256xbf16, #tpu.memory_space<vmem>>, %arg22: memref<1x256xf32, #tpu.memory_space<vmem>>, %arg23: memref<256x128xbf16, #tpu.memory_space<vmem>>, %arg24: memref<1x128xf32, #tpu.memory_space<vmem>>, %arg25: memref<1x32x128xf32, #tpu.memory_space<vmem>>, %arg26: memref<32x128xf32, #tpu.memory_space<vmem>>) attributes {dimension_semantics = [#tpu.dimension_semantics<parallel>], iteration_bounds = array<i64: 2>, scalar_prefetch = 0 : i64, scratch_operands = 1 : i64, tpu.core_type = #tpu.core_type<tc>, window_params = [{transform_indices = @transform_0, window_bounds = array<i64: 1, 32, 128>}, {transform_indices = @transform_1, window_bounds = array<i64: 1, 32, 128>}, {transform_indices = @transform_2, window_bounds = array<i64: 1, 32, 32>}, {transform_indices = @transform_3, window_bounds = array<i64: 1, 32, 32>}, {pipeline_mode = #tpu.pipeline_mode<synchronous>, transform_indices = @transform_4, window_bounds = array<i64: 128, 128>}, {pipeline_mode = #tpu.pipeline_mode<synchronous>, transform_indices = @transform_5, window_bounds = array<i64: 1, 128>}, {pipeline_mode = #tpu.pipeline_mode<synchronous>, transform_indices = @transform_6, window_bounds = array<i64: 128, 128>}, {pipeline_mode = #tpu.pipeline_mode<synchronous>, transform_indices = @transform_7, window_bounds = array<i64: 1, 128>}, {pipeline_mode = #tpu.pipeline_mode<synchronous>, transform_indices = @transform_8, window_bounds = array<i64: 128, 128>}, {pipeline_mode = #tpu.pipeline_mode<synchronous>, transform_indices = @transform_9, window_bounds = array<i64: 1, 128>}, {pipeline_mode = #tpu.pipeline_mode<synchronous>, transform_indices = @transform_10, window_bounds = array<i64: 128, 128>}, {pipeline_mode = #tpu.pipeline_mode<synchronous>, transform_indices = @transform_11, window_bounds = array<i64: 1, 128>}, {pipeline_mode = #tpu.pipeline_mode<synchronous>, transform_indices = @transform_12, window_bounds = array<i64: 128, 128>}, {pipeline_mode = #tpu.pipeline_mode<synchronous>, transform_indices = @transform_13, window_bounds = array<i64: 1, 128>}, {pipeline_mode = #tpu.pipeline_mode<synchronous>, transform_indices = @transform_14, window_bounds = array<i64: 128, 128>}, {pipeline_mode = #tpu.pipeline_mode<synchronous>, transform_indices = @transform_15, window_bounds = array<i64: 1, 128>}, {pipeline_mode = #tpu.pipeline_mode<synchronous>, transform_indices = @transform_16, window_bounds = array<i64: 128, 128>}, {pipeline_mode = #tpu.pipeline_mode<synchronous>, transform_indices = @transform_17, window_bounds = array<i64: 1, 128>}, {pipeline_mode = #tpu.pipeline_mode<synchronous>, transform_indices = @transform_18, window_bounds = array<i64: 128, 128>}, {pipeline_mode = #tpu.pipeline_mode<synchronous>, transform_indices = @transform_19, window_bounds = array<i64: 1, 128>}, {pipeline_mode = #tpu.pipeline_mode<synchronous>, transform_indices = @transform_20, window_bounds = array<i64: 128, 256>}, {pipeline_mode = #tpu.pipeline_mode<synchronous>, transform_indices = @transform_21, window_bounds = array<i64: 1, 256>}, {pipeline_mode = #tpu.pipeline_mode<synchronous>, transform_indices = @transform_22, window_bounds = array<i64: 256, 128>}, {pipeline_mode = #tpu.pipeline_mode<synchronous>, transform_indices = @transform_23, window_bounds = array<i64: 1, 128>}, {transform_indices = @transform_24, window_bounds = array<i64: 1, 32, 128>}]} {
    %c0 = arith.constant 0 : index
    %c0_0 = arith.constant 0 : index
    %c0_1 = arith.constant 0 : index
    %0 = vector.load %arg1[%c0, %c0_0, %c0_1] : memref<1x32x128xf32, #tpu.memory_space<vmem>>, vector<1x32x128xf32>
    %1 = vector.shape_cast %0 : vector<1x32x128xf32> to vector<32x128xf32>
    %2 = arith.truncf %1 : vector<32x128xf32> to vector<32x128xbf16>
    %c0_2 = arith.constant 0 : index
    %c0_3 = arith.constant 0 : index
    %c0_4 = arith.constant 0 : index
    %3 = vector.load %arg2[%c0_2, %c0_3, %c0_4] : memref<1x32x128xbf16, #tpu.memory_space<vmem>>, vector<1x32x128xbf16>
    %4 = vector.shape_cast %3 : vector<1x32x128xbf16> to vector<32x128xbf16>
    %c0_5 = arith.constant 0 : index
    %c0_6 = arith.constant 0 : index
    %c0_7 = arith.constant 0 : index
    %5 = vector.load %arg3[%c0_5, %c0_6, %c0_7] : memref<1x32x32xf32, #tpu.memory_space<vmem>>, vector<1x32x32xf32>
    %6 = vector.shape_cast %5 : vector<1x32x32xf32> to vector<32x32xf32>
    %c0_8 = arith.constant 0 : index
    %c0_9 = arith.constant 0 : index
    %c0_10 = arith.constant 0 : index
    %7 = vector.load %arg4[%c0_8, %c0_9, %c0_10] : memref<1x32x32xf32, #tpu.memory_space<vmem>>, vector<1x32x32xf32>
    %8 = vector.shape_cast %7 : vector<1x32x32xf32> to vector<32x32xf32>
    %9 = arith.truncf %1 : vector<32x128xf32> to vector<32x128xbf16>
    %c0_11 = arith.constant 0 : index
    %c0_12 = arith.constant 0 : index
    %10 = vector.load %arg5[%c0_11, %c0_12] : memref<128x128xbf16, #tpu.memory_space<vmem>>, vector<128x128xbf16>
    %cst = arith.constant dense<0.000000e+00> : vector<32x128xf32>
    %11 = tpu.matmul %9, %10, %cst {dimension_numbers = #tpu.dot_dimension_numbers<[1], [0], [0], [1], [0, 0, 1, 1], [], []>} : vector<32x128xbf16>, vector<128x128xbf16>, vector<32x128xf32> -> vector<32x128xf32>
    %c0_13 = arith.constant 0 : index
    %c0_14 = arith.constant 0 : index
    %12 = vector.load %arg6[%c0_13, %c0_14] : memref<1x128xf32, #tpu.memory_space<vmem>>, vector<1x128xf32>
    %13 = vector.broadcast %12 : vector<1x128xf32> to vector<32x128xf32>
    %14 = arith.addf %11, %13 : vector<32x128xf32>
    %c0_15 = arith.constant 0 : index
    %c0_16 = arith.constant 0 : index
    %15 = vector.load %arg7[%c0_15, %c0_16] : memref<128x128xbf16, #tpu.memory_space<vmem>>, vector<128x128xbf16>
    %cst_17 = arith.constant dense<0.000000e+00> : vector<32x128xf32>
    %16 = tpu.matmul %2, %15, %cst_17 {dimension_numbers = #tpu.dot_dimension_numbers<[1], [0], [0], [1], [0, 0, 1, 1], [], []>} : vector<32x128xbf16>, vector<128x128xbf16>, vector<32x128xf32> -> vector<32x128xf32>
    %c0_18 = arith.constant 0 : index
    %c0_19 = arith.constant 0 : index
    %17 = vector.load %arg8[%c0_18, %c0_19] : memref<1x128xf32, #tpu.memory_space<vmem>>, vector<1x128xf32>
    %18 = vector.broadcast %17 : vector<1x128xf32> to vector<32x128xf32>
    %19 = arith.addf %16, %18 : vector<32x128xf32>
    %c0_20 = arith.constant 0 : index
    %c0_21 = arith.constant 0 : index
    %20 = vector.load %arg9[%c0_20, %c0_21] : memref<128x128xbf16, #tpu.memory_space<vmem>>, vector<128x128xbf16>
    %cst_22 = arith.constant dense<0.000000e+00> : vector<32x128xf32>
    %21 = tpu.matmul %2, %20, %cst_22 {dimension_numbers = #tpu.dot_dimension_numbers<[1], [0], [0], [1], [0, 0, 1, 1], [], []>} : vector<32x128xbf16>, vector<128x128xbf16>, vector<32x128xf32> -> vector<32x128xf32>
    %c0_23 = arith.constant 0 : index
    %c0_24 = arith.constant 0 : index
    %22 = vector.load %arg10[%c0_23, %c0_24] : memref<1x128xf32, #tpu.memory_space<vmem>>, vector<1x128xf32>
    %23 = vector.broadcast %22 : vector<1x128xf32> to vector<32x128xf32>
    %24 = arith.addf %21, %23 : vector<32x128xf32>
    %cst_25 = arith.constant 0.176776692 : f32
    %25 = vector.broadcast %cst_25 : f32 to vector<32x128xf32>
    %26 = arith.mulf %14, %25 : vector<32x128xf32>
    %27 = arith.truncf %26 : vector<32x128xf32> to vector<32x128xbf16>
    %28 = arith.truncf %19 : vector<32x128xf32> to vector<32x128xbf16>
    %29 = arith.truncf %24 : vector<32x128xf32> to vector<32x128xbf16>
    %30 = vector.extract_strided_slice %27 {offsets = [0, 0], sizes = [32, 32], strides = [1, 1]} : vector<32x128xbf16> to vector<32x32xbf16>
    %31 = vector.extract_strided_slice %28 {offsets = [0, 0], sizes = [32, 32], strides = [1, 1]} : vector<32x128xbf16> to vector<32x32xbf16>
    %32 = vector.extract_strided_slice %29 {offsets = [0, 0], sizes = [32, 32], strides = [1, 1]} : vector<32x128xbf16> to vector<32x32xbf16>
    %cst_26 = arith.constant dense<0.000000e+00> : vector<32x32xf32>
    %33 = tpu.matmul %30, %31, %cst_26 {dimension_numbers = #tpu.dot_dimension_numbers<[1], [1], [0], [0], [0, 0, 1, 0], [], []>} : vector<32x32xbf16>, vector<32x32xbf16>, vector<32x32xf32> -> vector<32x32xf32>
    %34 = arith.addf %33, %6 : vector<32x32xf32>
    %cst_27 = arith.constant dense<0xFF800000> : vector<32xf32>
    %35 = vector.multi_reduction <maximumf>, %34, %cst_27 [1] : vector<32x32xf32> to vector<32xf32>
    %36 = vector.shape_cast %35 : vector<32xf32> to vector<32x1xf32>
    %37 = vector.broadcast %36 : vector<32x1xf32> to vector<32x32xf32>
    %38 = arith.subf %34, %37 : vector<32x32xf32>
    %39 = math.exp %38 : vector<32x32xf32>
    %cst_28 = arith.constant dense<0.000000e+00> : vector<32xf32>
    %40 = vector.multi_reduction <add>, %39, %cst_28 [1] : vector<32x32xf32> to vector<32xf32>
    %41 = vector.shape_cast %40 : vector<32xf32> to vector<32x1xf32>
    %42 = tpu.reciprocal %41 {approx = true} : vector<32x1xf32> -> vector<32x1xf32>
    %43 = vector.broadcast %42 : vector<32x1xf32> to vector<32x32xf32>
    %44 = arith.mulf %39, %43 : vector<32x32xf32>
    %45 = arith.truncf %44 : vector<32x32xf32> to vector<32x32xbf16>
    %cst_29 = arith.constant dense<0.000000e+00> : vector<32x32xf32>
    %46 = tpu.matmul %45, %32, %cst_29 {dimension_numbers = #tpu.dot_dimension_numbers<[1], [0], [0], [1], [0, 0, 1, 1], [], []>} : vector<32x32xbf16>, vector<32x32xbf16>, vector<32x32xf32> -> vector<32x32xf32>
    %c0_30 = arith.constant 0 : index
    %c0_31 = arith.constant 0 : index
    %47 = vector.load %arg26[%c0_30, %c0_31] : memref<32x128xf32, #tpu.memory_space<vmem>>, vector<32x32xf32>
    tpu.vector_store %arg26[%c0_30, %c0_31], %46 {strides = array<i32>} : memref<32x128xf32, #tpu.memory_space<vmem>>, vector<32x32xf32>,
    %48 = vector.extract_strided_slice %27 {offsets = [0, 32], sizes = [32, 32], strides = [1, 1]} : vector<32x128xbf16> to vector<32x32xbf16>
    %49 = vector.extract_strided_slice %28 {offsets = [0, 32], sizes = [32, 32], strides = [1, 1]} : vector<32x128xbf16> to vector<32x32xbf16>
    %50 = vector.extract_strided_slice %29 {offsets = [0, 32], sizes = [32, 32], strides = [1, 1]} : vector<32x128xbf16> to vector<32x32xbf16>
    %cst_32 = arith.constant dense<0.000000e+00> : vector<32x32xf32>
    %51 = tpu.matmul %48, %49, %cst_32 {dimension_numbers = #tpu.dot_dimension_numbers<[1], [1], [0], [0], [0, 0, 1, 0], [], []>} : vector<32x32xbf16>, vector<32x32xbf16>, vector<32x32xf32> -> vector<32x32xf32>
    %52 = arith.addf %51, %6 : vector<32x32xf32>
    %cst_33 = arith.constant dense<0xFF800000> : vector<32xf32>
    %53 = vector.multi_reduction <maximumf>, %52, %cst_33 [1] : vector<32x32xf32> to vector<32xf32>
    %54 = vector.shape_cast %53 : vector<32xf32> to vector<32x1xf32>
    %55 = vector.broadcast %54 : vector<32x1xf32> to vector<32x32xf32>
    %56 = arith.subf %52, %55 : vector<32x32xf32>
    %57 = math.exp %56 : vector<32x32xf32>
    %cst_34 = arith.constant dense<0.000000e+00> : vector<32xf32>
    %58 = vector.multi_reduction <add>, %57, %cst_34 [1] : vector<32x32xf32> to vector<32xf32>
    %59 = vector.shape_cast %58 : vector<32xf32> to vector<32x1xf32>
    %60 = tpu.reciprocal %59 {approx = true} : vector<32x1xf32> -> vector<32x1xf32>
    %61 = vector.broadcast %60 : vector<32x1xf32> to vector<32x32xf32>
    %62 = arith.mulf %57, %61 : vector<32x32xf32>
    %63 = arith.truncf %62 : vector<32x32xf32> to vector<32x32xbf16>
    %cst_35 = arith.constant dense<0.000000e+00> : vector<32x32xf32>
    %64 = tpu.matmul %63, %50, %cst_35 {dimension_numbers = #tpu.dot_dimension_numbers<[1], [0], [0], [1], [0, 0, 1, 1], [], []>} : vector<32x32xbf16>, vector<32x32xbf16>, vector<32x32xf32> -> vector<32x32xf32>
    %c0_36 = arith.constant 0 : index
    %c32 = arith.constant 32 : index
    %65 = vector.load %arg26[%c0_36, %c32] : memref<32x128xf32, #tpu.memory_space<vmem>>, vector<32x32xf32>
    tpu.vector_store %arg26[%c0_36, %c32], %64 {strides = array<i32>} : memref<32x128xf32, #tpu.memory_space<vmem>>, vector<32x32xf32>,
    %66 = vector.extract_strided_slice %27 {offsets = [0, 64], sizes = [32, 32], strides = [1, 1]} : vector<32x128xbf16> to vector<32x32xbf16>
    %67 = vector.extract_strided_slice %28 {offsets = [0, 64], sizes = [32, 32], strides = [1, 1]} : vector<32x128xbf16> to vector<32x32xbf16>
    %68 = vector.extract_strided_slice %29 {offsets = [0, 64], sizes = [32, 32], strides = [1, 1]} : vector<32x128xbf16> to vector<32x32xbf16>
    %cst_37 = arith.constant dense<0.000000e+00> : vector<32x32xf32>
    %69 = tpu.matmul %66, %67, %cst_37 {dimension_numbers = #tpu.dot_dimension_numbers<[1], [1], [0], [0], [0, 0, 1, 0], [], []>} : vector<32x32xbf16>, vector<32x32xbf16>, vector<32x32xf32> -> vector<32x32xf32>
    %70 = arith.addf %69, %6 : vector<32x32xf32>
    %cst_38 = arith.constant dense<0xFF800000> : vector<32xf32>
    %71 = vector.multi_reduction <maximumf>, %70, %cst_38 [1] : vector<32x32xf32> to vector<32xf32>
    %72 = vector.shape_cast %71 : vector<32xf32> to vector<32x1xf32>
    %73 = vector.broadcast %72 : vector<32x1xf32> to vector<32x32xf32>
    %74 = arith.subf %70, %73 : vector<32x32xf32>
    %75 = math.exp %74 : vector<32x32xf32>
    %cst_39 = arith.constant dense<0.000000e+00> : vector<32xf32>
    %76 = vector.multi_reduction <add>, %75, %cst_39 [1] : vector<32x32xf32> to vector<32xf32>
    %77 = vector.shape_cast %76 : vector<32xf32> to vector<32x1xf32>
    %78 = tpu.reciprocal %77 {approx = true} : vector<32x1xf32> -> vector<32x1xf32>
    %79 = vector.broadcast %78 : vector<32x1xf32> to vector<32x32xf32>
    %80 = arith.mulf %75, %79 : vector<32x32xf32>
    %81 = arith.truncf %80 : vector<32x32xf32> to vector<32x32xbf16>
    %cst_40 = arith.constant dense<0.000000e+00> : vector<32x32xf32>
    %82 = tpu.matmul %81, %68, %cst_40 {dimension_numbers = #tpu.dot_dimension_numbers<[1], [0], [0], [1], [0, 0, 1, 1], [], []>} : vector<32x32xbf16>, vector<32x32xbf16>, vector<32x32xf32> -> vector<32x32xf32>
    %c0_41 = arith.constant 0 : index
    %c64 = arith.constant 64 : index
    %83 = vector.load %arg26[%c0_41, %c64] : memref<32x128xf32, #tpu.memory_space<vmem>>, vector<32x32xf32>
    tpu.vector_store %arg26[%c0_41, %c64], %82 {strides = array<i32>} : memref<32x128xf32, #tpu.memory_space<vmem>>, vector<32x32xf32>,
    %84 = vector.extract_strided_slice %27 {offsets = [0, 96], sizes = [32, 32], strides = [1, 1]} : vector<32x128xbf16> to vector<32x32xbf16>
    %85 = vector.extract_strided_slice %28 {offsets = [0, 96], sizes = [32, 32], strides = [1, 1]} : vector<32x128xbf16> to vector<32x32xbf16>
    %86 = vector.extract_strided_slice %29 {offsets = [0, 96], sizes = [32, 32], strides = [1, 1]} : vector<32x128xbf16> to vector<32x32xbf16>
    %cst_42 = arith.constant dense<0.000000e+00> : vector<32x32xf32>
    %87 = tpu.matmul %84, %85, %cst_42 {dimension_numbers = #tpu.dot_dimension_numbers<[1], [1], [0], [0], [0, 0, 1, 0], [], []>} : vector<32x32xbf16>, vector<32x32xbf16>, vector<32x32xf32> -> vector<32x32xf32>
    %88 = arith.addf %87, %6 : vector<32x32xf32>
    %cst_43 = arith.constant dense<0xFF800000> : vector<32xf32>
    %89 = vector.multi_reduction <maximumf>, %88, %cst_43 [1] : vector<32x32xf32> to vector<32xf32>
    %90 = vector.shape_cast %89 : vector<32xf32> to vector<32x1xf32>
    %91 = vector.broadcast %90 : vector<32x1xf32> to vector<32x32xf32>
    %92 = arith.subf %88, %91 : vector<32x32xf32>
    %93 = math.exp %92 : vector<32x32xf32>
    %cst_44 = arith.constant dense<0.000000e+00> : vector<32xf32>
    %94 = vector.multi_reduction <add>, %93, %cst_44 [1] : vector<32x32xf32> to vector<32xf32>
    %95 = vector.shape_cast %94 : vector<32xf32> to vector<32x1xf32>
    %96 = tpu.reciprocal %95 {approx = true} : vector<32x1xf32> -> vector<32x1xf32>
    %97 = vector.broadcast %96 : vector<32x1xf32> to vector<32x32xf32>
    %98 = arith.mulf %93, %97 : vector<32x32xf32>
    %99 = arith.truncf %98 : vector<32x32xf32> to vector<32x32xbf16>
    %cst_45 = arith.constant dense<0.000000e+00> : vector<32x32xf32>
    %100 = tpu.matmul %99, %86, %cst_45 {dimension_numbers = #tpu.dot_dimension_numbers<[1], [0], [0], [1], [0, 0, 1, 1], [], []>} : vector<32x32xbf16>, vector<32x32xbf16>, vector<32x32xf32> -> vector<32x32xf32>
    %c0_46 = arith.constant 0 : index
    %c96 = arith.constant 96 : index
    %101 = vector.load %arg26[%c0_46, %c96] : memref<32x128xf32, #tpu.memory_space<vmem>>, vector<32x32xf32>
    tpu.vector_store %arg26[%c0_46, %c96], %100 {strides = array<i32>} : memref<32x128xf32, #tpu.memory_space<vmem>>, vector<32x32xf32>,
    %c0_47 = arith.constant 0 : index
    %c0_48 = arith.constant 0 : index
    %102 = vector.load %arg26[%c0_47, %c0_48] : memref<32x128xf32, #tpu.memory_space<vmem>>, vector<32x128xf32>
    %103 = arith.truncf %102 : vector<32x128xf32> to vector<32x128xbf16>
    %c0_49 = arith.constant 0 : index
    %c0_50 = arith.constant 0 : index
    %104 = vector.load %arg11[%c0_49, %c0_50] : memref<128x128xbf16, #tpu.memory_space<vmem>>, vector<128x128xbf16>
    %cst_51 = arith.constant dense<0.000000e+00> : vector<32x128xf32>
    %105 = tpu.matmul %103, %104, %cst_51 {dimension_numbers = #tpu.dot_dimension_numbers<[1], [0], [0], [1], [0, 0, 1, 1], [], []>} : vector<32x128xbf16>, vector<128x128xbf16>, vector<32x128xf32> -> vector<32x128xf32>
    %c0_52 = arith.constant 0 : index
    %c0_53 = arith.constant 0 : index
    %106 = vector.load %arg12[%c0_52, %c0_53] : memref<1x128xf32, #tpu.memory_space<vmem>>, vector<1x128xf32>
    %107 = vector.broadcast %106 : vector<1x128xf32> to vector<32x128xf32>
    %108 = arith.addf %105, %107 : vector<32x128xf32>
    %109 = arith.addf %108, %1 : vector<32x128xf32>
    %cst_54 = arith.constant dense<0.000000e+00> : vector<32xf32>
    %110 = vector.multi_reduction <add>, %109, %cst_54 [1] : vector<32x128xf32> to vector<32xf32>
    %111 = vector.shape_cast %110 : vector<32xf32> to vector<32x1xf32>
    %cst_55 = arith.constant 1.280000e+02 : f32
    %112 = vector.broadcast %cst_55 : f32 to vector<32x1xf32>
    %113 = arith.divf %111, %112 : vector<32x1xf32>
    %114 = vector.broadcast %113 : vector<32x1xf32> to vector<32x128xf32>
    %115 = arith.subf %109, %114 : vector<32x128xf32>
    %116 = arith.mulf %115, %115 : vector<32x128xf32>
    %cst_56 = arith.constant dense<0.000000e+00> : vector<32xf32>
    %117 = vector.multi_reduction <add>, %116, %cst_56 [1] : vector<32x128xf32> to vector<32xf32>
    %118 = vector.shape_cast %117 : vector<32xf32> to vector<32x1xf32>
    %cst_57 = arith.constant 1.280000e+02 : f32
    %119 = vector.broadcast %cst_57 : f32 to vector<32x1xf32>
    %120 = arith.divf %118, %119 : vector<32x1xf32>
    %cst_58 = arith.constant 9.99999996E-13 : f32
    %121 = vector.broadcast %cst_58 : f32 to vector<32x1xf32>
    %122 = arith.addf %120, %121 : vector<32x1xf32>
    %123 = math.rsqrt %122 : vector<32x1xf32>
    %124 = vector.broadcast %123 : vector<32x1xf32> to vector<32x128xf32>
    %125 = arith.mulf %115, %124 : vector<32x128xf32>
    %126 = arith.truncf %125 : vector<32x128xf32> to vector<32x128xbf16>
    %c0_59 = arith.constant 0 : index
    %c0_60 = arith.constant 0 : index
    %127 = vector.load %arg13[%c0_59, %c0_60] : memref<128x128xbf16, #tpu.memory_space<vmem>>, vector<128x128xbf16>
    %cst_61 = arith.constant dense<0.000000e+00> : vector<32x128xf32>
    %128 = tpu.matmul %126, %127, %cst_61 {dimension_numbers = #tpu.dot_dimension_numbers<[1], [0], [0], [1], [0, 0, 1, 1], [], []>} : vector<32x128xbf16>, vector<128x128xbf16>, vector<32x128xf32> -> vector<32x128xf32>
    %c0_62 = arith.constant 0 : index
    %c0_63 = arith.constant 0 : index
    %129 = vector.load %arg14[%c0_62, %c0_63] : memref<1x128xf32, #tpu.memory_space<vmem>>, vector<1x128xf32>
    %130 = vector.broadcast %129 : vector<1x128xf32> to vector<32x128xf32>
    %131 = arith.addf %128, %130 : vector<32x128xf32>
    %c0_64 = arith.constant 0 : index
    %c0_65 = arith.constant 0 : index
    %132 = vector.load %arg15[%c0_64, %c0_65] : memref<128x128xbf16, #tpu.memory_space<vmem>>, vector<128x128xbf16>
    %cst_66 = arith.constant dense<0.000000e+00> : vector<32x128xf32>
    %133 = tpu.matmul %4, %132, %cst_66 {dimension_numbers = #tpu.dot_dimension_numbers<[1], [0], [0], [1], [0, 0, 1, 1], [], []>} : vector<32x128xbf16>, vector<128x128xbf16>, vector<32x128xf32> -> vector<32x128xf32>
    %c0_67 = arith.constant 0 : index
    %c0_68 = arith.constant 0 : index
    %134 = vector.load %arg16[%c0_67, %c0_68] : memref<1x128xf32, #tpu.memory_space<vmem>>, vector<1x128xf32>
    %135 = vector.broadcast %134 : vector<1x128xf32> to vector<32x128xf32>
    %136 = arith.addf %133, %135 : vector<32x128xf32>
    %c0_69 = arith.constant 0 : index
    %c0_70 = arith.constant 0 : index
    %137 = vector.load %arg17[%c0_69, %c0_70] : memref<128x128xbf16, #tpu.memory_space<vmem>>, vector<128x128xbf16>
    %cst_71 = arith.constant dense<0.000000e+00> : vector<32x128xf32>
    %138 = tpu.matmul %4, %137, %cst_71 {dimension_numbers = #tpu.dot_dimension_numbers<[1], [0], [0], [1], [0, 0, 1, 1], [], []>} : vector<32x128xbf16>, vector<128x128xbf16>, vector<32x128xf32> -> vector<32x128xf32>
    %c0_72 = arith.constant 0 : index
    %c0_73 = arith.constant 0 : index
    %139 = vector.load %arg18[%c0_72, %c0_73] : memref<1x128xf32, #tpu.memory_space<vmem>>, vector<1x128xf32>
    %140 = vector.broadcast %139 : vector<1x128xf32> to vector<32x128xf32>
    %141 = arith.addf %138, %140 : vector<32x128xf32>
    %cst_74 = arith.constant 0.176776692 : f32
    %142 = vector.broadcast %cst_74 : f32 to vector<32x128xf32>
    %143 = arith.mulf %131, %142 : vector<32x128xf32>
    %144 = arith.truncf %143 : vector<32x128xf32> to vector<32x128xbf16>
    %145 = arith.truncf %136 : vector<32x128xf32> to vector<32x128xbf16>
    %146 = arith.truncf %141 : vector<32x128xf32> to vector<32x128xbf16>
    %147 = vector.extract_strided_slice %144 {offsets = [0, 0], sizes = [32, 32], strides = [1, 1]} : vector<32x128xbf16> to vector<32x32xbf16>
    %148 = vector.extract_strided_slice %145 {offsets = [0, 0], sizes = [32, 32], strides = [1, 1]} : vector<32x128xbf16> to vector<32x32xbf16>
    %149 = vector.extract_strided_slice %146 {offsets = [0, 0], sizes = [32, 32], strides = [1, 1]} : vector<32x128xbf16> to vector<32x32xbf16>
    %cst_75 = arith.constant dense<0.000000e+00> : vector<32x32xf32>
    %150 = tpu.matmul %147, %148, %cst_75 {dimension_numbers = #tpu.dot_dimension_numbers<[1], [1], [0], [0], [0, 0, 1, 0], [], []>} : vector<32x32xbf16>, vector<32x32xbf16>, vector<32x32xf32> -> vector<32x32xf32>
    %151 = arith.addf %150, %8 : vector<32x32xf32>
    %cst_76 = arith.constant dense<0xFF800000> : vector<32xf32>
    %152 = vector.multi_reduction <maximumf>, %151, %cst_76 [1] : vector<32x32xf32> to vector<32xf32>
    %153 = vector.shape_cast %152 : vector<32xf32> to vector<32x1xf32>
    %154 = vector.broadcast %153 : vector<32x1xf32> to vector<32x32xf32>
    %155 = arith.subf %151, %154 : vector<32x32xf32>
    %156 = math.exp %155 : vector<32x32xf32>
    %cst_77 = arith.constant dense<0.000000e+00> : vector<32xf32>
    %157 = vector.multi_reduction <add>, %156, %cst_77 [1] : vector<32x32xf32> to vector<32xf32>
    %158 = vector.shape_cast %157 : vector<32xf32> to vector<32x1xf32>
    %159 = tpu.reciprocal %158 {approx = true} : vector<32x1xf32> -> vector<32x1xf32>
    %160 = vector.broadcast %159 : vector<32x1xf32> to vector<32x32xf32>
    %161 = arith.mulf %156, %160 : vector<32x32xf32>
    %162 = arith.truncf %161 : vector<32x32xf32> to vector<32x32xbf16>
    %cst_78 = arith.constant dense<0.000000e+00> : vector<32x32xf32>
    %163 = tpu.matmul %162, %149, %cst_78 {dimension_numbers = #tpu.dot_dimension_numbers<[1], [0], [0], [1], [0, 0, 1, 1], [], []>} : vector<32x32xbf16>, vector<32x32xbf16>, vector<32x32xf32> -> vector<32x32xf32>
    %c0_79 = arith.constant 0 : index
    %c0_80 = arith.constant 0 : index
    %164 = vector.load %arg26[%c0_79, %c0_80] : memref<32x128xf32, #tpu.memory_space<vmem>>, vector<32x32xf32>
    tpu.vector_store %arg26[%c0_79, %c0_80], %163 {strides = array<i32>} : memref<32x128xf32, #tpu.memory_space<vmem>>, vector<32x32xf32>,
    %165 = vector.extract_strided_slice %144 {offsets = [0, 32], sizes = [32, 32], strides = [1, 1]} : vector<32x128xbf16> to vector<32x32xbf16>
    %166 = vector.extract_strided_slice %145 {offsets = [0, 32], sizes = [32, 32], strides = [1, 1]} : vector<32x128xbf16> to vector<32x32xbf16>
    %167 = vector.extract_strided_slice %146 {offsets = [0, 32], sizes = [32, 32], strides = [1, 1]} : vector<32x128xbf16> to vector<32x32xbf16>
    %cst_81 = arith.constant dense<0.000000e+00> : vector<32x32xf32>
    %168 = tpu.matmul %165, %166, %cst_81 {dimension_numbers = #tpu.dot_dimension_numbers<[1], [1], [0], [0], [0, 0, 1, 0], [], []>} : vector<32x32xbf16>, vector<32x32xbf16>, vector<32x32xf32> -> vector<32x32xf32>
    %169 = arith.addf %168, %8 : vector<32x32xf32>
    %cst_82 = arith.constant dense<0xFF800000> : vector<32xf32>
    %170 = vector.multi_reduction <maximumf>, %169, %cst_82 [1] : vector<32x32xf32> to vector<32xf32>
    %171 = vector.shape_cast %170 : vector<32xf32> to vector<32x1xf32>
    %172 = vector.broadcast %171 : vector<32x1xf32> to vector<32x32xf32>
    %173 = arith.subf %169, %172 : vector<32x32xf32>
    %174 = math.exp %173 : vector<32x32xf32>
    %cst_83 = arith.constant dense<0.000000e+00> : vector<32xf32>
    %175 = vector.multi_reduction <add>, %174, %cst_83 [1] : vector<32x32xf32> to vector<32xf32>
    %176 = vector.shape_cast %175 : vector<32xf32> to vector<32x1xf32>
    %177 = tpu.reciprocal %176 {approx = true} : vector<32x1xf32> -> vector<32x1xf32>
    %178 = vector.broadcast %177 : vector<32x1xf32> to vector<32x32xf32>
    %179 = arith.mulf %174, %178 : vector<32x32xf32>
    %180 = arith.truncf %179 : vector<32x32xf32> to vector<32x32xbf16>
    %cst_84 = arith.constant dense<0.000000e+00> : vector<32x32xf32>
    %181 = tpu.matmul %180, %167, %cst_84 {dimension_numbers = #tpu.dot_dimension_numbers<[1], [0], [0], [1], [0, 0, 1, 1], [], []>} : vector<32x32xbf16>, vector<32x32xbf16>, vector<32x32xf32> -> vector<32x32xf32>
    %c0_85 = arith.constant 0 : index
    %c32_86 = arith.constant 32 : index
    %182 = vector.load %arg26[%c0_85, %c32_86] : memref<32x128xf32, #tpu.memory_space<vmem>>, vector<32x32xf32>
    tpu.vector_store %arg26[%c0_85, %c32_86], %181 {strides = array<i32>} : memref<32x128xf32, #tpu.memory_space<vmem>>, vector<32x32xf32>,
    %183 = vector.extract_strided_slice %144 {offsets = [0, 64], sizes = [32, 32], strides = [1, 1]} : vector<32x128xbf16> to vector<32x32xbf16>
    %184 = vector.extract_strided_slice %145 {offsets = [0, 64], sizes = [32, 32], strides = [1, 1]} : vector<32x128xbf16> to vector<32x32xbf16>
    %185 = vector.extract_strided_slice %146 {offsets = [0, 64], sizes = [32, 32], strides = [1, 1]} : vector<32x128xbf16> to vector<32x32xbf16>
    %cst_87 = arith.constant dense<0.000000e+00> : vector<32x32xf32>
    %186 = tpu.matmul %183, %184, %cst_87 {dimension_numbers = #tpu.dot_dimension_numbers<[1], [1], [0], [0], [0, 0, 1, 0], [], []>} : vector<32x32xbf16>, vector<32x32xbf16>, vector<32x32xf32> -> vector<32x32xf32>
    %187 = arith.addf %186, %8 : vector<32x32xf32>
    %cst_88 = arith.constant dense<0xFF800000> : vector<32xf32>
    %188 = vector.multi_reduction <maximumf>, %187, %cst_88 [1] : vector<32x32xf32> to vector<32xf32>
    %189 = vector.shape_cast %188 : vector<32xf32> to vector<32x1xf32>
    %190 = vector.broadcast %189 : vector<32x1xf32> to vector<32x32xf32>
    %191 = arith.subf %187, %190 : vector<32x32xf32>
    %192 = math.exp %191 : vector<32x32xf32>
    %cst_89 = arith.constant dense<0.000000e+00> : vector<32xf32>
    %193 = vector.multi_reduction <add>, %192, %cst_89 [1] : vector<32x32xf32> to vector<32xf32>
    %194 = vector.shape_cast %193 : vector<32xf32> to vector<32x1xf32>
    %195 = tpu.reciprocal %194 {approx = true} : vector<32x1xf32> -> vector<32x1xf32>
    %196 = vector.broadcast %195 : vector<32x1xf32> to vector<32x32xf32>
    %197 = arith.mulf %192, %196 : vector<32x32xf32>
    %198 = arith.truncf %197 : vector<32x32xf32> to vector<32x32xbf16>
    %cst_90 = arith.constant dense<0.000000e+00> : vector<32x32xf32>
    %199 = tpu.matmul %198, %185, %cst_90 {dimension_numbers = #tpu.dot_dimension_numbers<[1], [0], [0], [1], [0, 0, 1, 1], [], []>} : vector<32x32xbf16>, vector<32x32xbf16>, vector<32x32xf32> -> vector<32x32xf32>
    %c0_91 = arith.constant 0 : index
    %c64_92 = arith.constant 64 : index
    %200 = vector.load %arg26[%c0_91, %c64_92] : memref<32x128xf32, #tpu.memory_space<vmem>>, vector<32x32xf32>
    tpu.vector_store %arg26[%c0_91, %c64_92], %199 {strides = array<i32>} : memref<32x128xf32, #tpu.memory_space<vmem>>, vector<32x32xf32>,
    %201 = vector.extract_strided_slice %144 {offsets = [0, 96], sizes = [32, 32], strides = [1, 1]} : vector<32x128xbf16> to vector<32x32xbf16>
    %202 = vector.extract_strided_slice %145 {offsets = [0, 96], sizes = [32, 32], strides = [1, 1]} : vector<32x128xbf16> to vector<32x32xbf16>
    %203 = vector.extract_strided_slice %146 {offsets = [0, 96], sizes = [32, 32], strides = [1, 1]} : vector<32x128xbf16> to vector<32x32xbf16>
    %cst_93 = arith.constant dense<0.000000e+00> : vector<32x32xf32>
    %204 = tpu.matmul %201, %202, %cst_93 {dimension_numbers = #tpu.dot_dimension_numbers<[1], [1], [0], [0], [0, 0, 1, 0], [], []>} : vector<32x32xbf16>, vector<32x32xbf16>, vector<32x32xf32> -> vector<32x32xf32>
    %205 = arith.addf %204, %8 : vector<32x32xf32>
    %cst_94 = arith.constant dense<0xFF800000> : vector<32xf32>
    %206 = vector.multi_reduction <maximumf>, %205, %cst_94 [1] : vector<32x32xf32> to vector<32xf32>
    %207 = vector.shape_cast %206 : vector<32xf32> to vector<32x1xf32>
    %208 = vector.broadcast %207 : vector<32x1xf32> to vector<32x32xf32>
    %209 = arith.subf %205, %208 : vector<32x32xf32>
    %210 = math.exp %209 : vector<32x32xf32>
    %cst_95 = arith.constant dense<0.000000e+00> : vector<32xf32>
    %211 = vector.multi_reduction <add>, %210, %cst_95 [1] : vector<32x32xf32> to vector<32xf32>
    %212 = vector.shape_cast %211 : vector<32xf32> to vector<32x1xf32>
    %213 = tpu.reciprocal %212 {approx = true} : vector<32x1xf32> -> vector<32x1xf32>
    %214 = vector.broadcast %213 : vector<32x1xf32> to vector<32x32xf32>
    %215 = arith.mulf %210, %214 : vector<32x32xf32>
    %216 = arith.truncf %215 : vector<32x32xf32> to vector<32x32xbf16>
    %cst_96 = arith.constant dense<0.000000e+00> : vector<32x32xf32>
    %217 = tpu.matmul %216, %203, %cst_96 {dimension_numbers = #tpu.dot_dimension_numbers<[1], [0], [0], [1], [0, 0, 1, 1], [], []>} : vector<32x32xbf16>, vector<32x32xbf16>, vector<32x32xf32> -> vector<32x32xf32>
    %c0_97 = arith.constant 0 : index
    %c96_98 = arith.constant 96 : index
    %218 = vector.load %arg26[%c0_97, %c96_98] : memref<32x128xf32, #tpu.memory_space<vmem>>, vector<32x32xf32>
    tpu.vector_store %arg26[%c0_97, %c96_98], %217 {strides = array<i32>} : memref<32x128xf32, #tpu.memory_space<vmem>>, vector<32x32xf32>,
    %c0_99 = arith.constant 0 : index
    %c0_100 = arith.constant 0 : index
    %219 = vector.load %arg26[%c0_99, %c0_100] : memref<32x128xf32, #tpu.memory_space<vmem>>, vector<32x128xf32>
    %220 = arith.truncf %219 : vector<32x128xf32> to vector<32x128xbf16>
    %c0_101 = arith.constant 0 : index
    %c0_102 = arith.constant 0 : index
    %221 = vector.load %arg19[%c0_101, %c0_102] : memref<128x128xbf16, #tpu.memory_space<vmem>>, vector<128x128xbf16>
    %cst_103 = arith.constant dense<0.000000e+00> : vector<32x128xf32>
    %222 = tpu.matmul %220, %221, %cst_103 {dimension_numbers = #tpu.dot_dimension_numbers<[1], [0], [0], [1], [0, 0, 1, 1], [], []>} : vector<32x128xbf16>, vector<128x128xbf16>, vector<32x128xf32> -> vector<32x128xf32>
    %c0_104 = arith.constant 0 : index
    %c0_105 = arith.constant 0 : index
    %223 = vector.load %arg20[%c0_104, %c0_105] : memref<1x128xf32, #tpu.memory_space<vmem>>, vector<1x128xf32>
    %224 = vector.broadcast %223 : vector<1x128xf32> to vector<32x128xf32>
    %225 = arith.addf %222, %224 : vector<32x128xf32>
    %226 = arith.addf %225, %125 : vector<32x128xf32>
    %cst_106 = arith.constant dense<0.000000e+00> : vector<32xf32>
    %227 = vector.multi_reduction <add>, %226, %cst_106 [1] : vector<32x128xf32> to vector<32xf32>
    %228 = vector.shape_cast %227 : vector<32xf32> to vector<32x1xf32>
    %cst_107 = arith.constant 1.280000e+02 : f32
    %229 = vector.broadcast %cst_107 : f32 to vector<32x1xf32>
    %230 = arith.divf %228, %229 : vector<32x1xf32>
    %231 = vector.broadcast %230 : vector<32x1xf32> to vector<32x128xf32>
    %232 = arith.subf %226, %231 : vector<32x128xf32>
    %233 = arith.mulf %232, %232 : vector<32x128xf32>
    %cst_108 = arith.constant dense<0.000000e+00> : vector<32xf32>
    %234 = vector.multi_reduction <add>, %233, %cst_108 [1] : vector<32x128xf32> to vector<32xf32>
    %235 = vector.shape_cast %234 : vector<32xf32> to vector<32x1xf32>
    %cst_109 = arith.constant 1.280000e+02 : f32
    %236 = vector.broadcast %cst_109 : f32 to vector<32x1xf32>
    %237 = arith.divf %235, %236 : vector<32x1xf32>
    %cst_110 = arith.constant 9.99999996E-13 : f32
    %238 = vector.broadcast %cst_110 : f32 to vector<32x1xf32>
    %239 = arith.addf %237, %238 : vector<32x1xf32>
    %240 = math.rsqrt %239 : vector<32x1xf32>
    %241 = vector.broadcast %240 : vector<32x1xf32> to vector<32x128xf32>
    %242 = arith.mulf %232, %241 : vector<32x128xf32>
    %243 = arith.truncf %242 : vector<32x128xf32> to vector<32x128xbf16>
    %c0_111 = arith.constant 0 : index
    %c0_112 = arith.constant 0 : index
    %244 = vector.load %arg21[%c0_111, %c0_112] : memref<128x256xbf16, #tpu.memory_space<vmem>>, vector<128x256xbf16>
    %cst_113 = arith.constant dense<0.000000e+00> : vector<32x256xf32>
    %245 = tpu.matmul %243, %244, %cst_113 {dimension_numbers = #tpu.dot_dimension_numbers<[1], [0], [0], [1], [0, 0, 1, 1], [], []>} : vector<32x128xbf16>, vector<128x256xbf16>, vector<32x256xf32> -> vector<32x256xf32>
    %c0_114 = arith.constant 0 : index
    %c0_115 = arith.constant 0 : index
    %246 = vector.load %arg22[%c0_114, %c0_115] : memref<1x256xf32, #tpu.memory_space<vmem>>, vector<1x256xf32>
    %247 = vector.broadcast %246 : vector<1x256xf32> to vector<32x256xf32>
    %248 = arith.addf %245, %247 : vector<32x256xf32>
    %cst_116 = arith.constant 0.000000e+00 : f32
    %249 = vector.broadcast %cst_116 : f32 to vector<32x256xf32>
    %250 = arith.maximumf %248, %249 : vector<32x256xf32>
    %251 = arith.truncf %250 : vector<32x256xf32> to vector<32x256xbf16>
    %c0_117 = arith.constant 0 : index
    %c0_118 = arith.constant 0 : index
    %252 = vector.load %arg23[%c0_117, %c0_118] : memref<256x128xbf16, #tpu.memory_space<vmem>>, vector<256x128xbf16>
    %cst_119 = arith.constant dense<0.000000e+00> : vector<32x128xf32>
    %253 = tpu.matmul %251, %252, %cst_119 {dimension_numbers = #tpu.dot_dimension_numbers<[1], [0], [0], [1], [0, 0, 1, 1], [], []>} : vector<32x256xbf16>, vector<256x128xbf16>, vector<32x128xf32> -> vector<32x128xf32>
    %c0_120 = arith.constant 0 : index
    %c0_121 = arith.constant 0 : index
    %254 = vector.load %arg24[%c0_120, %c0_121] : memref<1x128xf32, #tpu.memory_space<vmem>>, vector<1x128xf32>
    %255 = vector.broadcast %254 : vector<1x128xf32> to vector<32x128xf32>
    %256 = arith.addf %253, %255 : vector<32x128xf32>
    %257 = arith.addf %256, %242 : vector<32x128xf32>
    %cst_122 = arith.constant dense<0.000000e+00> : vector<32xf32>
    %258 = vector.multi_reduction <add>, %257, %cst_122 [1] : vector<32x128xf32> to vector<32xf32>
    %259 = vector.shape_cast %258 : vector<32xf32> to vector<32x1xf32>
    %cst_123 = arith.constant 1.280000e+02 : f32
    %260 = vector.broadcast %cst_123 : f32 to vector<32x1xf32>
    %261 = arith.divf %259, %260 : vector<32x1xf32>
    %262 = vector.broadcast %261 : vector<32x1xf32> to vector<32x128xf32>
    %263 = arith.subf %257, %262 : vector<32x128xf32>
    %264 = arith.mulf %263, %263 : vector<32x128xf32>
    %cst_124 = arith.constant dense<0.000000e+00> : vector<32xf32>
    %265 = vector.multi_reduction <add>, %264, %cst_124 [1] : vector<32x128xf32> to vector<32xf32>
    %266 = vector.shape_cast %265 : vector<32xf32> to vector<32x1xf32>
    %cst_125 = arith.constant 1.280000e+02 : f32
    %267 = vector.broadcast %cst_125 : f32 to vector<32x1xf32>
    %268 = arith.divf %266, %267 : vector<32x1xf32>
    %cst_126 = arith.constant 9.99999996E-13 : f32
    %269 = vector.broadcast %cst_126 : f32 to vector<32x1xf32>
    %270 = arith.addf %268, %269 : vector<32x1xf32>
    %271 = math.rsqrt %270 : vector<32x1xf32>
    %272 = vector.broadcast %271 : vector<32x1xf32> to vector<32x128xf32>
    %273 = arith.mulf %263, %272 : vector<32x128xf32>
    %c0_127 = arith.constant 0 : index
    %c0_128 = arith.constant 0 : index
    %c0_129 = arith.constant 0 : index
    %274 = vector.load %arg25[%c0_127, %c0_128, %c0_129] : memref<1x32x128xf32, #tpu.memory_space<vmem>>, vector<1x32x128xf32>
    %275 = vector.shape_cast %274 : vector<1x32x128xf32> to vector<32x128xf32>
    %276 = vector.shape_cast %273 : vector<32x128xf32> to vector<1x32x128xf32>
    tpu.vector_store %arg25[%c0_127, %c0_128, %c0_129], %276 {strides = array<i32>} : memref<1x32x128xf32, #tpu.memory_space<vmem>>, vector<1x32x128xf32>,
    return
  }
  func.func @transform_0(%arg0: i32) -> (i32, i32, i32) {
    %c0_i32 = arith.constant 0 : i32
    %c0_i32_0 = arith.constant 0 : i32
    %c0_i32_1 = arith.constant 0 : i32
    return %arg0, %c0_i32, %c0_i32_0 : i32, i32, i32
  }
  func.func @transform_1(%arg0: i32) -> (i32, i32, i32) {
    %c0_i32 = arith.constant 0 : i32
    %c0_i32_0 = arith.constant 0 : i32
    %c0_i32_1 = arith.constant 0 : i32
    return %arg0, %c0_i32, %c0_i32_0 : i32, i32, i32
  }
  func.func @transform_2(%arg0: i32) -> (i32, i32, i32) {
    %c0_i32 = arith.constant 0 : i32
    %c0_i32_0 = arith.constant 0 : i32
    %c0_i32_1 = arith.constant 0 : i32
    return %arg0, %c0_i32, %c0_i32_0 : i32, i32, i32
  }
  func.func @transform_3(%arg0: i32) -> (i32, i32, i32) {
    %c0_i32 = arith.constant 0 : i32
    %c0_i32_0 = arith.constant 0 : i32
    %c0_i32_1 = arith.constant 0 : i32
    return %arg0, %c0_i32, %c0_i32_0 : i32, i32, i32
  }
  func.func @transform_4(%arg0: i32) -> (i32, i32) {
    %c0_i32 = arith.constant 0 : i32
    %c0_i32_0 = arith.constant 0 : i32
    %c0_i32_1 = arith.constant 0 : i32
    return %c0_i32, %c0_i32_0 : i32, i32
  }
  func.func @transform_5(%arg0: i32) -> (i32, i32) {
    %c0_i32 = arith.constant 0 : i32
    %c0_i32_0 = arith.constant 0 : i32
    %c0_i32_1 = arith.constant 0 : i32
    return %c0_i32, %c0_i32_0 : i32, i32
  }
  func.func @transform_6(%arg0: i32) -> (i32, i32) {
    %c0_i32 = arith.constant 0 : i32
    %c0_i32_0 = arith.constant 0 : i32
    %c0_i32_1 = arith.constant 0 : i32
    return %c0_i32, %c0_i32_0 : i32, i32
  }
  func.func @transform_7(%arg0: i32) -> (i32, i32) {
    %c0_i32 = arith.constant 0 : i32
    %c0_i32_0 = arith.constant 0 : i32
    %c0_i32_1 = arith.constant 0 : i32
    return %c0_i32, %c0_i32_0 : i32, i32
  }
  func.func @transform_8(%arg0: i32) -> (i32, i32) {
    %c0_i32 = arith.constant 0 : i32
    %c0_i32_0 = arith.constant 0 : i32
    %c0_i32_1 = arith.constant 0 : i32
    return %c0_i32, %c0_i32_0 : i32, i32
  }
  func.func @transform_9(%arg0: i32) -> (i32, i32) {
    %c0_i32 = arith.constant 0 : i32
    %c0_i32_0 = arith.constant 0 : i32
    %c0_i32_1 = arith.constant 0 : i32
    return %c0_i32, %c0_i32_0 : i32, i32
  }
  func.func @transform_10(%arg0: i32) -> (i32, i32) {
    %c0_i32 = arith.constant 0 : i32
    %c0_i32_0 = arith.constant 0 : i32
    %c0_i32_1 = arith.constant 0 : i32
    return %c0_i32, %c0_i32_0 : i32, i32
  }
  func.func @transform_11(%arg0: i32) -> (i32, i32) {
    %c0_i32 = arith.constant 0 : i32
    %c0_i32_0 = arith.constant 0 : i32
    %c0_i32_1 = arith.constant 0 : i32
    return %c0_i32, %c0_i32_0 : i32, i32
  }
  func.func @transform_12(%arg0: i32) -> (i32, i32) {
    %c0_i32 = arith.constant 0 : i32
    %c0_i32_0 = arith.constant 0 : i32
    %c0_i32_1 = arith.constant 0 : i32
    return %c0_i32, %c0_i32_0 : i32, i32
  }
  func.func @transform_13(%arg0: i32) -> (i32, i32) {
    %c0_i32 = arith.constant 0 : i32
    %c0_i32_0 = arith.constant 0 : i32
    %c0_i32_1 = arith.constant 0 : i32
    return %c0_i32, %c0_i32_0 : i32, i32
  }
  func.func @transform_14(%arg0: i32) -> (i32, i32) {
    %c0_i32 = arith.constant 0 : i32
    %c0_i32_0 = arith.constant 0 : i32
    %c0_i32_1 = arith.constant 0 : i32
    return %c0_i32, %c0_i32_0 : i32, i32
  }
  func.func @transform_15(%arg0: i32) -> (i32, i32) {
    %c0_i32 = arith.constant 0 : i32
    %c0_i32_0 = arith.constant 0 : i32
    %c0_i32_1 = arith.constant 0 : i32
    return %c0_i32, %c0_i32_0 : i32, i32
  }
  func.func @transform_16(%arg0: i32) -> (i32, i32) {
    %c0_i32 = arith.constant 0 : i32
    %c0_i32_0 = arith.constant 0 : i32
    %c0_i32_1 = arith.constant 0 : i32
    return %c0_i32, %c0_i32_0 : i32, i32
  }
  func.func @transform_17(%arg0: i32) -> (i32, i32) {
    %c0_i32 = arith.constant 0 : i32
    %c0_i32_0 = arith.constant 0 : i32
    %c0_i32_1 = arith.constant 0 : i32
    return %c0_i32, %c0_i32_0 : i32, i32
  }
  func.func @transform_18(%arg0: i32) -> (i32, i32) {
    %c0_i32 = arith.constant 0 : i32
    %c0_i32_0 = arith.constant 0 : i32
    %c0_i32_1 = arith.constant 0 : i32
    return %c0_i32, %c0_i32_0 : i32, i32
  }
  func.func @transform_19(%arg0: i32) -> (i32, i32) {
    %c0_i32 = arith.constant 0 : i32
    %c0_i32_0 = arith.constant 0 : i32
    %c0_i32_1 = arith.constant 0 : i32
    return %c0_i32, %c0_i32_0 : i32, i32
  }
  func.func @transform_20(%arg0: i32) -> (i32, i32) {
    %c0_i32 = arith.constant 0 : i32
    %c0_i32_0 = arith.constant 0 : i32
    %c0_i32_1 = arith.constant 0 : i32
    return %c0_i32, %c0_i32_0 : i32, i32
  }
  func.func @transform_21(%arg0: i32) -> (i32, i32) {
    %c0_i32 = arith.constant 0 : i32
    %c0_i32_0 = arith.constant 0 : i32
    %c0_i32_1 = arith.constant 0 : i32
    return %c0_i32, %c0_i32_0 : i32, i32
  }
  func.func @transform_22(%arg0: i32) -> (i32, i32) {
    %c0_i32 = arith.constant 0 : i32
    %c0_i32_0 = arith.constant 0 : i32
    %c0_i32_1 = arith.constant 0 : i32
    return %c0_i32, %c0_i32_0 : i32, i32
  }
  func.func @transform_23(%arg0: i32) -> (i32, i32) {
    %c0_i32 = arith.constant 0 : i32
    %c0_i32_0 = arith.constant 0 : i32
    %c0_i32_1 = arith.constant 0 : i32
    return %c0_i32, %c0_i32_0 : i32, i32
  }
  func.func @transform_24(%arg0: i32) -> (i32, i32, i32) {
    %c0_i32 = arith.constant 0 : i32
    %c0_i32_0 = arith.constant 0 : i32
    %c0_i32_1 = arith.constant 0 : i32
    return %arg0, %c0_i32, %c0_i32_0 : i32, i32, i32
  }
}

</mosaic_0001>

<bundles_post_ra>
// kernel: forward.5
= control target key start
LH: loop header
LB: loop body
LE: loop exit
PB: predicated region body
PF: predicated region fallthrough
CT: control target
= control target key end

     0   :  { %8 = vsyncpa [#allocation3], 0  ;;  %s776_s0 = inlined_call_operand.vmem [shape: f32[2,32,128], index: 0, kind: input, shape index: {}]   ;;  %s777_s1 = inlined_call_operand.vmem [shape: bf16[128,128], index: 1, kind: input, shape index: {}]   ;;  %s778_s2 = inlined_call_operand.vmem [shape: f32[1,128], index: 2, kind: input, shape index: {}]   ;;  %s779_s3 = inlined_call_operand.hbm [shape: f32[2,32,128], index: 3, kind: output, shape index: {}]  }
   0x1   :  { %10 = vsyncpa [#allocation3 + $0x1], 0  ;;  %s652_s12 = smov 0   ;;  %s654_s13 = smov 0  }
   0x2   :  { %s656_s14 = smov 0   ;;  %s658_s15 = smov 0  }
   0x3   :  { %s660_s16 = smov 0   ;;  %s662_s17 = smov 0  }
   0x4 LB: > { %s427_s18 = sadd.s32 4294967295, %s628_s17   ;;  %s428_s19 = sadd.s32 4294967294, %s628_s17   ;;  %s628_s17 = sphi %s662_s17, %s16_s17   ;;  %s624_s16 = sphi %s660_s16, %s786_s16   ;;  %s620_s15 = sphi %s658_s15, %s785_s15   ;;  %s616_s14 = sphi %s656_s14, %s784_s14   ;;  %s612_s13 = sphi %s654_s13, %s783_s13   ;;  %s608_s12 = sphi %s652_s12, %s782_s12  }
   0x5   : > { %s28_s20 = sadd.s32 1, %s624_s16  ;;  %s115_s21 = sadd.s32 1, %s616_s14 }
   0x6   : > { %p30_p0 = scmp.ge.s32.totalorder %s28_s20, 2  ;;  %p125_p1 = scmp.ne.s32.totalorder %s616_s14, %s612_s13 }
   0x7   : > { %p126_p2 = scmp.eq.s32.totalorder %s427_s18, 1  ;;  %p131_p3 = scmp.ne.s32.totalorder %s612_s13, %s608_s12 }
   0x8   : > { %s788_s20 = smov (%p30_p0, %s28_s20), 0  ;;  %p132_p5 = scmp.eq.s32.totalorder %s428_s19, 1 }
   0x9   : > { %p692_p4 = por %p126_p2, %p125_p1  ;;  %s110_s23 = ssub.s32 %s624_s16, %s788_s20 }
   0xa   : > { %p433_p6 = scmp.ge.s32.totalorder %s628_s17, 1  ;;  %p113_p7 = scmp.eq.s32.totalorder %s110_s23, 0 }
   0xb   : > { %p699_p8 = por %p132_p5, %p131_p3  ;;  %p171_p9 = scmp.lt.s32.totalorder %s628_s17, 3 }
   0xc   : > { %s705_s25 = scalar_select %p113_p7, %s616_s14, %s115_s21  }
   0xd   : > { %p172_p10 = pnand %p433_p6, %p171_p9 }
   0xe   : > { %p202_p11 = scmp.lt.s32.totalorder (!%p172_p10), %s620_s15, 1  ;;  %s199_s30 = sand.u32 (!%p172_p10), 1, %s612_s13  }
   0xf   : > { %175 = sbr.rel (%p172_p10) target bundleno = 193 (0xc1), region = 32  ;;  %s434_s4 = sshll.u32 (!%p172_p10), %s199_s30, 5 }
  0x10   : > { %s483_s7 = sshll.u32 (!%p172_p10), %s620_s15, 5  ;;  %s201_s8 = scalar_lea.vmem (!%p172_p10), [#allocation2], %s434_s4 }
  0x11   : > { %s324_s11 = scalar_lea.hbm (!%p172_p10), %s779_s3, %s483_s7  ;;  %s570_s28 = scalar_lea.hbm (!%p172_p10), %s779_s3, 64 }
  0x12   : > { %s327_s19 = sshll.u32 (!%p172_p10), %s324_s11, 4  ;;  %s328_s19 = int_to_ptr.hbm [resolvable:$true] %s327_s19 }
  0x13   : > { %s564_s21 = sshra.s32 (!%p172_p10), %s328_s19, 4  ;;  %s565_s21 = int_to_ptr.hbm [resolvable:$true] %s564_s21 }
  0x14   : > { %v482_v0 = vld [vmem:[%s777_s1 + $0x38] sm:$0xff]  ;;  %v481_v1 = vld [vmem:[%s777_s1 + $0x30] sm:$0xff]  ;;  %v480_v2 = vld [vmem:[%s777_s1 + $0x28] sm:$0xff]  ;;  %s203_s9 = scalar_select %p202_p11, %s620_s15, 1 }
  0x15   : > { %288 = vmatpush.bf16.msra.mxu0 %v482_v0  ;;  %484 = vmatpush.bf16.msra.mxu1 %v482_v0  ;;  %v479_v3 = vld [vmem:[%s777_s1 + $0x20] sm:$0xff]  ;;  %v478_v4 = vld [vmem:[%s777_s1 + $0x18] sm:$0xff]  ;;  %v477_v5 = vld [vmem:[%s777_s1 + $0x10] sm:$0xff]  ;;  %s312_s15 = scalar_lea.sflag [#allocation3], %s199_s30  ;;  %s566_s23 = scalar_lea.hbm %s565_s21, 32 }
  0x16   : > { %s474_s18 = sshll.u32 %s203_s9, 5  ;;  %v476_v6 = vld [vmem:[%s777_s1 + $0x8] sm:$0xff]  ;;  %v475_v7 = vld [vmem:[%s777_s1] sm:$0xff]  ;;  %p567_p12 = scmp.ne.s32.totalorder %s565_s21, %s566_s23 }
  0x17   : > { %s206_s27 = scalar_lea.vmem %s776_s0, %s474_s18  ;;  %v549_v14 = vld [vmem:[%s778_s2] ss:$0 sm:$0xff]  ;;  %s325_s18 = sshll.u32 %s201_s8, 4  ;;  %s326_s18 = int_to_ptr.vmem [resolvable:$true] %s325_s18 }
  0x18   : > { %v214_v8 = vld [vmem:[%s206_s27] sm:$0xff]  ;;  %v215_v9 = vld [vmem:[%s206_s27 + $0x8] sm:$0xff]  ;;  %v216_v10 = vld [vmem:[%s206_s27 + $0x10] sm:$0xff]  ;;  %p568_p13 = pnand %p567_p12, %p692_p4  ;;  %p571_p1 = scmp.lt.s32.totalorder %s565_s21, %s779_s3 }
  0x19   : > { %289 = vmatpush.bf16.msra.mxu0 %v481_v1  ;;  %485 = vmatpush.bf16.msra.mxu1 %v481_v1  ;;  %v217_v11 = vld [vmem:[%s206_s27 + $0x18] sm:$0xff]  ;;  %v218_v12 = vpack.c.bf16 %v215_v9, %v214_v8  ;;  %p572_p2 = scmp.lt.s32.totalorder %s570_s28, %s566_s23 }
  0x1a   : > { %v219_v13 = vpack.c.bf16 %v217_v11, %v216_v10  ;;  %p569_p0 = pneg %p568_p13 }
  0x1b   : > { %p573_p3 = por %p572_p2, %p571_p1 }
  0x1d   : > { %290 = vmatpush.bf16.msra.mxu0 %v480_v2  ;;  %486 = vmatpush.bf16.msra.mxu1 %v480_v2  ;;  %p574_p5 = pnand %p573_p3, %p569_p0 }
  0x21   : > { %291 = vmatpush.bf16.msra.mxu0 %v479_v3  ;;  %487 = vmatpush.bf16.msra.mxu1 %v479_v3 }
  0x25   : > { %292 = vmatpush.bf16.msra.mxu0 %v478_v4  ;;  %488 = vmatpush.bf16.msra.mxu1 %v478_v4 }
  0x29   : > { %293 = vmatpush.bf16.msra.mxu0 %v477_v5  ;;  %489 = vmatpush.bf16.msra.mxu1 %v477_v5 }
  0x2d   : > { %294 = vmatpush.bf16.msra.mxu0 %v476_v6  ;;  %490 = vmatpush.bf16.msra.mxu1 %v476_v6 }
  0x31   : > { %295 = vmatpush.bf16.msra.mxu0 %v475_v7  ;;  %491 = vmatpush.bf16.msra.mxu1 %v475_v7 }
  0x34   : > { %296 = vmatmul.bf16.vlgmr.msra.gmra.mxu0 %v218_v12  ;;  %301 = vmatmul.bf16.vlgmr.msra.gmra.mxu1 %v219_v13 }
  0xb1   : > { %v297_v15 = vpop.f32.mrf.mxu0  ;;  %v302_v16 = vpop.f32.mrf.mxu1 }
  0xb2   : > { %v298_v17 = vadd.f32 %v549_v14, %v297_v15  ;;  %v303_v18 = vadd.f32 %v549_v14, %v302_v16 }
  0xb4   : > { %307 = vst [vmem:[%s201_s8] sm:$0xff] %v298_v17 }
  0xb5   : > { %309 = vst [vmem:[%s201_s8 + $0x10] sm:$0xff] %v303_v18 }
  0xb9   : > { %v299_v19 = vpop.f32.mrf.mxu0  ;;  %v304_v20 = vpop.f32.mrf.mxu1 }
  0xba   : > { %v300_v21 = vadd.f32 %v549_v14, %v299_v19  ;;  %v305_v22 = vadd.f32 %v549_v14, %v304_v20 }
  0xbc   : > { %308 = vst [vmem:[%s201_s8 + $0x8] sm:$0xff] %v300_v21 }
  0xbd   : > { %310 = vst [vmem:[%s201_s8 + $0x18] sm:$0xff] %v305_v22 }
  0xbe   : > { %577 = shalt.err (!%p574_p5)
}
  0xbf   : > { %s630_s30 = smov 128   ;;  %s631_s5 = smov 8  }
  0xc0   : > { %492 = dma.vmem_to_hbm [thread:$0]  (%p692_p4), %s326_s18, 512, %s328_s19, %s312_s15, %s630_s30, %s630_s30, %s631_s5  }
  0xc1 PF: > { %p498_p6 = scmp.ge.s32.totalorder %s628_s17, 2  ;;  %s342_s6 = sand.u32 1, %s608_s12  }
  0xc2   : > { %s343_s7 = scalar_lea.sflag [#allocation3], %s342_s6 }
  0xc3   : > { %p495_p7 = pnand %p498_p6, %p699_p8 }
  0xc5   : > { %p496_p9 = pneg %p495_p7 }
  0xc7   : > { %603 = dma.done.wait (%p496_p9), %s343_s7, 512  }
  0xc8   : > { %605 = vsyncadd (%p496_p9), %s343_s7, 4294966784  ;;  %s16_s17 = sadd.s32 1, %s628_s17   ;;  %s782_s12 = smov %s612_s13 }
  0xc9   : > { %p13_p10 = scmp.ge.s32.totalorder %s16_s17, 4   ;;  %s783_s13 = smov %s616_s14 }
  0xca   : > { %s784_s14 = smov %s705_s25  ;;  %s785_s15 = smov %s624_s16 }
  0xcb   : > { %s786_s16 = smov %s788_s20  ;;  %15 = sbr.rel (!%p13_p10) target bundleno = 4 (0x4), region = 73 }
  0xd0   :  { %349 = vsyncpa [#allocation3], 1 }
  0xd1   :  { %351 = vsyncpa [#allocation3 + $0x1], 1 }

// kernel: forward.3
= control target key start
LH: loop header
LB: loop body
LE: loop exit
PB: predicated region body
PF: predicated region fallthrough
CT: control target
= control target key end

     0   :  { %s5248_s0 = inlined_call_operand.vmem [shape: f32[2,32,128], index: 0, kind: input, shape index: {}]   ;;  %s5249_s1 = inlined_call_operand.vmem [shape: bf16[2,32,128], index: 1, kind: input, shape index: {}]   ;;  %s5250_s2 = inlined_call_operand.vmem [shape: f32[2,32,32], index: 2, kind: input, shape index: {}]   ;;  %s5251_s3 = inlined_call_operand.vmem [shape: f32[2,32,32], index: 3, kind: input, shape index: {}]   ;;  %s5252_s4 = inlined_call_operand.vmem [shape: bf16[128,128], index: 4, kind: input, shape index: {}]   ;;  %s5253_s5 = inlined_call_operand.vmem [shape: f32[1,128], index: 5, kind: input, shape index: {}]   ;;  %s5254_s6 = inlined_call_operand.vmem [shape: bf16[128,128], index: 6, kind: input, shape index: {}]   ;;  %s5255_s7 = inlined_call_operand.vmem [shape: f32[1,128], index: 7, kind: input, shape index: {}]   ;;  %s5256_s8 = inlined_call_operand.vmem [shape: bf16[128,128], index: 8, kind: input, shape index: {}]   ;;  %s5257_s9 = inlined_call_operand.vmem [shape: f32[1,128], index: 9, kind: input, shape index: {}]   ;;  %s5258_s10 = inlined_call_operand.vmem [shape: bf16[128,128], index: 10, kind: input, shape index: {}]   ;;  %s5259_s11 = inlined_call_operand.vmem [shape: f32[1,128], index: 11, kind: input, shape index: {}]   ;;  %s5260_s12 = inlined_call_operand.vmem [shape: bf16[128,128], index: 12, kind: input, shape index: {}]   ;;  %s5261_s13 = inlined_call_operand.vmem [shape: f32[1,128], index: 13, kind: input, shape index: {}]   ;;  %s5262_s14 = inlined_call_operand.vmem [shape: bf16[128,128], index: 14, kind: input, shape index: {}]   ;;  %s5263_s15 = inlined_call_operand.vmem [shape: f32[1,128], index: 15, kind: input, shape index: {}]   ;;  %s5264_s16 = inlined_call_operand.vmem [shape: bf16[128,128], index: 16, kind: input, shape index: {}]   ;;  %s5265_s17 = inlined_call_operand.vmem [shape: f32[1,128], index: 17, kind: input, shape index: {}]   ;;  %s5266_s18 = inlined_call_operand.vmem [shape: bf16[128,128], index: 18, kind: input, shape index: {}]   ;;  %s5267_s19 = inlined_call_operand.vmem [shape: f32[1,128], index: 19, kind: input, shape index: {}]   ;;  %s5268_s20 = inlined_call_operand.vmem [shape: bf16[128,256], index: 20, kind: input, shape index: {}]   ;;  %s5269_s21 = inlined_call_operand.vmem [shape: f32[1,256], index: 21, kind: input, shape index: {}]   ;;  %s5270_s22 = inlined_call_operand.vmem [shape: bf16[256,128], index: 22, kind: input, shape index: {}]   ;;  %s5271_s23 = inlined_call_operand.vmem [shape: f32[1,128], index: 23, kind: input, shape index: {}]   ;;  %s5272_s24 = inlined_call_operand.vmem [shape: f32[2,32,128], index: 24, kind: output, shape index: {}]  }
   0x1   :  { %5277 = sst [smem:[#allocation4_spill]] %s5248_s0 }
   0x2   :  { %5278 = sst [smem:[#allocation5_spill]] %s5249_s1 }
   0x3   :  { %5279 = sst [smem:[#allocation6_spill]] %s5250_s2 }
   0x4   :  { %5280 = sst [smem:[#allocation7_spill]] %s5251_s3 }
   0x5   :  { %5281 = sst [smem:[#allocation8_spill]] %s5252_s4 }
   0x6   :  { %5282 = sst [smem:[#allocation9_spill]] %s5253_s5  ;;  %s4201_s5 = smov 0  }
   0x7   :  { %5283 = sst [smem:[#allocation10_spill]] %s5254_s6 }
   0x8   :  { %5284 = sst [smem:[#allocation11_spill]] %s5255_s7 }
   0x9   :  { %5285 = sst [smem:[#allocation12_spill]] %s5256_s8 }
   0xa   :  { %5286 = sst [smem:[#allocation13_spill]] %s5271_s23 }
   0xb   :  { %5287 = sst [smem:[#allocation14_spill]] %s5272_s24 }
   0xc LB: > { %5288 = sst [smem:[#allocation3_spill]] %s4070_s5  ;;  %s3345_s26 = sadd.s32 4294967295, %s4070_s5   ;;  %s4070_s5 = sphi %s4201_s5, %s34_s5  }
   0xd   : > { %p3349_p0 = scmp.ge.s32.totalorder %s4070_s5, 1  ;;  %p692_p1 = scmp.lt.s32.totalorder %s4070_s5, 3 }
   0xf   : > { %p693_p2 = pnand %p3349_p0, %p692_p1 }
  0x10   : > { %s5289_s6 = sld [smem:[#allocation8_spill]] (!%p693_p2)  ;;  %p773_p3 = scmp.lt.s32.totalorder (!%p693_p2), %s3345_s26, 1 }
  0x11   : > { %696 = sbr.rel (%p693_p2) target bundleno = 3467 (0xd8b), region = 116  ;;  %s5290_s0 = sld [smem:[#allocation10_spill]] (!%p693_p2) }
  0x12   : > { %s5291_s27 = sld [smem:[#allocation12_spill]] (!%p693_p2)  ;;  %s4072_s2 = smov (!%p693_p2), 64  }
  0x13   : > { %s5292_s7 = sld [smem:[#allocation4_spill]] (!%p693_p2)  ;;  %s4073_s29 = smov (!%p693_p2), 96  }
  0x14   : > { %s5293_s28 = sld [smem:[#allocation9_spill]] (!%p693_p2) }
  0x15   : > { %s5294_s24 = sld [smem:[#allocation11_spill]] (!%p693_p2) }
  0x16   : > { %v3800_v0 = vld [vmem:[%s5289_s6 + $0x38] sm:$0xff]  ;;  %v3799_v2 = vld [vmem:[%s5289_s6 + $0x30] sm:$0xff]  ;;  %v3798_v4 = vld [vmem:[%s5289_s6 + $0x28] sm:$0xff]  ;;  %s5302_s26 = smov (!%p773_p3, %s3345_s26), 1  ;;  %vm1114_vm0 = vcmask 261120   ;;  %s5295_s1 = sld [smem:[#allocation6_spill]] }
  0x17   : > { %v3808_v1 = vld [vmem:[%s5290_s0 + $0x38] sm:$0xff]  ;;  %885 = vmatpush.bf16.msra.mxu0 %v3800_v0  ;;  %v3807_v3 = vld [vmem:[%s5290_s0 + $0x30] sm:$0xff]  ;;  %v3806_v5 = vld [vmem:[%s5290_s0 + $0x28] sm:$0xff]  ;;  %s4254_s25 = sshll.u32 %s5302_s26, 5  ;;  %vm1365_vm1 = vcmask 523520   ;;  %vm1502_vm2 = vcmask 785920  }
  0x18   : > { %972 = vmatpush.bf16.msra.mxu1 %v3808_v1  ;;  %v3797_v6 = vld [vmem:[%s5289_s6 + $0x20] sm:$0xff]  ;;  %v3796_v8 = vld [vmem:[%s5289_s6 + $0x18] sm:$0xff]  ;;  %v3795_v11 = vld [vmem:[%s5289_s6 + $0x10] sm:$0xff]  ;;  %vm1639_vm3 = vcmask 1048320   ;;  %s3787_s8 = sshll.u32 %s5302_s26, 4  ;;  %s5296_s23 = sld [smem:[#allocation5_spill]] }
  0x19   : > { %v3805_v7 = vld [vmem:[%s5290_s0 + $0x20] sm:$0xff]  ;;  %v3804_v9 = vld [vmem:[%s5290_s0 + $0x18] sm:$0xff]  ;;  %v3803_v12 = vld [vmem:[%s5290_s0 + $0x10] sm:$0xff]  ;;  %s777_s5 = scalar_lea.vmem %s5292_s7, %s4254_s25  ;;  %s4074_s7 = smov 32  }
  0x1a   : > { %v3816_v10 = vld [vmem:[%s5291_s27 + $0x38] sm:$0xff]  ;;  %v3815_v13 = vld [vmem:[%s5291_s27 + $0x30] sm:$0xff]  ;;  %v3794_v14 = vld [vmem:[%s5289_s6 + $0x8] sm:$0xff]  ;;  %s5297_s26 = sld [smem:[#allocation7_spill]] }
  0x1b   : > { %886 = vmatpush.bf16.msra.mxu0 %v3799_v2  ;;  %1059 = vmatpush.bf16.msra.mxu2 %v3816_v10  ;;  %v3802_v15 = vld [vmem:[%s5290_s0 + $0x8] sm:$0xff]  ;;  %v3793_v17 = vld [vmem:[%s5289_s6] sm:$0xff]  ;;  %v3812_v23 = vld [vmem:[%s5291_s27 + $0x18] sm:$0xff] }
  0x1c   : > { %973 = vmatpush.bf16.msra.mxu1 %v3807_v3  ;;  %v3814_v16 = vld [vmem:[%s5291_s27 + $0x28] sm:$0xff]  ;;  %v3801_v18 = vld [vmem:[%s5290_s0] sm:$0xff]  ;;  %v3811_v24 = vld [vmem:[%s5291_s27 + $0x10] sm:$0xff] }
  0x1d   : > { %v4275_v19 = vld [vmem:[%s777_s5] sm:$0xff]  ;;  %v4277_v20 = vld [vmem:[%s777_s5 + $0x8] sm:$0xff]  ;;  %v4293_v26 = vld [vmem:[%s777_s5 + $0x10] sm:$0xff] }
  0x1e   : > { %v3813_v21 = vld [vmem:[%s5291_s27 + $0x20] sm:$0xff]  ;;  %v803_v22 = vpack.c.bf16 %v4277_v20, %v4275_v19  ;;  %v3810_v25 = vld [vmem:[%s5291_s27 + $0x8] sm:$0xff]  ;;  %v4295_v27 = vld [vmem:[%s777_s5 + $0x18] sm:$0xff] }
  0x1f   : > { %887 = vmatpush.bf16.msra.mxu0 %v3798_v4  ;;  %1060 = vmatpush.bf16.msra.mxu2 %v3815_v13  ;;  %v3809_v28 = vld [vmem:[%s5291_s27] sm:$0xff]  ;;  %v804_v29 = vpack.c.bf16 %v4295_v27, %v4293_v26 }
  0x20   : > { %974 = vmatpush.bf16.msra.mxu1 %v3806_v5  ;;  %v3901_v30 = vld [vmem:[%s5293_s28] ss:$0 sm:$0xff]  ;;  %s787_s28 = scalar_lea.vmem %s5295_s1, %s4254_s25  ;;  %s792_s30 = scalar_lea.vmem %s5297_s26, %s4254_s25 }
  0x21   : > { %v3902_v34 = vld [vmem:[%s5294_s24] ss:$0 sm:$0xff]  ;;  %s782_s24 = scalar_lea.vmem %s5296_s23, %s3787_s8  ;;  %s5298_s1 = sld [smem:[#allocation13_spill]] }
  0x23   : > { %888 = vmatpush.bf16.msra.mxu0 %v3797_v6  ;;  %1061 = vmatpush.bf16.msra.mxu2 %v3814_v16 }
  0x24   : > { %975 = vmatpush.bf16.msra.mxu1 %v3805_v7 }
  0x27   : > { %889 = vmatpush.bf16.msra.mxu0 %v3796_v8  ;;  %1062 = vmatpush.bf16.msra.mxu2 %v3813_v21 }
  0x28   : > { %976 = vmatpush.bf16.msra.mxu1 %v3804_v9 }
  0x2b   : > { %890 = vmatpush.bf16.msra.mxu0 %v3795_v11  ;;  %1063 = vmatpush.bf16.msra.mxu2 %v3812_v23  ;;  %v3903_v11 = vld [vmem:[%s5257_s9] ss:$0 sm:$0xff] }
  0x2c   : > { %977 = vmatpush.bf16.msra.mxu1 %v3803_v12 }
  0x2f   : > { %891 = vmatpush.bf16.msra.mxu0 %v3794_v14  ;;  %1064 = vmatpush.bf16.msra.mxu2 %v3811_v24 }
  0x30   : > { %978 = vmatpush.bf16.msra.mxu1 %v3802_v15 }
  0x33   : > { %892 = vmatpush.bf16.msra.mxu0 %v3793_v17  ;;  %1065 = vmatpush.bf16.msra.mxu2 %v3810_v25 }
  0x34   : > { %979 = vmatpush.bf16.msra.mxu1 %v3801_v18 }
  0x36   : > { %893 = vmatmul.bf16.vlgmr.msra.gmra.mxu0 %v803_v22 }
  0x37   : > { %980 = vmatmul.bf16.vlgmr.msra.gmra.mxu1 %v803_v22  ;;  %1066 = vmatpush.bf16.msra.mxu2 %v3809_v28 }
  0x3a   : > { %1067 = vmatmul.bf16.vlgmr.msra.gmra.mxu2 %v803_v22 }
  0x46   : > { %898 = vmatmul.bf16.gmra.mxu0 %v804_v29 }
  0x47   : > { %985 = vmatmul.bf16.gmra.mxu1 %v804_v29 }
  0x4a   : > { %1072 = vmatmul.bf16.gmra.mxu2 %v804_v29 }
  0xb3   : > { %v894_v31 = vpop.f32.mrf.mxu0 }
  0xb4   : > { %v981_v32 = vpop.f32.mrf.mxu1  ;;  %v895_v33 = vadd.f32 %v3901_v30, %v894_v31 }
  0xb5   : > { %v982_v36 = vadd.f32 %v3902_v34, %v981_v32 }
  0xb6   : > { %v1078_v35 = vmul.f32 0.17677669, %v895_v33 }
  0xb7   : > { %v1086_v40 = vpack.c.bf16 %v982_v36, %v982_v36 }
  0xb8   : > { %v1082_v39 = vpack.c.bf16 %v1078_v35, %v1078_v35 }
  0xb9   : > { %v1108_v46 = vunpack.c.l.b16 %v1086_v40 }
  0xba   : > { %v1098_v45 = vunpack.c.l.b16 %v1082_v39 }
  0xbb   : > { %v896_v37 = vpop.f32.mrf.mxu0 }
  0xbc   : > { %v983_v38 = vpop.f32.mrf.mxu1  ;;  %v897_v41 = vadd.f32 %v3901_v30, %v896_v37 }
  0xbd   : > { %v984_v42 = vadd.f32 %v3902_v34, %v983_v38  ;;  %v1068_v10 = vpop.f32.mrf.mxu2 }
  0xbe   : > { %v1079_v43 = vmul.f32 0.17677669, %v897_v41  ;;  %v1069_v12 = vadd.f32 %v3903_v11, %v1068_v10 }
  0xbf   : > { %v1087_v44 = vpack.c.bf16 %v984_v42, %v984_v42 }
  0xc0   : > { %v1083_v47 = vpack.c.bf16 %v1079_v43, %v1079_v43  ;;  %v1090_v13 = vpack.c.bf16 %v1069_v12, %v1069_v12 }
  0xc1   : > { %v1109_v48 = vunpack.c.l.b16 %v1087_v44 }
  0xc2   : > { %v1099_v49 = vunpack.c.l.b16 %v1083_v47  ;;  %v1196_v16 = vunpack.c.l.b16 %v1090_v13 }
  0xc3   : > { %v1112_v50 = vpack.c.b16 %v1109_v48, %v1108_v46  ;;  %v899_v51 = vpop.f32.mrf.mxu0  ;;  %v4349_v48 = vld [vmem:[%s787_s28] sm:$0xff] }
  0xc4   : > { %v986_v52 = vpop.f32.mrf.mxu1  ;;  %v1102_v53 = vpack.c.b16 %v1099_v49, %v1098_v45  ;;  %v900_v54 = vadd.f32 %v3901_v30, %v899_v51 }
  0xc5   : > { %1374 = vrot.lane.b32.xlu2 %v1112_v50, %s4072_s2  ;;  %v987_v56 = vadd.f32 %v3902_v34, %v986_v52  ;;  %v1122_v9 = vsel %vm1114_vm0, %v1112_v50, 0  ;;  %v1070_v14 = vpop.f32.mrf.mxu2 }
  0xc6   : > { %1233 = vrot.lane.b32.xlu1 %v1102_v53, %s4073_s29  ;;  %v1080_v55 = vmul.f32 0.17677669, %v900_v54  ;;  %v1071_v15 = vadd.f32 %v3903_v11, %v1070_v14 }
  0xc7   : > { %v1088_v60 = vpack.c.bf16 %v987_v56, %v987_v56 }
  0xc8   : > { %v1084_v59 = vpack.c.bf16 %v1080_v55, %v1080_v55  ;;  %v1091_v17 = vpack.c.bf16 %v1071_v15, %v1071_v15 }
  0xc9   : > { %v1110_v2 = vunpack.c.l.b16 %v1088_v60 }
  0xca   : > { %v1100_v1 = vunpack.c.l.b16 %v1084_v59  ;;  %v1197_v18 = vunpack.c.l.b16 %v1091_v17 }
  0xcb   : > { %v901_v57 = vpop.f32.mrf.mxu0 }
  0xcc   : > { %v988_v58 = vpop.f32.mrf.mxu1  ;;  %v902_v61 = vadd.f32 %v3901_v30, %v901_v57  ;;  %v4327_v21 = vpack.c.b16 %v1197_v18, %v1196_v16  ;;  %v4359_v57 = vld [vmem:[%s787_s28 + $0x10] sm:$0xff] }
  0xcd   : > { %v989_v62 = vadd.f32 %v3902_v34, %v988_v58  ;;  %v1073_v22 = vpop.f32.mrf.mxu2 }
  0xce   : > { %v1081_v63 = vmul.f32 0.17677669, %v902_v61  ;;  %v1074_v23 = vadd.f32 %v3903_v11, %v1073_v22 }
  0xcf   : > { %v1089_v0 = vpack.c.bf16 %v989_v62, %v989_v62  ;;  %v4364_v62 = vld [vmem:[%s787_s28 + $0x18] sm:$0xff] }
  0xd0   : > { %v1085_v3 = vpack.c.bf16 %v1081_v63, %v1081_v63  ;;  %v1092_v24 = vpack.c.bf16 %v1074_v23, %v1074_v23 }
  0xd1   : > { %v1111_v4 = vunpack.c.l.b16 %v1089_v0 }
  0xd2   : > { %v1101_v5 = vunpack.c.l.b16 %v1085_v3  ;;  %v1198_v29 = vunpack.c.l.b16 %v1092_v24 }
  0xd3   : > { %v1113_v6 = vpack.c.b16 %v1111_v4, %v1110_v2 }
  0xd4   : > { %v1103_v7 = vpack.c.b16 %v1101_v5, %v1100_v1 }
  0xd5   : > { %1239 = vrot.lane.b32.xlu0 %v1113_v6, %s4073_s29  ;;  %1376 = vrot.lane.b32.xlu1 %v1113_v6, %s4072_s2  ;;  %v1125_v8 = vsel %vm1114_vm0, %v1113_v6, 0  ;;  %v1075_v25 = vpop.f32.mrf.mxu2 }
  0xd6   : > { %1133 = vmatpush.bf16.xpose.msra.mxu3 %v1125_v8  ;;  %1235 = vrot.lane.b32.xlu2 %v1103_v7, %s4073_s29  ;;  %v1076_v28 = vadd.f32 %v3903_v11, %v1075_v25 }
  0xd8   : > { %v1093_v30 = vpack.c.bf16 %v1076_v28, %v1076_v28 }
  0xda   : > { %v1199_v31 = vunpack.c.l.b16 %v1093_v30 }
  0xdc   : > { %v4331_v32 = vpack.c.b16 %v1199_v31, %v1198_v29 }
  0xdd   : > { %1237 = vrot.lane.b32.xlu0 %v1112_v50, %s4073_s29  ;;  %1370 = vrot.lane.b32.xlu1 %v1102_v53, %s4072_s2 }
  0xde   : > { %1134 = vmatpush.bf16.xpose.msra.mxu3 %v1122_v9  ;;  %1511 = vrot.lane.b32.xlu2 %v1112_v50, %s4074_s7 }
  0xe5   : > { %1513 = vrot.lane.b32.xlu0 %v1113_v6, %s4074_s7  ;;  %3456 = vmatmul.msk.bf16.vlgmr.msra.gmra.mxu3 %vm1114_vm0, %v1102_v53 }
  0xe6   : > { %1372 = vrot.lane.b32.xlu1 %v1103_v7, %s4072_s2  ;;  %1509 = vrot.lane.b32.xlu2 %v1103_v7, %s4074_s7 }
  0xe7   : > { %1216 = vmatpush.bf16.msrb.mxu3 %v4331_v32 }
  0xeb   : > { %1217 = vmatpush.bf16.msrb.mxu3 %v4327_v21 }
  0xed   : > { %1507 = vrot.lane.b32.xlu0 %v1102_v53, %s4074_s7  ;;  %v4355_v53 = vld [vmem:[%s787_s28 + $0x8] sm:$0xff]  ;;  %s5299_s28 = sld [smem:[#allocation14_spill]] }
  0xee   : > { %1318 = vrot.lane.b32.xlu2 %v4327_v21, %s4073_s29  ;;  %1320 = vrot.lane.b32.xlu1 %v4331_v32, %s4073_s29 }
  0xf3   : > { %s5236_s5 = scalar_lea.vmem %s5299_s28, %s4254_s25 }
  0xf5   : > { %3457 = vmatmul.msk.bf16.gmra.mxu3 %vm1114_vm0, %v1103_v7 }
 0x11f   : > { %v1375_v38 = vpop.permute.xlu2 %1374 }
 0x120   : > { %v1385_v41 = vsel %vm1114_vm0, %v1375_v38, 0 }
 0x130   : > { %v1236_v42 = vpop.permute.xlu2 %1235 }
 0x138   : > { %v1234_v33 = vpop.permute.xlu1 %1233  ;;  %v1512_v46 = vpop.permute.xlu2 %1511 }
 0x139   : > { %v1522_v47 = vsel %vm1114_vm0, %v1512_v46, 0 }
 0x140   : > { %v1510_v2 = vpop.permute.xlu2 %1509 }
 0x147   : > { %v1240_v34 = vpop.permute.xlu0 %1239  ;;  %v1377_v35 = vpop.permute.xlu1 %1376 }
 0x148   : > { %v1251_v36 = vsel %vm1114_vm0, %v1240_v34, 0  ;;  %v1388_v37 = vsel %vm1114_vm0, %v1377_v35, 0  ;;  %v1319_v4 = vpop.permute.xlu2 %1318 }
 0x149   : > { %1259 = vmatpush.bf16.xpose.msrb.mxu0 %v1251_v36  ;;  %1396 = vmatpush.bf16.xpose.msrb.mxu2 %v1388_v37 }
 0x14f   : > { %v1238_v39 = vpop.permute.xlu0 %1237  ;;  %v1371_v43 = vpop.permute.xlu1 %1370 }
 0x150   : > { %v1248_v40 = vsel %vm1114_vm0, %v1238_v39, 0 }
 0x151   : > { %1260 = vmatpush.bf16.xpose.msrb.mxu0 %v1248_v40  ;;  %1397 = vmatpush.bf16.xpose.msrb.mxu2 %v1385_v41 }
 0x157   : > { %v1514_v44 = vpop.permute.xlu0 %1513 }
 0x158   : > { %v1525_v45 = vsel %vm1114_vm0, %v1514_v44, 0  ;;  %3460 = vmatmul.msk.bf16.vlgmr.msrb.gmra.mxu0 %vm1114_vm0, %v1234_v33  ;;  %3464 = vmatmul.msk.bf16.vlgmr.msrb.gmra.mxu2 %vm1114_vm0, %v1371_v43  ;;  %v1373_v49 = vpop.permute.xlu1 %1372 }
 0x159   : > { %1533 = vmatpush.bf16.xpose.msra.mxu0 %v1525_v45 }
 0x15f   : > { %v1508_v58 = vpop.permute.xlu0 %1507 }
 0x160   : > { %v1321_v3 = vpop.permute.xlu1 %1320 }
 0x161   : > { %1534 = vmatpush.bf16.xpose.msra.mxu0 %v1522_v47  ;;  %1336 = vmatpush.bf16.msrb.mxu1 %v1321_v3 }
 0x165   : > { %1337 = vmatpush.bf16.msrb.mxu1 %v1319_v4 }
 0x168   : > { %v1136_v50 = vpop.f32.mrf.mxu3  ;;  %3461 = vmatmul.msk.bf16.gmra.mxu0 %vm1114_vm0, %v1236_v42  ;;  %3465 = vmatmul.msk.bf16.gmra.mxu2 %vm1114_vm0, %v1373_v49 }
 0x169   : > { %v1137_v51 = vadd.f32 %v1136_v50, %v4349_v48 }
 0x16b   : > { %v1146_v52 = vsel %vm1114_vm0, %v1137_v51, -inf }
 0x16c   : > { %1147 = vmax.xlane.f32.xlu0 %v1146_v52 }
 0x170   : > { %v1138_v54 = vpop.f32.mrf.mxu3 }
 0x171   : > { %v1139_v55 = vadd.f32 %v1138_v54, %v4355_v53 }
 0x173   : > { %v1149_v56 = vsel %vm1114_vm0, %v1139_v55, -inf }
 0x174   : > { %1150 = vmax.xlane.f32.xlu1 %v1149_v56 }
 0x178   : > { %v1141_v59 = vpop.f32.mrf.mxu3  ;;  %3468 = vmatmul.msk.bf16.vlgmr.msra.gmra.mxu0 %vm1114_vm0, %v1508_v58 }
 0x179   : > { %v1142_v60 = vadd.f32 %v1141_v59, %v4359_v57 }
 0x17b   : > { %v1152_v61 = vsel %vm1114_vm0, %v1142_v60, -inf }
 0x17c   : > { %1153 = vmax.xlane.f32.xlu0 %v1152_v61 }
 0x180   : > { %v1143_v63 = vpop.f32.mrf.mxu3 }
 0x181   : > { %v1144_v0 = vadd.f32 %v1143_v63, %v4364_v62 }
 0x183   : > { %v1155_v1 = vsel %vm1114_vm0, %v1144_v0, -inf }
 0x184   : > { %1156 = vmax.xlane.f32.xlu1 %v1155_v1 }
 0x188   : > { %3469 = vmatmul.msk.bf16.gmra.mxu0 %vm1114_vm0, %v1510_v2 }
 0x1d5   : > { %v1262_v5 = vpop.f32.mrf.mxu0 }
 0x1d6   : > { %v4370_v6 = vadd.f32 %v1262_v5, %v4349_v48 }
 0x1d8   : > { %v1272_v7 = vsel %vm1114_vm0, %v4370_v6, -inf }
 0x1d9   : > { %1273 = vmax.xlane.f32.xlu2 %v1272_v7 }
 0x1db   : > { %v1399_v8 = vpop.f32.mrf.mxu2 }
 0x1dc   : > { %v4375_v9 = vadd.f32 %v1399_v8, %v4349_v48 }
 0x1dd   : > { %v1264_v10 = vpop.f32.mrf.mxu0 }
 0x1de   : > { %v4378_v11 = vadd.f32 %v1264_v10, %v4355_v53  ;;  %v1409_v12 = vsel %vm1114_vm0, %v4375_v9, -inf }
 0x1df   : > { %1410 = vmax.xlane.f32.xlu1 %v1409_v12  ;;  %v1148_v13 = vpop.xlane.xlu0 %1147 }
 0x1e0   : > { %v1158_v14 = vsub.f32 %v1137_v51, %v1148_v13  ;;  %v1275_v15 = vsel %vm1114_vm0, %v4378_v11, -inf }
 0x1e1   : > { %1276 = vmax.xlane.f32.xlu2 %v1275_v15 }
 0x1e2   : > { %v1162_v16 = vmul.f32 1.442695, %v1158_v14 }
 0x1e3   : > { %v1401_v17 = vpop.f32.mrf.mxu2 }
 0x1e4   : > { %3910 = vpow2.f32 %v1162_v16  ;;  %v4385_v18 = vadd.f32 %v1401_v17, %v4355_v53 }
 0x1e5   : > { %v1267_v22 = vpop.f32.mrf.mxu0 }
 0x1e6   : > { %v1412_v23 = vsel %vm1114_vm0, %v4385_v18, -inf  ;;  %v4394_v29 = vadd.f32 %v1267_v22, %v4359_v57 }
 0x1e7   : > { %v1151_v30 = vpop.xlane.xlu1 %1150 }
 0x1e8   : > { %v1159_v34 = vsub.f32 %v1139_v55, %v1151_v30  ;;  %v1278_v35 = vsel %vm1114_vm0, %v4394_v29, -inf }
 0x1e9   : > { %1413 = vmax.xlane.f32.xlu2 %v1412_v23 }
 0x1ea   : > { %v4389_v24 = vpop.eup %3910  ;;  %v1164_v37 = vmul.f32 1.442695, %v1159_v34 }
 0x1eb   : > { %v1170_v25 = vsel %vm1114_vm0, %v4389_v24, 0.0  ;;  %v1404_v28 = vpop.f32.mrf.mxu2 }
 0x1ec   : > { %1171 = vadd.xlane.f32.xlu1 %v1170_v25  ;;  %v4404_v40 = vadd.f32 %v1404_v28, %v4359_v57  ;;  %3912 = vpow2.f32 %v1164_v37 }
 0x1ed   : > { %v1269_v31 = vpop.f32.mrf.mxu0 }
 0x1ee   : > { %v4397_v33 = vadd.f32 %v1269_v31, %v4364_v62  ;;  %v1415_v46 = vsel %vm1114_vm0, %v4404_v40, -inf }
 0x1ef   : > { %v1154_v38 = vpop.xlane.xlu0 %1153 }
 0x1f0   : > { %v1281_v36 = vsel %vm1114_vm0, %v4397_v33, -inf  ;;  %v1160_v43 = vsub.f32 %v1142_v60, %v1154_v38 }
 0x1f1   : > { %1279 = vmax.xlane.f32.xlu2 %v1278_v35  ;;  %1282 = vmax.xlane.f32.xlu0 %v1281_v36 }
 0x1f2   : > { %v1166_v49 = vmul.f32 1.442695, %v1160_v43  ;;  %v4416_v52 = vpop.eup %3912 }
 0x1f3   : > { %v1406_v39 = vpop.f32.mrf.mxu2  ;;  %v1173_v56 = vsel %vm1114_vm0, %v4416_v52, 0.0 }
 0x1f4   : > { %v4407_v41 = vadd.f32 %v1406_v39, %v4364_v62  ;;  %3914 = vpow2.f32 %v1166_v49 }
 0x1f5   : > { %v1536_v42 = vpop.f32.mrf.mxu0 }
 0x1f6   : > { %v1418_v47 = vsel %vm1114_vm0, %v4407_v41, -inf  ;;  %v4414_v51 = vadd.f32 %v1536_v42, %v4349_v48 }
 0x1f7   : > { %v1157_v44 = vpop.xlane.xlu1 %1156 }
 0x1f8   : > { %v1161_v45 = vsub.f32 %v1144_v0, %v1157_v44  ;;  %v1546_v58 = vsel %vm1114_vm0, %v4414_v51, -inf }
 0x1f9   : > { %1416 = vmax.xlane.f32.xlu2 %v1415_v46  ;;  %1419 = vmax.xlane.f32.xlu0 %v1418_v47 }
 0x1fa   : > { %v1168_v50 = vmul.f32 1.442695, %v1161_v45  ;;  %v4427_v48 = vpop.eup %3914 }
 0x1fb   : > { %v1176_v63 = vsel %vm1114_vm0, %v4427_v48, 0.0 }
 0x1fc   : > { %3916 = vpow2.f32 %v1168_v50 }
 0x1fd   : > { %v1538_v54 = vpop.f32.mrf.mxu0 }
 0x1fe   : > { %v4419_v55 = vadd.f32 %v1538_v54, %v4355_v53 }
 0x200   : > { %v1549_v59 = vsel %vm1114_vm0, %v4419_v55, -inf }
 0x201   : > { %1174 = vadd.xlane.f32.xlu2 %v1173_v56  ;;  %1547 = vmax.xlane.f32.xlu0 %v1546_v58 }
 0x202   : > { %1550 = vmax.xlane.f32.xlu1 %v1549_v59  ;;  %v4429_v60 = vpop.eup %3916 }
 0x203   : > { %v1179_v53 = vsel %vm1114_vm0, %v4429_v60, 0.0 }
 0x205   : > { %v1541_v61 = vpop.f32.mrf.mxu0 }
 0x206   : > { %v4436_v0 = vadd.f32 %v1541_v61, %v4359_v57 }
 0x208   : > { %v1552_v3 = vsel %vm1114_vm0, %v4436_v0, -inf }
 0x209   : > { %1180 = vadd.xlane.f32.xlu0 %v1179_v53  ;;  %1177 = vadd.xlane.f32.xlu2 %v1176_v63 }
 0x20d   : > { %v1543_v1 = vpop.f32.mrf.mxu0 }
 0x20e   : > { %v4439_v2 = vadd.f32 %v1543_v1, %v4364_v62 }
 0x210   : > { %v1555_v4 = vsel %vm1114_vm0, %v4439_v2, -inf }
 0x211   : > { %1553 = vmax.xlane.f32.xlu0 %v1552_v3  ;;  %1556 = vmax.xlane.f32.xlu1 %v1555_v4 }
 0x24c   : > { %v1274_v5 = vpop.xlane.xlu2 %1273 }
 0x24d   : > { %v1284_v7 = vsub.f32 %v4370_v6, %v1274_v5 }
 0x24f   : > { %v1288_v8 = vmul.f32 1.442695, %v1284_v7 }
 0x251   : > { %3918 = vpow2.f32 %v1288_v8 }
 0x252   : > { %v1411_v10 = vpop.xlane.xlu1 %1410 }
 0x253   : > { %v1421_v57 = vsub.f32 %v4375_v9, %v1411_v10 }
 0x254   : > { %v1277_v12 = vpop.xlane.xlu2 %1276 }
 0x255   : > { %v1425_v13 = vmul.f32 1.442695, %v1421_v57  ;;  %v1285_v62 = vsub.f32 %v4378_v11, %v1277_v12 }
 0x257   : > { %v4448_v14 = vpop.eup %3918  ;;  %3920 = vpow2.f32 %v1425_v13  ;;  %v1290_v15 = vmul.f32 1.442695, %v1285_v62 }
 0x258   : > { %v1296_v16 = vsel %vm1114_vm0, %v4448_v14, 0.0 }
 0x259   : > { %3922 = vpow2.f32 %v1290_v15  ;;  %1297 = vadd.xlane.f32.xlu2 %v1296_v16 }
 0x25c   : > { %v1414_v17 = vpop.xlane.xlu2 %1413 }
 0x25d   : > { %v4452_v6 = vpop.eup %3920  ;;  %v1422_v22 = vsub.f32 %v4385_v18, %v1414_v17 }
 0x25e   : > { %v1433_v9 = vsel %vm1114_vm0, %v4452_v6, 0.0 }
 0x25f   : > { %v4457_v23 = vpop.eup %3922  ;;  %v1427_v11 = vmul.f32 1.442695, %v1422_v22  ;;  %1434 = vadd.xlane.f32.xlu1 %v1433_v9  ;;  %v1172_v43 = vpop.xlane.xlu1 %1171 }
 0x260   : > { %v1299_v25 = vsel %vm1114_vm0, %v4457_v23, 0.0 }
 0x261   : > { %3924 = vpow2.f32 %v1427_v11  ;;  %1300 = vadd.xlane.f32.xlu0 %v1299_v25 }
 0x264   : > { %v1280_v28 = vpop.xlane.xlu2 %1279  ;;  %v1283_v30 = vpop.xlane.xlu0 %1282 }
 0x265   : > { %v1286_v31 = vsub.f32 %v4394_v29, %v1280_v28  ;;  %v1287_v18 = vsub.f32 %v4397_v33, %v1283_v30 }
 0x267   : > { %v4462_v34 = vpop.eup %3924  ;;  %v1292_v35 = vmul.f32 1.442695, %v1286_v31  ;;  %v1294_v37 = vmul.f32 1.442695, %v1287_v18 }
 0x268   : > { %v1436_v36 = vsel %vm1114_vm0, %v4462_v34, 0.0 }
 0x269   : > { %3926 = vpow2.f32 %v1292_v35  ;;  %1437 = vadd.xlane.f32.xlu0 %v1436_v36 }
 0x26a   : > { %3928 = vpow2.f32 %v1294_v37 }
 0x26b   : > { %3930 = vrcp.f32 %v1172_v43 }
 0x26c   : > { %v4467_v38 = vpop.xlane.xlu2 %1416  ;;  %v1420_v39 = vpop.xlane.xlu0 %1419 }
 0x26d   : > { %v1424_v8 = vsub.f32 %v4407_v41, %v1420_v39  ;;  %v1423_v22 = vsub.f32 %v4404_v40, %v4467_v38 }
 0x26f   : > { %v4469_v42 = vpop.eup %3926  ;;  %v1431_v10 = vmul.f32 1.442695, %v1424_v8  ;;  %v1429_v9 = vmul.f32 1.442695, %v1423_v22 }
 0x270   : > { %v1302_v29 = vsel %vm1114_vm0, %v4469_v42, 0.0  ;;  %v4475_v45 = vpop.eup %3928 }
 0x271   : > { %1303 = vadd.xlane.f32.xlu0 %v1302_v29  ;;  %1457 = vrot.lane.b32.xlu2 %v4331_v32, %s4072_s2  ;;  %v1305_v49 = vsel %vm1114_vm0, %v4475_v45, 0.0  ;;  %v3931_v50 = vpop.eup %3930 }
 0x272   : > { %v1186_v56 = vmul.f32 %v3931_v50, %v4389_v24 }
 0x274   : > { %v1175_v33 = vpop.xlane.xlu2 %1174  ;;  %v1548_v44 = vpop.xlane.xlu0 %1547 }
 0x275   : > { %3932 = vrcp.f32 %v1175_v33  ;;  %v1558_v46 = vsub.f32 %v4414_v51, %v1548_v44  ;;  %v1551_v51 = vpop.xlane.xlu1 %1550 }
 0x277   : > { %v1562_v47 = vmul.f32 1.442695, %v1558_v46 }
 0x278   : > { %1594 = vrot.lane.b32.xlu1 %v4331_v32, %s4074_s7 }
 0x279   : > { %3934 = vpow2.f32 %v1562_v47  ;;  %1306 = vadd.xlane.f32.xlu0 %v1305_v49 }
 0x27b   : > { %v3933_v54 = vpop.eup %3932 }
 0x27c   : > { %v1187_v58 = vmul.f32 %v3933_v54, %v4416_v52  ;;  %v1178_v59 = vpop.xlane.xlu2 %1177  ;;  %v1181_v61 = vpop.xlane.xlu0 %1180  ;;  %v1559_v52 = vsub.f32 %v4419_v55, %v1551_v51 }
 0x27d   : > { %3936 = vrcp.f32 %v1178_v59 }
 0x27e   : > { %v1190_v53 = vpack.c.bf16 %v1187_v58, %v1186_v56  ;;  %3938 = vrcp.f32 %v1181_v61  ;;  %v1564_v5 = vmul.f32 1.442695, %v1559_v52 }
 0x27f   : > { %v4484_v63 = vpop.eup %3934 }
 0x280   : > { %1592 = vrot.lane.b32.xlu1 %v4327_v21, %s4074_s7  ;;  %3458 = vmatmul.msk.bf16.vlgmr.msrb.gmra.mxu3 %vm1114_vm0, %v1190_v53  ;;  %v1570_v32 = vsel %vm1114_vm0, %v4484_v63, 0.0  ;;  %3940 = vpow2.f32 %v1564_v5 }
 0x281   : > { %1571 = vadd.xlane.f32.xlu0 %v1570_v32  ;;  %3942 = vpow2.f32 %v1431_v10 }
 0x283   : > { %v3937_v24 = vpop.eup %3936 }
 0x284   : > { %v3939_v1 = vpop.eup %3938  ;;  %v1188_v3 = vmul.f32 %v3937_v24, %v4427_v48  ;;  %v1557_v57 = vpop.xlane.xlu1 %1556 }
 0x285   : > { %v1189_v4 = vmul.f32 %v3939_v1, %v4429_v60  ;;  %v1554_v12 = vpop.xlane.xlu0 %1553  ;;  %v1561_v55 = vsub.f32 %v4439_v2, %v1557_v57 }
 0x286   : > { %v4498_v13 = vpop.eup %3940  ;;  %v1560_v48 = vsub.f32 %v4436_v0, %v1554_v12 }
 0x287   : > { %v1191_v7 = vpack.c.bf16 %v1189_v4, %v1188_v3  ;;  %v1573_v60 = vsel %vm1114_vm0, %v4498_v13, 0.0  ;;  %v1568_v41 = vmul.f32 1.442695, %v1561_v55  ;;  %v4504_v15 = vpop.eup %3942 }
 0x288   : > { %v1566_v62 = vmul.f32 1.442695, %v1560_v48 }
 0x289   : > { %3944 = vpow2.f32 %v1568_v41 }
 0x28a   : > { %3946 = vpow2.f32 %v1566_v62 }
 0x28b   : > { %3948 = vpow2.f32 %v1429_v9 }
 0x28f   : > { %v4508_v16 = vpop.eup %3944 }
 0x290   : > { %3459 = vmatmul.msk.bf16.gmra.mxu3 %vm1114_vm0, %v1191_v7  ;;  %v4510_v2 = vpop.eup %3946  ;;  %v1579_v0 = vsel %vm1114_vm0, %v4508_v16, 0.0 }
 0x291   : > { %v1576_v17 = vsel %vm1114_vm0, %v4510_v2, 0.0  ;;  %v4518_v11 = vpop.eup %3948 }
 0x292   : > { %v1439_v25 = vsel %vm1114_vm0, %v4518_v11, 0.0 }
 0x295   : > { %1455 = vrot.lane.b32.xlu0 %v4327_v21, %s4072_s2  ;;  %v1442_v21 = vsel %vm1114_vm0, %v4504_v15, 0.0 }
 0x29a   : > { %1574 = vadd.xlane.f32.xlu2 %v1573_v60 }
 0x2a2   : > { %1443 = vadd.xlane.f32.xlu2 %v1442_v21 }
 0x2aa   : > { %1580 = vadd.xlane.f32.xlu1 %v1579_v0  ;;  %1577 = vadd.xlane.f32.xlu2 %v1576_v17 }
 0x2bf   : > { %1440 = vadd.xlane.f32.xlu0 %v1439_v25 }
 0x2cc   : > { %v1298_v28 = vpop.xlane.xlu2 %1297 }
 0x2cd   : > { %3950 = vrcp.f32 %v1298_v28 }
 0x2d2   : > { %v1435_v39 = vpop.xlane.xlu1 %1434 }
 0x2d3   : > { %v3951_v35 = vpop.eup %3950 }
 0x2d4   : > { %v1458_v30 = vpop.permute.xlu2 %1457  ;;  %v1301_v31 = vpop.xlane.xlu0 %1300  ;;  %v1312_v36 = vmul.f32 %v3951_v35, %v4448_v14 }
 0x2d5   : > { %3952 = vrcp.f32 %v1301_v31  ;;  %1473 = vmatpush.bf16.msra.mxu3 %v1458_v30 }
 0x2db   : > { %v3953_v18 = vpop.eup %3952 }
 0x2dc   : > { %v1313_v40 = vmul.f32 %v3953_v18, %v4457_v23  ;;  %v1438_v37 = vpop.xlane.xlu0 %1437  ;;  %v3824_v18 = vld [vmem:[%s5258_s10 + $0x38] sm:$0xff] }
 0x2dd   : > { %1718 = vmatpush.bf16.msra.mxu2 %v3824_v18 }
 0x2de   : > { %v1316_v38 = vpack.c.bf16 %v1313_v40, %v1312_v36  ;;  %v3823_v36 = vld [vmem:[%s5258_s10 + $0x30] sm:$0xff]  ;;  %v3822_v40 = vld [vmem:[%s5258_s10 + $0x28] sm:$0xff] }
 0x2e0   : > { %3462 = vmatmul.msk.bf16.vlgmr.msrb.gmra.mxu1 %vm1114_vm0, %v1316_v38 }
 0x2e1   : > { %1719 = vmatpush.bf16.msra.mxu2 %v3823_v36  ;;  %v3833_v36 = vld [vmem:[%s5262_s14] sm:$0xff] }
 0x2e4   : > { %v1304_v43 = vpop.xlane.xlu0 %1303 }
 0x2e5   : > { %3954 = vrcp.f32 %v1304_v43  ;;  %1720 = vmatpush.bf16.msra.mxu2 %v3822_v40  ;;  %v3820_v43 = vld [vmem:[%s5258_s10 + $0x18] sm:$0xff] }
 0x2ea   : > { %v1595_v29 = vpop.permute.xlu1 %1594 }
 0x2eb   : > { %1610 = vmatpush.bf16.msra.mxu1 %v1595_v29  ;;  %v3955_v44 = vpop.eup %3954  ;;  %v3819_v29 = vld [vmem:[%s5258_s10 + $0x10] sm:$0xff] }
 0x2ec   : > { %v1307_v33 = vpop.xlane.xlu0 %1306  ;;  %v1314_v49 = vmul.f32 %v3955_v44, %v4469_v42  ;;  %v3818_v44 = vld [vmem:[%s5258_s10 + $0x8] sm:$0xff] }
 0x2ed   : > { %3956 = vrcp.f32 %v1307_v33 }
 0x2ee   : > { %3958 = vrcp.f32 %v1438_v37  ;;  %v3821_v37 = vld [vmem:[%s5258_s10 + $0x20] sm:$0xff] }
 0x2ef   : > { %3960 = vrcp.f32 %v1435_v39  ;;  %1721 = vmatpush.bf16.msra.mxu2 %v3821_v37  ;;  %v4647_v37 = vld [vmem:[%s782_s24] sm:$0xff] }
 0x2f2   : > { %v1593_v46 = vpop.permute.xlu1 %1592 }
 0x2f3   : > { %v3957_v47 = vpop.eup %3956  ;;  %1611 = vmatpush.bf16.msra.mxu1 %v1593_v46  ;;  %1722 = vmatpush.bf16.msra.mxu2 %v3820_v43  ;;  %v3817_v46 = vld [vmem:[%s5258_s10] sm:$0xff]  ;;  %v3832_v43 = vld [vmem:[%s5260_s12 + $0x38] sm:$0xff] }
 0x2f4   : > { %v1315_v14 = vmul.f32 %v3957_v47, %v4475_v45  ;;  %v1572_v50 = vpop.xlane.xlu0 %1571  ;;  %v3959_v54 = vpop.eup %3958 }
 0x2f5   : > { %v3961_v58 = vpop.eup %3960  ;;  %v1450_v59 = vmul.f32 %v3959_v54, %v4462_v34  ;;  %3962 = vrcp.f32 %v1572_v50 }
 0x2f6   : > { %v1317_v23 = vpack.c.bf16 %v1315_v14, %v1314_v49  ;;  %v1449_v61 = vmul.f32 %v3961_v58, %v4452_v6 }
 0x2f7   : > { %1723 = vmatpush.bf16.msra.mxu2 %v3819_v29  ;;  %v3831_v29 = vld [vmem:[%s5260_s12 + $0x30] sm:$0xff] }
 0x2f8   : > { %3463 = vmatmul.msk.bf16.gmra.mxu1 %vm1114_vm0, %v1317_v23  ;;  %v1453_v42 = vpack.c.bf16 %v1450_v59, %v1449_v61 }
 0x2fb   : > { %v3963_v51 = vpop.eup %3962  ;;  %1724 = vmatpush.bf16.msra.mxu2 %v3818_v44  ;;  %v3829_v44 = vld [vmem:[%s5260_s12 + $0x20] sm:$0xff] }
 0x2fc   : > { %v1586_v34 = vmul.f32 %v3963_v51, %v4484_v63 }
 0x2ff   : > { %1725 = vmatpush.bf16.msra.mxu2 %v3817_v46  ;;  %v3828_v46 = vld [vmem:[%s5260_s12 + $0x18] sm:$0xff] }
 0x303   : > { %v1219_v56 = vpop.f32.mrf.mxu3 }
 0x304   : > { %1229 = vst.msk [vmem:[#allocation2] sm:$0xff] %vm1114_vm0, %v1219_v56 }
 0x307   : > { %v1456_v53 = vpop.permute.xlu0 %1455 }
 0x308   : > { %1474 = vmatpush.bf16.msra.mxu3 %v1456_v53 }
 0x30b   : > { %v1221_v32 = vpop.f32.mrf.mxu3  ;;  %3466 = vmatmul.msk.bf16.vlgmr.msra.gmra.mxu3 %vm1114_vm0, %v1453_v42 }
 0x30c   : > { %1230 = vst.msk [vmem:[#allocation2 + $0x8] sm:$0xff] %vm1114_vm0, %v1221_v32  ;;  %1898 = vmatpush.bf16.msrb.mxu3 %v3832_v43 }
 0x30d   : > { %v1575_v45 = vpop.xlane.xlu2 %1574 }
 0x30e   : > { %3964 = vrcp.f32 %v1575_v45  ;;  %v3904_v45 = vld [vmem:[%s5259_s11] ss:$0 sm:$0xff] }
 0x310   : > { %1899 = vmatpush.bf16.msrb.mxu3 %v3831_v29 }
 0x313   : > { %v1224_v24 = vpop.f32.mrf.mxu3 }
 0x314   : > { %v3965_v1 = vpop.eup %3964  ;;  %1231 = vst.msk [vmem:[#allocation2 + $0x10] sm:$0xff] %vm1114_vm0, %v1224_v24 }
 0x315   : > { %v1587_v6 = vmul.f32 %v3965_v1, %v4498_v13  ;;  %v1444_v52 = vpop.xlane.xlu2 %1443 }
 0x317   : > { %v1590_v3 = vpack.c.bf16 %v1587_v6, %v1586_v34 }
 0x319   : > { %3470 = vmatmul.msk.bf16.vlgmr.msra.gmra.mxu1 %vm1114_vm0, %v1590_v3 }
 0x31b   : > { %v1226_v4 = vpop.f32.mrf.mxu3 }
 0x31c   : > { %1232 = vst.msk [vmem:[#allocation2 + $0x18] sm:$0xff] %vm1114_vm0, %v1226_v4 }
 0x31d   : > { %v1581_v5 = vpop.xlane.xlu1 %1580  ;;  %v1578_v7 = vpop.xlane.xlu2 %1577 }
 0x31e   : > { %3966 = vrcp.f32 %v1581_v5 }
 0x31f   : > { %3968 = vrcp.f32 %v1578_v7 }
 0x320   : > { %3970 = vrcp.f32 %v1444_v52 }
 0x324   : > { %v3967_v8 = vpop.eup %3966 }
 0x325   : > { %v3969_v10 = vpop.eup %3968  ;;  %v1589_v57 = vmul.f32 %v3967_v8, %v4508_v16 }
 0x326   : > { %v1588_v12 = vmul.f32 %v3969_v10, %v4510_v2  ;;  %v3971_v55 = vpop.eup %3970 }
 0x327   : > { %v1452_v41 = vmul.f32 %v3971_v55, %v4504_v15 }
 0x328   : > { %v1591_v63 = vpack.c.bf16 %v1589_v57, %v1588_v12  ;;  %v4075_v57 = vmov 128.0  }
 0x32a   : > { %3471 = vmatmul.msk.bf16.gmra.mxu1 %vm1114_vm0, %v1591_v63 }
 0x332   : > { %v1441_v13 = vpop.xlane.xlu0 %1440 }
 0x333   : > { %3972 = vrcp.f32 %v1441_v13 }
 0x334   : > { %3974 = vrcp.f32 %v4075_v57 }
 0x339   : > { %v3973_v48 = vpop.eup %3972 }
 0x33a   : > { %v1451_v60 = vmul.f32 %v3973_v48, %v4518_v11  ;;  %v3975_v12 = vpop.eup %3974 }
 0x33b   : > { %vm1754_vm4 = vweird.f32 %v3975_v12 }
 0x33c   : > { %v1454_v62 = vpack.c.bf16 %v1452_v41, %v1451_v60 }
 0x33e   : > { %3467 = vmatmul.msk.bf16.gmra.mxu3 %vm1114_vm0, %v1454_v62 }
 0x35d   : > { %v1339_v21 = vpop.f32.mrf.mxu1 }
 0x35e   : > { %1353 = vrot.lane.b32.xlu2 %v1339_v21, %s4074_s7 }
 0x365   : > { %v1341_v16 = vpop.f32.mrf.mxu1 }
 0x366   : > { %1355 = vrot.lane.b32.xlu0 %v1341_v16, %s4074_s7 }
 0x375   : > { %v1344_v2 = vpop.f32.mrf.mxu1 }
 0x376   : > { %1357 = vrot.lane.b32.xlu1 %v1344_v2, %s4074_s7  ;;  %v3840_v2 = vld [vmem:[%s5262_s14 + $0x38] sm:$0xff] }
 0x377   : > { %1997 = vmatpush.bf16.msrb.mxu0 %v3840_v2  ;;  %v3844_v2 = vld [vmem:[%s5264_s16 + $0x18] sm:$0xff] }
 0x37d   : > { %v1346_v0 = vpop.f32.mrf.mxu1 }
 0x38e   : > { %v1476_v17 = vpop.f32.mrf.mxu3 }
 0x38f   : > { %1490 = vrot.lane.b32.xlu2 %v1476_v17, %s4072_s2  ;;  %v3838_v17 = vld [vmem:[%s5262_s14 + $0x28] sm:$0xff] }
 0x396   : > { %v1478_v22 = vpop.f32.mrf.mxu3  ;;  %v1613_v9 = vpop.f32.mrf.mxu1 }
 0x397   : > { %1359 = vrot.lane.b32.xlu2 %v1346_v0, %s4074_s7  ;;  %1492 = vrot.lane.b32.xlu0 %v1478_v22, %s4072_s2  ;;  %v3839_v0 = vld [vmem:[%s5262_s14 + $0x30] sm:$0xff]  ;;  %v3837_v22 = vld [vmem:[%s5262_s14 + $0x20] sm:$0xff] }
 0x398   : > { %1998 = vmatpush.bf16.msrb.mxu0 %v3839_v0  ;;  %v3905_v0 = vld [vmem:[%s5263_s15] ss:$0 sm:$0xff] }
 0x39c   : > { %1999 = vmatpush.bf16.msrb.mxu0 %v3838_v17 }
 0x39e   : > { %v1615_v15 = vpop.f32.mrf.mxu1 }
 0x39f   : > { %1627 = vrot.lane.b32.xlu2 %v1613_v9, %s4073_s29  ;;  %1629 = vrot.lane.b32.xlu0 %v1615_v15, %s4073_s29  ;;  %v3836_v9 = vld [vmem:[%s5262_s14 + $0x18] sm:$0xff] }
 0x3a0   : > { %2000 = vmatpush.bf16.msrb.mxu0 %v3837_v22 }
 0x3a4   : > { %2001 = vmatpush.bf16.msrb.mxu0 %v3836_v9 }
 0x3a7   : > { %v1618_v28 = vpop.f32.mrf.mxu1 }
 0x3af   : > { %v1620_v31 = vpop.f32.mrf.mxu1 }
 0x3b8   : > { %v1354_v11 = vpop.permute.xlu2 %1353 }
 0x3b9   : > { %1366 = vst.msk [vmem:[#allocation2] sm:$0xff] %vm1365_vm1, %v1354_v11 }
 0x3c1   : > { %v1481_v25 = vpop.f32.mrf.mxu3 }
 0x3c2   : > { %1494 = vrot.lane.b32.xlu0 %v1481_v25, %s4072_s2  ;;  %v3835_v25 = vld [vmem:[%s5262_s14 + $0x10] sm:$0xff] }
 0x3c3   : > { %2002 = vmatpush.bf16.msrb.mxu0 %v3835_v25 }
 0x3c9   : > { %v1483_v30 = vpop.f32.mrf.mxu3 }
 0x3ca   : > { %1631 = vrot.lane.b32.xlu0 %v1618_v28, %s4073_s29  ;;  %1496 = vrot.lane.b32.xlu2 %v1483_v30, %s4072_s2 }
 0x3d2   : > { %1633 = vrot.lane.b32.xlu2 %v1620_v31, %s4073_s29  ;;  %v3834_v31 = vld [vmem:[%s5262_s14 + $0x8] sm:$0xff] }
 0x3d3   : > { %2003 = vmatpush.bf16.msrb.mxu0 %v3834_v31 }
 0x3d7   : > { %2004 = vmatpush.bf16.msrb.mxu0 %v3833_v36 }
 0x3d8   : > { %v1356_v35 = vpop.permute.xlu0 %1355 }
 0x3d9   : > { %1367 = vst.msk [vmem:[#allocation2 + $0x8] sm:$0xff] %vm1365_vm1, %v1356_v35 }
 0x3da   : > { %2005 = vmatmul.bf16.vlgmr.msrb.gmra.mxu0 %v4647_v37 }
 0x3e8   : > { %v1358_v38 = vpop.permute.xlu1 %1357 }
 0x3e9   : > { %1368 = vst.msk [vmem:[#allocation2 + $0x10] sm:$0xff] %vm1365_vm1, %v1358_v38  ;;  %v1491_v39 = vpop.permute.xlu2 %1490 }
 0x3ea   : > { %1503 = vst.msk [vmem:[#allocation2] sm:$0xff] %vm1502_vm2, %v1491_v39  ;;  %v4652_v39 = vld [vmem:[%s782_s24 + $0x8] sm:$0xff] }
 0x3eb   : > { %2010 = vmatmul.bf16.gmra.mxu0 %v4652_v39 }
 0x3f1   : > { %v1360_v33 = vpop.permute.xlu2 %1359 }
 0x3f2   : > { %1369 = vst.msk [vmem:[#allocation2 + $0x18] sm:$0xff] %vm1365_vm1, %v1360_v33  ;;  %v3830_v33 = vld [vmem:[%s5260_s12 + $0x28] sm:$0xff] }
 0x3f3   : > { %1900 = vmatpush.bf16.msrb.mxu3 %v3830_v33 }
 0x3f7   : > { %1901 = vmatpush.bf16.msrb.mxu3 %v3829_v44 }
 0x3f9   : > { %v1628_v47 = vpop.permute.xlu2 %1627 }
 0x3fa   : > { %1640 = vst.msk [vmem:[#allocation2] sm:$0xff] %vm1639_vm3, %v1628_v47  ;;  %v3827_v47 = vld [vmem:[%s5260_s12 + $0x10] sm:$0xff] }
 0x3fb   : > { %1902 = vmatpush.bf16.msrb.mxu3 %v3828_v46  ;;  %v3841_v46 = vld [vmem:[%s5264_s16] sm:$0xff] }
 0x3ff   : > { %1903 = vmatpush.bf16.msrb.mxu3 %v3827_v47 }
 0x401   : > { %v1644_v23 = vld [vmem:[#allocation2] sm:$0xff] }
 0x409   : > { %v1493_v49 = vpop.permute.xlu0 %1492 }
 0x40a   : > { %1504 = vst.msk [vmem:[#allocation2 + $0x8] sm:$0xff] %vm1502_vm2, %v1493_v49  ;;  %v3826_v49 = vld [vmem:[%s5260_s12 + $0x8] sm:$0xff] }
 0x40b   : > { %1904 = vmatpush.bf16.msrb.mxu3 %v3826_v49 }
 0x411   : > { %v1630_v14 = vpop.permute.xlu0 %1629 }
 0x412   : > { %1641 = vst.msk [vmem:[#allocation2 + $0x8] sm:$0xff] %vm1639_vm3, %v1630_v14  ;;  %v3825_v14 = vld [vmem:[%s5260_s12] sm:$0xff] }
 0x413   : > { %1905 = vmatpush.bf16.msrb.mxu3 %v3825_v14 }
 0x419   : > { %v1645_v50 = vld [vmem:[#allocation2 + $0x8] sm:$0xff] }
 0x41a   : > { %v1648_v54 = vpack.c.bf16 %v1645_v50, %v1644_v23 }
 0x41c   : > { %1726 = vmatmul.bf16.vlgmr.msra.gmra.mxu2 %v1648_v54 }
 0x424   : > { %v1497_v56 = vpop.permute.xlu2 %1496 }
 0x425   : > { %1506 = vst.msk [vmem:[#allocation2 + $0x18] sm:$0xff] %vm1502_vm2, %v1497_v56 }
 0x42c   : > { %v1634_v58 = vpop.permute.xlu2 %1633 }
 0x42d   : > { %1643 = vst.msk [vmem:[#allocation2 + $0x18] sm:$0xff] %vm1639_vm3, %v1634_v58 }
 0x434   : > { %v1495_v59 = vpop.permute.xlu0 %1494  ;;  %v1647_v42 = vld [vmem:[#allocation2 + $0x18] sm:$0xff] }
 0x435   : > { %1505 = vst.msk [vmem:[#allocation2 + $0x10] sm:$0xff] %vm1502_vm2, %v1495_v59 }
 0x43c   : > { %v1632_v61 = vpop.permute.xlu0 %1631 }
 0x43d   : > { %1642 = vst.msk [vmem:[#allocation2 + $0x10] sm:$0xff] %vm1639_vm3, %v1632_v61 }
 0x444   : > { %v1646_v53 = vld [vmem:[#allocation2 + $0x10] sm:$0xff] }
 0x445   : > { %v1649_v32 = vpack.c.bf16 %v1647_v42, %v1646_v53 }
 0x447   : > { %1731 = vmatmul.bf16.gmra.mxu2 %v1649_v32 }
 0x457   : > { %v2006_v22 = vpop.f32.mrf.mxu0 }
 0x45f   : > { %v2008_v43 = vpop.f32.mrf.mxu0 }
 0x460   : > { %v2009_v44 = vadd.f32 %v3905_v0, %v2008_v43 }
 0x462   : > { %v2112_v14 = vpack.c.bf16 %v2009_v44, %v2009_v44 }
 0x49f   : > { %v1727_v51 = vpop.f32.mrf.mxu2 }
 0x4a0   : > { %v1728_v24 = vadd.f32 %v3904_v45, %v1727_v51 }
 0x4a2   : > { %v1737_v1 = vadd.f32 %v1728_v24, %v4275_v19  ;;  %v1750_v19 = vmul.f32 128.0, %v3975_v12 }
 0x4a4   : > { %1741 = vadd.xlane.f32.xlu0 %v1737_v1  ;;  %v1751_v63 = vsub.f32 1.0, %v1750_v19 }
 0x4a6   : > { %v1752_v13 = vmul.f32 %v3975_v12, %v1751_v63  ;;  %v3848_v63 = vld [vmem:[%s5264_s16 + $0x38] sm:$0xff] }
 0x4a7   : > { %v1729_v34 = vpop.f32.mrf.mxu2  ;;  %2084 = vmatpush.bf16.msrb.mxu1 %v3848_v63 }
 0x4a8   : > { %v1730_v6 = vadd.f32 %v3904_v45, %v1729_v34  ;;  %v1753_v55 = vadd.f32 %v3975_v12, %v1752_v13  ;;  %v3847_v13 = vld [vmem:[%s5264_s16 + $0x30] sm:$0xff] }
 0x4aa   : > { %v1738_v52 = vadd.f32 %v1730_v6, %v4277_v20  ;;  %v4599_v20 = vsel %vm1754_vm4, %v3975_v12, %v1753_v55 }
 0x4ab   : > { %2085 = vmatpush.bf16.msrb.mxu1 %v3847_v13 }
 0x4ac   : > { %1743 = vadd.xlane.f32.xlu1 %v1738_v52 }
 0x4ca   : > { %v1732_v3 = vpop.f32.mrf.mxu2 }
 0x4cb   : > { %v1733_v4 = vadd.f32 %v3904_v45, %v1732_v3 }
 0x4cd   : > { %v1739_v5 = vadd.f32 %v1733_v4, %v4293_v26 }
 0x4cf   : > { %1745 = vadd.xlane.f32.xlu2 %v1739_v5 }
 0x4d2   : > { %v1734_v7 = vpop.f32.mrf.mxu2 }
 0x4d3   : > { %v1735_v8 = vadd.f32 %v3904_v45, %v1734_v7 }
 0x4d5   : > { %v1740_v10 = vadd.f32 %v1735_v8, %v4295_v27 }
 0x4d7   : > { %1747 = vadd.xlane.f32.xlu0 %v1740_v10 }
 0x517   : > { %v1742_v48 = vpop.xlane.xlu0 %1741 }
 0x518   : > { %v1756_v60 = vmul.f32 %v4599_v20, %v1742_v48 }
 0x51a   : > { %v4602_v26 = vsub.f32 %v1737_v1, %v1756_v60  ;;  %v3846_v60 = vld [vmem:[%s5264_s16 + $0x28] sm:$0xff] }
 0x51b   : > { %2086 = vmatpush.bf16.msrb.mxu1 %v3846_v60  ;;  %v3907_v60 = vld [vmem:[%s5265_s17] ss:$0 sm:$0xff] }
 0x51c   : > { %v1764_v41 = vmul.f32 %v4602_v26, %v4602_v26 }
 0x51e   : > { %1768 = vadd.xlane.f32.xlu1 %v1764_v41 }
 0x51f   : > { %v1744_v27 = vpop.xlane.xlu1 %1743 }
 0x520   : > { %v1757_v62 = vmul.f32 %v4599_v20, %v1744_v27 }
 0x522   : > { %v4607_v21 = vsub.f32 %v1738_v52, %v1757_v62  ;;  %v3845_v62 = vld [vmem:[%s5264_s16 + $0x20] sm:$0xff] }
 0x523   : > { %2087 = vmatpush.bf16.msrb.mxu1 %v3845_v62 }
 0x524   : > { %v1765_v16 = vmul.f32 %v4607_v21, %v4607_v21 }
 0x526   : > { %1770 = vadd.xlane.f32.xlu2 %v1765_v16 }
 0x527   : > { %2088 = vmatpush.bf16.msrb.mxu1 %v3844_v2 }
 0x542   : > { %v1746_v15 = vpop.xlane.xlu2 %1745 }
 0x543   : > { %v1758_v11 = vmul.f32 %v4599_v20, %v1746_v15 }
 0x545   : > { %v4630_v28 = vsub.f32 %v1739_v5, %v1758_v11  ;;  %v3843_v11 = vld [vmem:[%s5264_s16 + $0x10] sm:$0xff] }
 0x546   : > { %2089 = vmatpush.bf16.msrb.mxu1 %v3843_v11 }
 0x547   : > { %v1766_v30 = vmul.f32 %v4630_v28, %v4630_v28 }
 0x549   : > { %1772 = vadd.xlane.f32.xlu0 %v1766_v30  ;;  %v2007_v30 = vadd.f32 %v3905_v0, %v2006_v22 }
 0x54a   : > { %v1748_v35 = vpop.xlane.xlu0 %1747 }
 0x54b   : > { %v1759_v18 = vmul.f32 %v4599_v20, %v1748_v35 }
 0x54d   : > { %v4645_v40 = vsub.f32 %v1740_v10, %v1759_v18  ;;  %v3842_v18 = vld [vmem:[%s5264_s16 + $0x8] sm:$0xff] }
 0x54e   : > { %2090 = vmatpush.bf16.msrb.mxu1 %v3842_v18 }
 0x54f   : > { %v1767_v38 = vmul.f32 %v4645_v40, %v4645_v40 }
 0x551   : > { %1774 = vadd.xlane.f32.xlu1 %v1767_v38  ;;  %v2111_v38 = vpack.c.bf16 %v2007_v30, %v2007_v30 }
 0x552   : > { %2091 = vmatpush.bf16.msrb.mxu1 %v3841_v46 }
 0x553   : > { %v2133_v49 = vunpack.c.l.b16 %v2111_v38 }
 0x555   : > { %2092 = vmatmul.bf16.vlgmr.msrb.gmra.mxu1 %v4647_v37 }
 0x565   : > { %2097 = vmatmul.bf16.gmra.mxu1 %v4652_v39 }
 0x591   : > { %v1769_v23 = vpop.xlane.xlu1 %1768 }
 0x592   : > { %v1776_v50 = vmul.f32 %v1769_v23, %v4599_v20 }
 0x594   : > { %v1780_v54 = vadd.f32 1e-12, %v1776_v50 }
 0x596   : > { %3976 = vrsqrt.f32 %v1780_v54  ;;  %vm1790_vm6 = vweird.f32 %v1780_v54 }
 0x599   : > { %v1771_v56 = vpop.xlane.xlu2 %1770 }
 0x59a   : > { %v1777_v58 = vmul.f32 %v1771_v56, %v4599_v20 }
 0x59c   : > { %v3977_v59 = vpop.eup %3976  ;;  %v1781_v61 = vadd.f32 1e-12, %v1777_v58 }
 0x59d   : > { %v1785_v53 = vmul.f32 %v3977_v59, %v1780_v54  ;;  %vm1791_vm5 = vweird.f32 %v3977_v59  ;;  %v2134_v54 = vunpack.c.l.b16 %v2112_v14 }
 0x59e   : > { %3978 = vrsqrt.f32 %v1781_v61  ;;  %vm1792_vm8 = vmor %vm1790_vm6, %vm1791_vm5  ;;  %vm1800_vm9 = vweird.f32 %v1781_v61 }
 0x59f   : > { %v1786_v42 = vmul.f32 %v3977_v59, %v1785_v53  ;;  %v4726_v58 = vpack.c.b16 %v2134_v54, %v2133_v49 }
 0x5a1   : > { %v1787_v32 = vmul.f32 0.5, %v1786_v42  ;;  %2261 = vrot.lane.b32.xlu0 %v4726_v58, %s4073_s29 }
 0x5a3   : > { %v1788_v51 = vsub.f32 1.5, %v1787_v32 }
 0x5a4   : > { %v3979_v45 = vpop.eup %3978 }
 0x5a5   : > { %v1795_v24 = vmul.f32 %v3979_v45, %v1781_v61  ;;  %v1789_v34 = vmul.f32 %v3977_v59, %v1788_v51  ;;  %vm1801_vm7 = vweird.f32 %v3979_v45 }
 0x5a6   : > { %vm1802_vm10 = vmor %vm1800_vm9, %vm1801_vm7 }
 0x5a7   : > { %v1796_v1 = vmul.f32 %v3979_v45, %v1795_v24  ;;  %v1793_v3 = vsel %vm1792_vm8, %v3977_v59, %v1789_v34  ;;  %v2011_v59 = vpop.f32.mrf.mxu0  ;;  %v2146_v24 = vsel %vm1114_vm0, %v4726_v58, 0 }
 0x5a8   : > { %v4682_v7 = vmul.f32 %v1793_v3, %v4602_v26  ;;  %v2012_v61 = vadd.f32 %v3905_v0, %v2011_v59 }
 0x5a9   : > { %v1797_v6 = vmul.f32 0.5, %v1796_v1  ;;  %v3906_v1 = vld [vmem:[%s5261_s13] ss:$0 sm:$0xff] }
 0x5ab   : > { %v1798_v52 = vsub.f32 1.5, %v1797_v6 }
 0x5ad   : > { %v1799_v4 = vmul.f32 %v3979_v45, %v1798_v52 }
 0x5af   : > { %v1803_v5 = vsel %vm1802_vm10, %v3979_v45, %v1799_v4  ;;  %v2013_v53 = vpop.f32.mrf.mxu0 }
 0x5b0   : > { %v4685_v8 = vmul.f32 %v1803_v5, %v4607_v21  ;;  %v2014_v42 = vadd.f32 %v3905_v0, %v2013_v53 }
 0x5b2   : > { %v1828_v10 = vpack.c.bf16 %v4685_v8, %v4682_v7  ;;  %v2114_v32 = vpack.c.bf16 %v2014_v42, %v2014_v42 }
 0x5b4   : > { %1906 = vmatmul.bf16.vlgmr.msrb.gmra.mxu3 %v1828_v10  ;;  %v2136_v45 = vunpack.c.l.b16 %v2114_v32  ;;  %v4777_v32 = vld [vmem:[%s792_s30] sm:$0xff] }
 0x5bc   : > { %v1773_v57 = vpop.xlane.xlu0 %1772 }
 0x5bd   : > { %v1778_v12 = vmul.f32 %v1773_v57, %v4599_v20 }
 0x5bf   : > { %v1782_v19 = vadd.f32 1e-12, %v1778_v12 }
 0x5c1   : > { %3980 = vrsqrt.f32 %v1782_v19  ;;  %vm1810_vm12 = vweird.f32 %v1782_v19 }
 0x5c4   : > { %v1775_v55 = vpop.xlane.xlu1 %1774 }
 0x5c5   : > { %v1779_v48 = vmul.f32 %v1775_v55, %v4599_v20 }
 0x5c7   : > { %v3981_v26 = vpop.eup %3980  ;;  %v1783_v41 = vadd.f32 1e-12, %v1779_v48 }
 0x5c8   : > { %v1805_v27 = vmul.f32 %v3981_v26, %v1782_v19  ;;  %vm1811_vm11 = vweird.f32 %v3981_v26 }
 0x5c9   : > { %3982 = vrsqrt.f32 %v1783_v41  ;;  %vm1812_vm14 = vmor %vm1810_vm12, %vm1811_vm11  ;;  %vm1820_vm15 = vweird.f32 %v1783_v41 }
 0x5ca   : > { %v1806_v21 = vmul.f32 %v3981_v26, %v1805_v27 }
 0x5cc   : > { %v1807_v16 = vmul.f32 0.5, %v1806_v21 }
 0x5ce   : > { %v1808_v9 = vsub.f32 1.5, %v1807_v16 }
 0x5cf   : > { %v3983_v17 = vpop.eup %3982 }
 0x5d0   : > { %v1815_v15 = vmul.f32 %v3983_v17, %v1783_v41  ;;  %v1809_v35 = vmul.f32 %v3981_v26, %v1808_v9  ;;  %vm1821_vm13 = vweird.f32 %v3983_v17 }
 0x5d1   : > { %vm1822_vm4 = vmor %vm1820_vm15, %vm1821_vm13 }
 0x5d2   : > { %v1816_v25 = vmul.f32 %v3983_v17, %v1815_v15  ;;  %v1813_v29 = vsel %vm1812_vm14, %v3981_v26, %v1809_v35  ;;  %v2093_v41 = vpop.f32.mrf.mxu1 }
 0x5d3   : > { %v4719_v23 = vmul.f32 %v1813_v29, %v4630_v28  ;;  %v2113_v28 = vpack.c.bf16 %v2012_v61, %v2012_v61  ;;  %v2094_v62 = vadd.f32 %v3907_v60, %v2093_v41 }
 0x5d4   : > { %v1817_v31 = vmul.f32 0.5, %v1816_v25 }
 0x5d5   : > { %v2115_v15 = vpack.c.bf16 %v2094_v62, %v2094_v62 }
 0x5d6   : > { %v1818_v36 = vsub.f32 1.5, %v1817_v31 }
 0x5d8   : > { %v1819_v33 = vmul.f32 %v3983_v17, %v1818_v36  ;;  %v2220_v36 = vunpack.c.l.b16 %v2115_v15 }
 0x5da   : > { %v1823_v47 = vsel %vm1822_vm4, %v3983_v17, %v1819_v33  ;;  %v2095_v25 = vpop.f32.mrf.mxu1 }
 0x5db   : > { %v4722_v50 = vmul.f32 %v1823_v47, %v4645_v40  ;;  %v2135_v40 = vunpack.c.l.b16 %v2113_v28  ;;  %v2096_v31 = vadd.f32 %v3907_v60, %v2095_v25 }
 0x5dd   : > { %v1829_v56 = vpack.c.bf16 %v4722_v50, %v4719_v23  ;;  %v2138_v51 = vpack.c.b16 %v2136_v45, %v2135_v40  ;;  %v2116_v38 = vpack.c.bf16 %v2096_v31, %v2096_v31 }
 0x5df   : > { %1911 = vmatmul.bf16.gmra.mxu3 %v1829_v56  ;;  %2399 = vrot.lane.b32.xlu0 %v2138_v51, %s4072_s2  ;;  %v2149_v37 = vsel %vm1114_vm0, %v2138_v51, 0  ;;  %v2221_v29 = vunpack.c.l.b16 %v2116_v38 }
 0x5e0   : > { %2263 = vrot.lane.b32.xlu2 %v2138_v51, %s4073_s29  ;;  %2157 = vmatpush.bf16.xpose.msrb.mxu2 %v2149_v37 }
 0x5e1   : > { %v4756_v46 = vpack.c.b16 %v2221_v29, %v2220_v36 }
 0x5e2   : > { %v2098_v49 = vpop.f32.mrf.mxu1 }
 0x5e3   : > { %v2099_v14 = vadd.f32 %v3907_v60, %v2098_v49 }
 0x5e5   : > { %v2117_v54 = vpack.c.bf16 %v2099_v14, %v2099_v14 }
 0x5e7   : > { %v2222_v61 = vunpack.c.l.b16 %v2117_v54 }
 0x5e8   : > { %2397 = vrot.lane.b32.xlu2 %v4726_v58, %s4072_s2  ;;  %2158 = vmatpush.bf16.xpose.msrb.mxu2 %v2146_v24  ;;  %v4781_v24 = vld [vmem:[%s792_s30 + $0x8] sm:$0xff] }
 0x5ea   : > { %v2100_v56 = vpop.f32.mrf.mxu1 }
 0x5eb   : > { %v2101_v59 = vadd.f32 %v3907_v60, %v2100_v56 }
 0x5ed   : > { %v2118_v28 = vpack.c.bf16 %v2101_v59, %v2101_v59 }
 0x5ef   : > { %v2223_v53 = vunpack.c.l.b16 %v2118_v28 }
 0x5f0   : > { %2535 = vrot.lane.b32.xlu2 %v2138_v51, %s4074_s7 }
 0x5f1   : > { %v4765_v42 = vpack.c.b16 %v2223_v53, %v2222_v61 }
 0x5f3   : > { %2240 = vmatpush.bf16.msra.mxu3 %v4765_v42 }
 0x5f7   : > { %2241 = vmatpush.bf16.msra.mxu3 %v4756_v46 }
 0x613   : > { %v2262_v55 = vpop.permute.xlu0 %2261 }
 0x614   : > { %v2272_v2 = vsel %vm1114_vm0, %v2262_v55, 0 }
 0x637   : > { %v1907_v34 = vpop.f32.mrf.mxu3 }
 0x638   : > { %v1908_v6 = vadd.f32 %v3906_v1, %v1907_v34 }
 0x63a   : > { %v2103_v52 = vmul.f32 0.17677669, %v1908_v6  ;;  %v2264_v48 = vpop.permute.xlu2 %2263 }
 0x63b   : > { %v2275_v26 = vsel %vm1114_vm0, %v2264_v48, 0 }
 0x63c   : > { %v2107_v4 = vpack.c.bf16 %v2103_v52, %v2103_v52  ;;  %2283 = vmatpush.bf16.xpose.msra.mxu0 %v2275_v26 }
 0x63e   : > { %v2123_v57 = vunpack.c.l.b16 %v2107_v4 }
 0x63f   : > { %v1909_v39 = vpop.f32.mrf.mxu3 }
 0x640   : > { %v1910_v3 = vadd.f32 %v3906_v1, %v1909_v39 }
 0x642   : > { %v2104_v5 = vmul.f32 0.17677669, %v1910_v3  ;;  %v2398_v9 = vpop.permute.xlu2 %2397 }
 0x643   : > { %v2408_v33 = vsel %vm1114_vm0, %v2398_v9, 0 }
 0x644   : > { %v2108_v10 = vpack.c.bf16 %v2104_v5, %v2104_v5  ;;  %2284 = vmatpush.bf16.xpose.msra.mxu0 %v2272_v2 }
 0x646   : > { %v2124_v12 = vunpack.c.l.b16 %v2108_v10  ;;  %v4788_v10 = vld [vmem:[%s792_s30 + $0x10] sm:$0xff] }
 0x648   : > { %v2127_v19 = vpack.c.b16 %v2124_v12, %v2123_v57 }
 0x64a   : > { %2529 = vrot.lane.b32.xlu2 %v2127_v19, %s4074_s7  ;;  %3608 = vmatmul.msk.bf16.vlgmr.msrb.gmra.mxu2 %vm1114_vm0, %v2127_v19  ;;  %v2536_v44 = vpop.permute.xlu2 %2535 }
 0x64b   : > { %2257 = vrot.lane.b32.xlu1 %v2127_v19, %s4073_s29  ;;  %v2547_v47 = vsel %vm1114_vm0, %v2536_v44, 0 }
 0x64c   : > { %2555 = vmatpush.bf16.xpose.msrb.mxu0 %v2547_v47 }
 0x651   : > { %v2400_v22 = vpop.permute.xlu0 %2399 }
 0x652   : > { %v2411_v11 = vsel %vm1114_vm0, %v2400_v22, 0  ;;  %2342 = vrot.lane.b32.xlu2 %v4756_v46, %s4073_s29 }
 0x653   : > { %2393 = vrot.lane.b32.xlu1 %v2127_v19, %s4072_s2  ;;  %2419 = vmatpush.bf16.xpose.msra.mxu2 %v2411_v11 }
 0x65b   : > { %2420 = vmatpush.bf16.xpose.msra.mxu2 %v2408_v33 }
 0x662   : > { %v1912_v63 = vpop.f32.mrf.mxu3 }
 0x663   : > { %v1913_v13 = vadd.f32 %v3906_v1, %v1912_v63  ;;  %v4793_v63 = vld [vmem:[%s792_s30 + $0x18] sm:$0xff] }
 0x665   : > { %v2105_v27 = vmul.f32 0.17677669, %v1913_v13 }
 0x667   : > { %v2109_v0 = vpack.c.bf16 %v2105_v27, %v2105_v27 }
 0x669   : > { %v2125_v35 = vunpack.c.l.b16 %v2109_v0 }
 0x66a   : > { %v1914_v21 = vpop.f32.mrf.mxu3 }
 0x66b   : > { %v1915_v16 = vadd.f32 %v3906_v1, %v1914_v21 }
 0x66d   : > { %v2106_v17 = vmul.f32 0.17677669, %v1915_v16 }
 0x66f   : > { %v2110_v30 = vpack.c.bf16 %v2106_v17, %v2106_v17 }
 0x671   : > { %v2126_v18 = vunpack.c.l.b16 %v2110_v30 }
 0x673   : > { %v2128_v43 = vpack.c.b16 %v2126_v18, %v2125_v35 }
 0x675   : > { %2395 = vrot.lane.b32.xlu1 %v2128_v43, %s4072_s2  ;;  %2259 = vrot.lane.b32.xlu0 %v2128_v43, %s4073_s29 }
 0x676   : > { %3609 = vmatmul.msk.bf16.gmra.mxu2 %vm1114_vm0, %v2128_v43 }
 0x67d   : > { %2533 = vrot.lane.b32.xlu0 %v4726_v58, %s4074_s7 }
 0x685   : > { %2531 = vrot.lane.b32.xlu0 %v2128_v43, %s4074_s7 }
 0x68d   : > { %2344 = vrot.lane.b32.xlu0 %v4765_v42, %s4073_s29 }
 0x6a4   : > { %v2530_v5 = vpop.permute.xlu2 %2529 }
 0x6ac   : > { %v2343_v41 = vpop.permute.xlu2 %2342 }
 0x6bd   : > { %v2258_v58 = vpop.permute.xlu1 %2257 }
 0x6be   : > { %3612 = vmatmul.msk.bf16.vlgmr.msra.gmra.mxu0 %vm1114_vm0, %v2258_v58 }
 0x6c5   : > { %v2394_v40 = vpop.permute.xlu1 %2393 }
 0x6c6   : > { %3616 = vmatmul.msk.bf16.vlgmr.msra.gmra.mxu2 %vm1114_vm0, %v2394_v40 }
 0x6cd   : > { %v2160_v45 = vpop.f32.mrf.mxu2 }
 0x6ce   : > { %v2161_v51 = vadd.f32 %v2160_v45, %v4777_v32 }
 0x6d0   : > { %v2170_v37 = vsel %vm1114_vm0, %v2161_v51, -inf }
 0x6d1   : > { %2171 = vmax.xlane.f32.xlu2 %v2170_v37 }
 0x6d5   : > { %v2162_v1 = vpop.f32.mrf.mxu2 }
 0x6d6   : > { %v2163_v34 = vadd.f32 %v2162_v1, %v4781_v24 }
 0x6d8   : > { %v2173_v6 = vsel %vm1114_vm0, %v2163_v34, -inf }
 0x6d9   : > { %2174 = vmax.xlane.f32.xlu1 %v2173_v6 }
 0x6e7   : > { %v2396_v52 = vpop.permute.xlu1 %2395  ;;  %v2260_v39 = vpop.permute.xlu0 %2259 }
 0x6e8   : > { %3613 = vmatmul.msk.bf16.gmra.mxu0 %vm1114_vm0, %v2260_v39  ;;  %3617 = vmatmul.msk.bf16.gmra.mxu2 %vm1114_vm0, %v2396_v52 }
 0x6ef   : > { %v2534_v3 = vpop.permute.xlu0 %2533 }
 0x6f0   : > { %v2544_v4 = vsel %vm1114_vm0, %v2534_v3, 0 }
 0x6f1   : > { %2556 = vmatpush.bf16.xpose.msrb.mxu0 %v2544_v4 }
 0x6f7   : > { %v2532_v60 = vpop.permute.xlu0 %2531 }
 0x6f8   : > { %3620 = vmatmul.msk.bf16.vlgmr.msrb.gmra.mxu0 %vm1114_vm0, %v2530_v5 }
 0x6f9   : > { %v2165_v57 = vpop.f32.mrf.mxu2 }
 0x6fa   : > { %v2166_v12 = vadd.f32 %v2165_v57, %v4788_v10 }
 0x6fc   : > { %v2176_v19 = vsel %vm1114_vm0, %v2166_v12, -inf }
 0x6fd   : > { %2177 = vmax.xlane.f32.xlu1 %v2176_v19 }
 0x6ff   : > { %v2345_v26 = vpop.permute.xlu0 %2344 }
 0x700   : > { %2360 = vmatpush.bf16.msra.mxu1 %v2345_v26 }
 0x701   : > { %v2167_v13 = vpop.f32.mrf.mxu2 }
 0x702   : > { %v2168_v55 = vadd.f32 %v2167_v13, %v4793_v63 }
 0x704   : > { %v2179_v48 = vsel %vm1114_vm0, %v2168_v55, -inf  ;;  %2361 = vmatpush.bf16.msra.mxu1 %v2343_v41 }
 0x705   : > { %2180 = vmax.xlane.f32.xlu0 %v2179_v48 }
 0x708   : > { %3621 = vmatmul.msk.bf16.gmra.mxu0 %vm1114_vm0, %v2532_v60 }
 0x73b   : > { %v2286_v27 = vpop.f32.mrf.mxu0 }
 0x73c   : > { %v4799_v62 = vadd.f32 %v2286_v27, %v4777_v32 }
 0x73e   : > { %v2296_v21 = vsel %vm1114_vm0, %v4799_v62, -inf }
 0x73f   : > { %2297 = vmax.xlane.f32.xlu0 %v2296_v21 }
 0x743   : > { %v2288_v16 = vpop.f32.mrf.mxu0 }
 0x744   : > { %v4804_v2 = vadd.f32 %v2288_v16, %v4781_v24  ;;  %v2172_v0 = vpop.xlane.xlu2 %2171 }
 0x745   : > { %v2182_v17 = vsub.f32 %v2161_v51, %v2172_v0 }
 0x746   : > { %v2299_v22 = vsel %vm1114_vm0, %v4804_v2, -inf }
 0x747   : > { %v2186_v9 = vmul.f32 1.442695, %v2182_v17  ;;  %2300 = vmax.xlane.f32.xlu2 %v2299_v22 }
 0x749   : > { %v2422_v15 = vpop.f32.mrf.mxu2  ;;  %3984 = vpow2.f32 %v2186_v9 }
 0x74a   : > { %v4809_v11 = vadd.f32 %v2422_v15, %v4777_v32 }
 0x74c   : > { %v2432_v25 = vsel %vm1114_vm0, %v4809_v11, -inf  ;;  %v2175_v38 = vpop.xlane.xlu1 %2174 }
 0x74d   : > { %2433 = vmax.xlane.f32.xlu0 %v2432_v25  ;;  %v2183_v33 = vsub.f32 %v2163_v34, %v2175_v38 }
 0x74f   : > { %v4813_v30 = vpop.eup %3984  ;;  %v2188_v47 = vmul.f32 1.442695, %v2183_v33 }
 0x750   : > { %v2194_v36 = vsel %vm1114_vm0, %v4813_v30, 0.0 }
 0x751   : > { %v2424_v31 = vpop.f32.mrf.mxu2  ;;  %3986 = vpow2.f32 %v2188_v47 }
 0x752   : > { %v4816_v35 = vadd.f32 %v2424_v31, %v4781_v24 }
 0x754   : > { %v2435_v18 = vsel %vm1114_vm0, %v4816_v35, -inf }
 0x755   : > { %2436 = vmax.xlane.f32.xlu2 %v2435_v18  ;;  %2195 = vadd.xlane.f32.xlu0 %v2194_v36 }
 0x757   : > { %v4840_v51 = vpop.eup %3986 }
 0x758   : > { %v2197_v6 = vsel %vm1114_vm0, %v4840_v51, 0.0 }
 0x765   : > { %v2291_v43 = vpop.f32.mrf.mxu0 }
 0x766   : > { %v4823_v29 = vadd.f32 %v2291_v43, %v4788_v10 }
 0x768   : > { %v2302_v44 = vsel %vm1114_vm0, %v4823_v29, -inf }
 0x769   : > { %2303 = vmax.xlane.f32.xlu2 %v2302_v44 }
 0x76b   : > { %v2427_v49 = vpop.f32.mrf.mxu2 }
 0x76c   : > { %v4828_v14 = vadd.f32 %v2427_v49, %v4788_v10 }
 0x76d   : > { %v2293_v54 = vpop.f32.mrf.mxu0 }
 0x76e   : > { %v4831_v56 = vadd.f32 %v2293_v54, %v4793_v63  ;;  %v2438_v28 = vsel %vm1114_vm0, %v4828_v14, -inf }
 0x770   : > { %v2178_v59 = vpop.xlane.xlu1 %2177  ;;  %v2305_v61 = vsel %vm1114_vm0, %v4831_v56, -inf }
 0x771   : > { %v2184_v53 = vsub.f32 %v2166_v12, %v2178_v59  ;;  %2306 = vmax.xlane.f32.xlu1 %v2305_v61  ;;  %2439 = vmax.xlane.f32.xlu2 %v2438_v28 }
 0x773   : > { %v2190_v58 = vmul.f32 1.442695, %v2184_v53  ;;  %v2429_v40 = vpop.f32.mrf.mxu2 }
 0x774   : > { %v4838_v45 = vadd.f32 %v2429_v40, %v4793_v63 }
 0x775   : > { %v2558_v37 = vpop.f32.mrf.mxu0  ;;  %3988 = vpow2.f32 %v2190_v58 }
 0x776   : > { %v2441_v34 = vsel %vm1114_vm0, %v4838_v45, -inf  ;;  %v4849_v4 = vadd.f32 %v2558_v37, %v4777_v32 }
 0x778   : > { %v2181_v1 = vpop.xlane.xlu0 %2180  ;;  %v2568_v13 = vsel %vm1114_vm0, %v4849_v4, -inf }
 0x779   : > { %v2185_v52 = vsub.f32 %v2168_v55, %v2181_v1  ;;  %2442 = vmax.xlane.f32.xlu1 %v2441_v34  ;;  %2198 = vadd.xlane.f32.xlu2 %v2197_v6 }
 0x77b   : > { %v2192_v39 = vmul.f32 1.442695, %v2185_v52  ;;  %v4846_v3 = vpop.eup %3988 }
 0x77c   : > { %v2200_v12 = vsel %vm1114_vm0, %v4846_v3, 0.0 }
 0x77d   : > { %v2560_v5 = vpop.f32.mrf.mxu0  ;;  %3990 = vpow2.f32 %v2192_v39 }
 0x77e   : > { %v4852_v57 = vadd.f32 %v2560_v5, %v4781_v24 }
 0x780   : > { %v2571_v19 = vsel %vm1114_vm0, %v4852_v57, -inf }
 0x781   : > { %2201 = vadd.xlane.f32.xlu2 %v2200_v12  ;;  %2572 = vmax.xlane.f32.xlu0 %v2571_v19 }
 0x782   : > { %2569 = vmax.xlane.f32.xlu1 %v2568_v13 }
 0x783   : > { %v4860_v32 = vpop.eup %3990 }
 0x784   : > { %v2203_v24 = vsel %vm1114_vm0, %v4860_v32, 0.0 }
 0x785   : > { %v2563_v55 = vpop.f32.mrf.mxu0 }
 0x786   : > { %v4865_v48 = vadd.f32 %v2563_v55, %v4788_v10 }
 0x788   : > { %v2574_v27 = vsel %vm1114_vm0, %v4865_v48, -inf }
 0x78a   : > { %2204 = vadd.xlane.f32.xlu1 %v2203_v24 }
 0x78d   : > { %v2565_v60 = vpop.f32.mrf.mxu0 }
 0x78e   : > { %v4868_v26 = vadd.f32 %v2565_v60, %v4793_v63 }
 0x790   : > { %v2577_v41 = vsel %vm1114_vm0, %v4868_v26, -inf }
 0x791   : > { %2578 = vmax.xlane.f32.xlu0 %v2577_v41 }
 0x792   : > { %2575 = vmax.xlane.f32.xlu1 %v2574_v27 }
 0x7b2   : > { %v2298_v21 = vpop.xlane.xlu0 %2297 }
 0x7b3   : > { %v2308_v16 = vsub.f32 %v4799_v62, %v2298_v21 }
 0x7b5   : > { %v2312_v0 = vmul.f32 1.442695, %v2308_v16 }
 0x7b7   : > { %3992 = vpow2.f32 %v2312_v0 }
 0x7ba   : > { %v2301_v17 = vpop.xlane.xlu2 %2300 }
 0x7bb   : > { %v2309_v10 = vsub.f32 %v4804_v2, %v2301_v17 }
 0x7bd   : > { %v4876_v22 = vpop.eup %3992  ;;  %v2314_v63 = vmul.f32 1.442695, %v2309_v10 }
 0x7be   : > { %v2320_v9 = vsel %vm1114_vm0, %v4876_v22, 0.0 }
 0x7bf   : > { %3994 = vpow2.f32 %v2314_v63  ;;  %2321 = vadd.xlane.f32.xlu2 %v2320_v9 }
 0x7c0   : > { %v2434_v15 = vpop.xlane.xlu0 %2433 }
 0x7c1   : > { %v2444_v25 = vsub.f32 %v4809_v11, %v2434_v15 }
 0x7c3   : > { %v2448_v31 = vmul.f32 1.442695, %v2444_v25 }
 0x7c5   : > { %v4881_v18 = vpop.eup %3994  ;;  %3996 = vpow2.f32 %v2448_v31 }
 0x7c6   : > { %v2323_v62 = vsel %vm1114_vm0, %v4881_v18, 0.0 }
 0x7c7   : > { %2324 = vadd.xlane.f32.xlu1 %v2323_v62 }
 0x7c8   : > { %v2437_v2 = vpop.xlane.xlu2 %2436  ;;  %v2196_v58 = vpop.xlane.xlu0 %2195 }
 0x7c9   : > { %v2445_v36 = vsub.f32 %v4816_v35, %v2437_v2 }
 0x7cb   : > { %v4886_v38 = vpop.eup %3996  ;;  %v2450_v43 = vmul.f32 1.442695, %v2445_v36 }
 0x7cc   : > { %v2456_v33 = vsel %vm1114_vm0, %v4886_v38, 0.0 }
 0x7cd   : > { %3998 = vpow2.f32 %v2450_v43  ;;  %2457 = vadd.xlane.f32.xlu0 %v2456_v33 }
 0x7d3   : > { %v4890_v11 = vpop.eup %3998 }
 0x7d4   : > { %v2459_v44 = vsel %vm1114_vm0, %v4890_v11, 0.0 }
 0x7d5   : > { %2460 = vadd.xlane.f32.xlu1 %v2459_v44 }
 0x7d7   : > { %2480 = vrot.lane.b32.xlu2 %v4765_v42, %s4072_s2 }
 0x7dc   : > { %v2304_v47 = vpop.xlane.xlu2 %2303 }
 0x7dd   : > { %v2310_v35 = vsub.f32 %v4823_v29, %v2304_v47 }
 0x7df   : > { %v2316_v49 = vmul.f32 1.442695, %v2310_v35 }
 0x7e1   : > { %4000 = vpow2.f32 %v2316_v49  ;;  %2616 = vrot.lane.b32.xlu0 %v4765_v42, %s4074_s7 }
 0x7e4   : > { %v2307_v54 = vpop.xlane.xlu1 %2306  ;;  %v4899_v59 = vpop.xlane.xlu2 %2439 }
 0x7e5   : > { %v2311_v61 = vsub.f32 %v4831_v56, %v2307_v54 }
 0x7e7   : > { %v4902_v28 = vpop.eup %4000  ;;  %v2318_v53 = vmul.f32 1.442695, %v2311_v61 }
 0x7e8   : > { %v2326_v40 = vsel %vm1114_vm0, %v4902_v28, 0.0 }
 0x7e9   : > { %4002 = vpow2.f32 %v2318_v53  ;;  %2614 = vrot.lane.b32.xlu0 %v4756_v46, %s4074_s7  ;;  %2327 = vadd.xlane.f32.xlu1 %v2326_v40 }
 0x7ea   : > { %4004 = vrcp.f32 %v2196_v58 }
 0x7ec   : > { %v2443_v29 = vpop.xlane.xlu1 %2442  ;;  %v2199_v42 = vpop.xlane.xlu2 %2198 }
 0x7ed   : > { %4006 = vrcp.f32 %v2199_v42  ;;  %v2447_v55 = vsub.f32 %v4838_v45, %v2443_v29 }
 0x7ef   : > { %v4908_v37 = vpop.eup %4002  ;;  %v2454_v27 = vmul.f32 1.442695, %v2447_v55 }
 0x7f0   : > { %v2329_v56 = vsel %vm1114_vm0, %v4908_v37, 0.0  ;;  %v4005_v1 = vpop.eup %4004 }
 0x7f1   : > { %2330 = vadd.xlane.f32.xlu1 %v2329_v56  ;;  %v2210_v6 = vmul.f32 %v4005_v1, %v4813_v30 }
 0x7f3   : > { %v4007_v34 = vpop.eup %4006 }
 0x7f4   : > { %v2211_v52 = vmul.f32 %v4007_v34, %v4840_v51  ;;  %v2573_v39 = vpop.xlane.xlu0 %2572  ;;  %v2202_v41 = vpop.xlane.xlu2 %2201 }
 0x7f5   : > { %v2570_v5 = vpop.xlane.xlu1 %2569  ;;  %v2581_v12 = vsub.f32 %v4852_v57, %v2573_v39 }
 0x7f6   : > { %v2214_v19 = vpack.c.bf16 %v2211_v52, %v2210_v6  ;;  %v2580_v13 = vsub.f32 %v4849_v4, %v2570_v5 }
 0x7f7   : > { %v2586_v24 = vmul.f32 1.442695, %v2581_v12 }
 0x7f8   : > { %v2584_v60 = vmul.f32 1.442695, %v2580_v13  ;;  %3610 = vmatmul.msk.bf16.vlgmr.msra.gmra.mxu3 %vm1114_vm0, %v2214_v19 }
 0x7f9   : > { %4008 = vpow2.f32 %v2586_v24 }
 0x7fa   : > { %4010 = vpow2.f32 %v2584_v60 }
 0x7fb   : > { %4012 = vrcp.f32 %v2202_v41 }
 0x7fd   : > { %v2205_v30 = vpop.xlane.xlu1 %2204 }
 0x7fe   : > { %4014 = vrcp.f32 %v2205_v30 }
 0x7ff   : > { %v4918_v51 = vpop.eup %4008  ;;  %4016 = vpow2.f32 %v2454_v27 }
 0x800   : > { %v4920_v57 = vpop.eup %4010  ;;  %v2595_v4 = vsel %vm1114_vm0, %v4918_v51, 0.0 }
 0x801   : > { %v2592_v45 = vsel %vm1114_vm0, %v4920_v57, 0.0  ;;  %2596 = vadd.xlane.f32.xlu2 %v2595_v4  ;;  %v4013_v21 = vpop.eup %4012 }
 0x802   : > { %2593 = vadd.xlane.f32.xlu1 %v2592_v45  ;;  %v2212_v9 = vmul.f32 %v4013_v21, %v4846_v3 }
 0x804   : > { %v4015_v16 = vpop.eup %4014  ;;  %v2579_v0 = vpop.xlane.xlu0 %2578 }
 0x805   : > { %v4926_v17 = vpop.eup %4016  ;;  %v2576_v10 = vpop.xlane.xlu1 %2575  ;;  %v2583_v63 = vsub.f32 %v4868_v26, %v2579_v0  ;;  %v2213_v15 = vmul.f32 %v4015_v16, %v4860_v32 }
 0x806   : > { %v2582_v25 = vsub.f32 %v4865_v48, %v2576_v10  ;;  %v2465_v36 = vsel %vm1114_vm0, %v4926_v17, 0.0  ;;  %v2446_v48 = vsub.f32 %v4828_v14, %v4899_v59 }
 0x807   : > { %v2590_v31 = vmul.f32 1.442695, %v2583_v63  ;;  %v2215_v62 = vpack.c.bf16 %v2213_v15, %v2212_v9 }
 0x808   : > { %v2588_v2 = vmul.f32 1.442695, %v2582_v25  ;;  %v2452_v44 = vmul.f32 1.442695, %v2446_v48 }
 0x809   : > { %4018 = vpow2.f32 %v2590_v31  ;;  %3611 = vmatmul.msk.bf16.gmra.mxu3 %vm1114_vm0, %v2215_v62  ;;  %2466 = vadd.xlane.f32.xlu2 %v2465_v36 }
 0x80a   : > { %4020 = vpow2.f32 %v2588_v2 }
 0x80f   : > { %v4935_v43 = vpop.eup %4018 }
 0x810   : > { %v4937_v26 = vpop.eup %4020  ;;  %v2601_v3 = vsel %vm1114_vm0, %v4935_v43, 0.0 }
 0x811   : > { %v2598_v32 = vsel %vm1114_vm0, %v4937_v26, 0.0 }
 0x812   : > { %2599 = vadd.xlane.f32.xlu2 %v2598_v32 }
 0x813   : > { %2602 = vadd.xlane.f32.xlu0 %v2601_v3 }
 0x81b   : > { %2478 = vrot.lane.b32.xlu1 %v4756_v46, %s4072_s2 }
 0x832   : > { %v2322_v33 = vpop.xlane.xlu2 %2321 }
 0x833   : > { %4022 = vrcp.f32 %v2322_v33 }
 0x834   : > { %4024 = vpow2.f32 %v2452_v44 }
 0x839   : > { %v4023_v49 = vpop.eup %4022 }
 0x83a   : > { %v2325_v47 = vpop.xlane.xlu1 %2324  ;;  %v2481_v35 = vpop.permute.xlu2 %2480  ;;  %v2336_v53 = vmul.f32 %v4023_v49, %v4876_v22  ;;  %v3856_v49 = vld [vmem:[%s5266_s18 + $0x38] sm:$0xff] }
 0x83b   : > { %4026 = vrcp.f32 %v2325_v47  ;;  %2496 = vmatpush.bf16.msrb.mxu3 %v2481_v35  ;;  %v4947_v54 = vpop.eup %4024  ;;  %2739 = vmatpush.bf16.msrb.mxu2 %v3856_v49  ;;  %v3706_v49 = vld [vmem:[%s5268_s20 + $0x60] sm:$0xf] }
 0x83c   : > { %v2462_v14 = vsel %vm1114_vm0, %v4947_v54, 0.0 }
 0x840   : > { %v2458_v59 = vpop.xlane.xlu0 %2457 }
 0x841   : > { %v4027_v61 = vpop.eup %4026 }
 0x842   : > { %v2337_v58 = vmul.f32 %v4027_v61, %v4881_v18  ;;  %v3854_v61 = vld [vmem:[%s5266_s18 + $0x28] sm:$0xff] }
 0x844   : > { %v2340_v46 = vpack.c.bf16 %v2337_v58, %v2336_v53 }
 0x845   : > { %2463 = vadd.xlane.f32.xlu1 %v2462_v14 }
 0x846   : > { %3614 = vmatmul.msk.bf16.vlgmr.msra.gmra.mxu1 %vm1114_vm0, %v2340_v46 }
 0x848   : > { %v2461_v29 = vpop.xlane.xlu1 %2460 }
 0x853   : > { %v2617_v40 = vpop.permute.xlu0 %2616 }
 0x854   : > { %2632 = vmatpush.bf16.msrb.mxu1 %v2617_v40  ;;  %v3852_v40 = vld [vmem:[%s5266_s18 + $0x18] sm:$0xff] }
 0x85b   : > { %v2615_v42 = vpop.permute.xlu0 %2614 }
 0x85c   : > { %2633 = vmatpush.bf16.msrb.mxu1 %v2615_v42  ;;  %v2328_v56 = vpop.xlane.xlu1 %2327  ;;  %v3850_v42 = vld [vmem:[%s5266_s18 + $0x8] sm:$0xff] }
 0x85d   : > { %4028 = vrcp.f32 %v2328_v56  ;;  %v3849_v56 = vld [vmem:[%s5266_s18] sm:$0xff] }
 0x863   : > { %v4029_v22 = vpop.eup %4028 }
 0x864   : > { %v2331_v1 = vpop.xlane.xlu1 %2330  ;;  %v2338_v18 = vmul.f32 %v4029_v22, %v4902_v28 }
 0x865   : > { %4030 = vrcp.f32 %v2331_v1 }
 0x86b   : > { %v4031_v34 = vpop.eup %4030 }
 0x86c   : > { %v2339_v6 = vmul.f32 %v4031_v34, %v4908_v37 }
 0x86e   : > { %v2341_v52 = vpack.c.bf16 %v2339_v6, %v2338_v18 }
 0x870   : > { %3615 = vmatmul.msk.bf16.gmra.mxu1 %vm1114_vm0, %v2341_v52 }
 0x874   : > { %v2597_v39 = vpop.xlane.xlu2 %2596 }
 0x875   : > { %v2594_v5 = vpop.xlane.xlu1 %2593  ;;  %4032 = vrcp.f32 %v2597_v39 }
 0x876   : > { %4034 = vrcp.f32 %v2594_v5 }
 0x877   : > { %4036 = vrcp.f32 %v2461_v29  ;;  %v3851_v29 = vld [vmem:[%s5266_s18 + $0x10] sm:$0xff] }
 0x878   : > { %4038 = vrcp.f32 %v2458_v59  ;;  %v3853_v59 = vld [vmem:[%s5266_s18 + $0x20] sm:$0xff] }
 0x87b   : > { %v4033_v12 = vpop.eup %4032  ;;  %v2243_v19 = vpop.f32.mrf.mxu3 }
 0x87c   : > { %v4035_v13 = vpop.eup %4034  ;;  %v2609_v55 = vmul.f32 %v4033_v12, %v4918_v51  ;;  %2253 = vst.msk [vmem:[#allocation2] sm:$0xff] %vm1114_vm0, %v2243_v19  ;;  %v2467_v24 = vpop.xlane.xlu2 %2466 }
 0x87d   : > { %v2608_v60 = vmul.f32 %v4035_v13, %v4920_v57  ;;  %v4037_v30 = vpop.eup %4036 }
 0x87e   : > { %v4039_v4 = vpop.eup %4038  ;;  %v2473_v51 = vmul.f32 %v4037_v30, %v4890_v11 }
 0x87f   : > { %v2612_v28 = vpack.c.bf16 %v2609_v55, %v2608_v60  ;;  %v2472_v57 = vmul.f32 %v4039_v4, %v4886_v38 }
 0x881   : > { %3622 = vmatmul.msk.bf16.vlgmr.msrb.gmra.mxu1 %vm1114_vm0, %v2612_v28  ;;  %v2476_v9 = vpack.c.bf16 %v2473_v51, %v2472_v57 }
 0x883   : > { %v2245_v37 = vpop.f32.mrf.mxu3 }
 0x884   : > { %2254 = vst.msk [vmem:[#allocation2 + $0x8] sm:$0xff] %vm1114_vm0, %v2245_v37 }
 0x885   : > { %v2600_v41 = vpop.xlane.xlu2 %2599 }
 0x886   : > { %4040 = vrcp.f32 %v2600_v41  ;;  %v2603_v27 = vpop.xlane.xlu0 %2602  ;;  %v3908_v41 = vld [vmem:[%s5267_s19] ss:$0 sm:$0xff] }
 0x887   : > { %4042 = vrcp.f32 %v2603_v27 }
 0x888   : > { %4044 = vrcp.f32 %v2467_v24 }
 0x88c   : > { %v4041_v45 = vpop.eup %4040  ;;  %v2248_v21 = vpop.f32.mrf.mxu3 }
 0x88d   : > { %v4043_v16 = vpop.eup %4042  ;;  %2255 = vst.msk [vmem:[#allocation2 + $0x10] sm:$0xff] %vm1114_vm0, %v2248_v21  ;;  %v2479_v0 = vpop.permute.xlu1 %2478  ;;  %v2610_v10 = vmul.f32 %v4041_v45, %v4937_v26 }
 0x88e   : > { %2497 = vmatpush.bf16.msrb.mxu3 %v2479_v0  ;;  %v2611_v63 = vmul.f32 %v4043_v16, %v4935_v43  ;;  %v4045_v38 = vpop.eup %4044 }
 0x88f   : > { %v2475_v2 = vmul.f32 %v4045_v38, %v4926_v17 }
 0x890   : > { %v2613_v15 = vpack.c.bf16 %v2611_v63, %v2610_v10 }
 0x891   : > { %3618 = vmatmul.msk.bf16.vlgmr.msrb.gmra.mxu3 %vm1114_vm0, %v2476_v9 }
 0x892   : > { %3623 = vmatmul.msk.bf16.gmra.mxu1 %vm1114_vm0, %v2613_v15 }
 0x894   : > { %v2250_v11 = vpop.f32.mrf.mxu3 }
 0x895   : > { %2256 = vst.msk [vmem:[#allocation2 + $0x18] sm:$0xff] %vm1114_vm0, %v2250_v11 }
 0x8b8   : > { %v2464_v25 = vpop.xlane.xlu1 %2463 }
 0x8b9   : > { %4046 = vrcp.f32 %v2464_v25 }
 0x8bf   : > { %v4047_v31 = vpop.eup %4046 }
 0x8c0   : > { %v2474_v62 = vmul.f32 %v4047_v31, %v4947_v54  ;;  %v3855_v54 = vld [vmem:[%s5266_s18 + $0x30] sm:$0xff] }
 0x8c1   : > { %2740 = vmatpush.bf16.msrb.mxu2 %v3855_v54  ;;  %v3870_v54 = vld [vmem:[%s5268_s20 + $0x64] sm:$0xf0] }
 0x8c2   : > { %v2477_v36 = vpack.c.bf16 %v2475_v2, %v2474_v62 }
 0x8c3   : > { %v2363_v43 = vpop.f32.mrf.mxu1 }
 0x8c4   : > { %2377 = vrot.lane.b32.xlu2 %v2363_v43, %s4074_s7  ;;  %3619 = vmatmul.msk.bf16.gmra.mxu3 %vm1114_vm0, %v2477_v36 }
 0x8c5   : > { %2741 = vmatpush.bf16.msrb.mxu2 %v3854_v61  ;;  %v3869_v61 = vld [vmem:[%s5268_s20 + $0x64] sm:$0xf] }
 0x8c9   : > { %2742 = vmatpush.bf16.msrb.mxu2 %v3853_v59  ;;  %v3868_v59 = vld [vmem:[%s5268_s20 + $0x54] sm:$0xf0] }
 0x8cb   : > { %v2365_v26 = vpop.f32.mrf.mxu1 }
 0x8cc   : > { %2379 = vrot.lane.b32.xlu1 %v2365_v26, %s4074_s7 }
 0x8cd   : > { %2743 = vmatpush.bf16.msrb.mxu2 %v3852_v40  ;;  %v3867_v40 = vld [vmem:[%s5268_s20 + $0x54] sm:$0xf] }
 0x8d1   : > { %2744 = vmatpush.bf16.msrb.mxu2 %v3851_v29 }
 0x8d5   : > { %2745 = vmatpush.bf16.msrb.mxu2 %v3850_v42  ;;  %v3700_v42 = vld [vmem:[%s5268_s20 + $0x58] sm:$0xf0] }
 0x8d9   : > { %2746 = vmatpush.bf16.msrb.mxu2 %v3849_v56  ;;  %v3703_v56 = vor.u32 %v3867_v40, %v3700_v42  ;;  %v3879_v42 = vld [vmem:[%s5270_s22 + $0x30] sm:$0xff] }
 0x8ed   : > { %v2368_v3 = vpop.f32.mrf.mxu1 }
 0x8f5   : > { %v2370_v32 = vpop.f32.mrf.mxu1 }
 0x8fe   : > { %v2635_v48 = vpop.f32.mrf.mxu1 }
 0x8ff   : > { %2649 = vrot.lane.b32.xlu0 %v2635_v48, %s4073_s29  ;;  %v3714_v48 = vld [vmem:[%s5268_s20 + $0x70] sm:$0xf] }
 0x906   : > { %v2637_v33 = vpop.f32.mrf.mxu1 }
 0x907   : > { %2651 = vrot.lane.b32.xlu1 %v2637_v33, %s4073_s29  ;;  %v3872_v33 = vld [vmem:[%s5268_s20 + $0x74] sm:$0xf0] }
 0x90f   : > { %2383 = vrot.lane.b32.xlu1 %v2370_v32, %s4074_s7  ;;  %v2640_v17 = vpop.f32.mrf.mxu1 }
 0x910   : > { %2653 = vrot.lane.b32.xlu0 %v2640_v17, %s4073_s29  ;;  %v3871_v17 = vld [vmem:[%s5268_s20 + $0x74] sm:$0xf] }
 0x914   : > { %v2499_v44 = vpop.f32.mrf.mxu3 }
 0x915   : > { %2513 = vrot.lane.b32.xlu2 %v2499_v44, %s4072_s2  ;;  %v3715_v44 = vor.u32 %v3872_v33, %v3714_v48 }
 0x917   : > { %v2642_v46 = vpop.f32.mrf.mxu1  ;;  %2946 = vmatpush.bf16.msra.mxu3 %v3715_v44 }
 0x91c   : > { %v2501_v47 = vpop.f32.mrf.mxu3 }
 0x91d   : > { %2515 = vrot.lane.b32.xlu2 %v2501_v47, %s4072_s2  ;;  %v3716_v47 = vld [vmem:[%s5268_s20 + $0x78] sm:$0xf0] }
 0x91e   : > { %v2378_v35 = vpop.permute.xlu2 %2377 }
 0x91f   : > { %2389 = vst.msk [vmem:[#allocation2] sm:$0xff] %vm1365_vm1, %v2378_v35  ;;  %v3719_v35 = vor.u32 %v3871_v17, %v3716_v47 }
 0x921   : > { %2965 = vmatpush.bf16.msra.mxu0 %v3719_v35 }
 0x925   : > { %2381 = vrot.lane.b32.xlu2 %v2368_v3, %s4074_s7 }
 0x93e   : > { %v2380_v53 = vpop.permute.xlu1 %2379 }
 0x93f   : > { %2390 = vst.msk [vmem:[#allocation2 + $0x8] sm:$0xff] %vm1365_vm1, %v2380_v53  ;;  %v3707_v53 = vor.u32 %v3870_v54, %v3706_v49 }
 0x941   : > { %2947 = vmatpush.bf16.msra.mxu3 %v3707_v53 }
 0x947   : > { %v2504_v58 = vpop.f32.mrf.mxu3 }
 0x948   : > { %2517 = vrot.lane.b32.xlu2 %v2504_v58, %s4072_s2  ;;  %v3708_v58 = vld [vmem:[%s5268_s20 + $0x68] sm:$0xf0] }
 0x94f   : > { %v2506_v14 = vpop.f32.mrf.mxu3 }
 0x950   : > { %2519 = vrot.lane.b32.xlu1 %v2506_v14, %s4072_s2  ;;  %2655 = vrot.lane.b32.xlu2 %v2642_v46, %s4073_s29  ;;  %v3711_v46 = vor.u32 %v3869_v61, %v3708_v58  ;;  %v3698_v14 = vld [vmem:[%s5268_s20 + $0x50] sm:$0xf] }
 0x951   : > { %v3699_v29 = vor.u32 %v3868_v59, %v3698_v14 }
 0x952   : > { %2966 = vmatpush.bf16.msra.mxu0 %v3711_v46 }
 0x953   : > { %2948 = vmatpush.bf16.msra.mxu3 %v3699_v29  ;;  %v3888_v29 = vld [vmem:[%s5270_s22 + $0x78] sm:$0xff] }
 0x954   : > { %3147 = vmatpush.bf16.msra.mxu2 %v3888_v29 }
 0x956   : > { %2967 = vmatpush.bf16.msra.mxu0 %v3703_v56 }
 0x96f   : > { %v2514_v1 = vpop.permute.xlu2 %2513 }
 0x970   : > { %2525 = vst.msk [vmem:[#allocation2] sm:$0xff] %vm1502_vm2, %v2514_v1  ;;  %v3690_v1 = vld [vmem:[%s5268_s20 + $0x40] sm:$0xf] }
 0x971   : > { %v2650_v22 = vpop.permute.xlu0 %2649 }
 0x972   : > { %2661 = vst.msk [vmem:[#allocation2] sm:$0xff] %vm1639_vm3, %v2650_v22  ;;  %v3866_v22 = vld [vmem:[%s5268_s20 + $0x44] sm:$0xf0] }
 0x977   : > { %v2516_v34 = vpop.permute.xlu2 %2515 }
 0x978   : > { %2526 = vst.msk [vmem:[#allocation2 + $0x8] sm:$0xff] %vm1502_vm2, %v2516_v34  ;;  %v3865_v34 = vld [vmem:[%s5268_s20 + $0x44] sm:$0xf] }
 0x979   : > { %v2652_v18 = vpop.permute.xlu1 %2651  ;;  %v2665_v39 = vld [vmem:[#allocation2] sm:$0xff] }
 0x97a   : > { %2662 = vst.msk [vmem:[#allocation2 + $0x8] sm:$0xff] %vm1639_vm3, %v2652_v18  ;;  %v3691_v18 = vor.u32 %v3866_v22, %v3690_v1  ;;  %v3886_v22 = vld [vmem:[%s5270_s22 + $0x68] sm:$0xff] }
 0x97c   : > { %2949 = vmatpush.bf16.msra.mxu3 %v3691_v18 }
 0x97f   : > { %v2382_v6 = vpop.permute.xlu2 %2381 }
 0x980   : > { %2391 = vst.msk [vmem:[#allocation2 + $0x10] sm:$0xff] %vm1365_vm1, %v2382_v6  ;;  %v3692_v6 = vld [vmem:[%s5268_s20 + $0x48] sm:$0xf0] }
 0x981   : > { %v2384_v52 = vpop.permute.xlu1 %2383  ;;  %v2666_v5 = vld [vmem:[#allocation2 + $0x8] sm:$0xff] }
 0x982   : > { %2392 = vst.msk [vmem:[#allocation2 + $0x18] sm:$0xff] %vm1365_vm1, %v2384_v52  ;;  %v2669_v12 = vpack.c.bf16 %v2666_v5, %v2665_v39  ;;  %v2654_v13 = vpop.permute.xlu0 %2653  ;;  %v3695_v52 = vor.u32 %v3865_v34, %v3692_v6  ;;  %v3682_v39 = vld [vmem:[%s5268_s20 + $0x30] sm:$0xf]  ;;  %v3864_v5 = vld [vmem:[%s5268_s20 + $0x34] sm:$0xf0]  ;;  %v3878_v34 = vld [vmem:[%s5270_s22 + $0x28] sm:$0xff] }
 0x984   : > { %2747 = vmatmul.bf16.vlgmr.msrb.gmra.mxu2 %v2669_v12  ;;  %2968 = vmatpush.bf16.msra.mxu0 %v3695_v52  ;;  %v3863_v12 = vld [vmem:[%s5268_s20 + $0x34] sm:$0xf] }
 0x9a2   : > { %v2518_v19 = vpop.permute.xlu2 %2517 }
 0x9a3   : > { %2527 = vst.msk [vmem:[#allocation2 + $0x10] sm:$0xff] %vm1502_vm2, %v2518_v19  ;;  %v3683_v19 = vor.u32 %v3864_v5, %v3682_v39  ;;  %v3885_v39 = vld [vmem:[%s5270_s22 + $0x60] sm:$0xff] }
 0x9a4   : > { %2663 = vst.msk [vmem:[#allocation2 + $0x10] sm:$0xff] %vm1639_vm3, %v2654_v13  ;;  %v3684_v13 = vld [vmem:[%s5268_s20 + $0x38] sm:$0xf0] }
 0x9a5   : > { %2950 = vmatpush.bf16.msra.mxu3 %v3683_v19 }
 0x9aa   : > { %v2656_v24 = vpop.permute.xlu2 %2655 }
 0x9ab   : > { %v2667_v60 = vld [vmem:[#allocation2 + $0x10] sm:$0xff] }
 0x9c2   : > { %v2520_v55 = vpop.permute.xlu1 %2519 }
 0x9c3   : > { %2528 = vst.msk [vmem:[#allocation2 + $0x18] sm:$0xff] %vm1502_vm2, %v2520_v55  ;;  %v3687_v55 = vor.u32 %v3863_v12, %v3684_v13 }
 0x9c4   : > { %2664 = vst.msk [vmem:[#allocation2 + $0x18] sm:$0xff] %vm1639_vm3, %v2656_v24  ;;  %v3674_v24 = vld [vmem:[%s5268_s20 + $0x20] sm:$0xf] }
 0x9c5   : > { %2969 = vmatpush.bf16.msra.mxu0 %v3687_v55 }
 0x9cb   : > { %v2668_v28 = vld [vmem:[#allocation2 + $0x18] sm:$0xff] }
 0x9cc   : > { %v2670_v37 = vpack.c.bf16 %v2668_v28, %v2667_v60  ;;  %v3862_v60 = vld [vmem:[%s5268_s20 + $0x24] sm:$0xf0]  ;;  %v3861_v28 = vld [vmem:[%s5268_s20 + $0x24] sm:$0xf] }
 0x9ce   : > { %2752 = vmatmul.bf16.gmra.mxu2 %v2670_v37  ;;  %v3675_v37 = vor.u32 %v3862_v60, %v3674_v24 }
 0x9d0   : > { %2951 = vmatpush.bf16.msra.mxu3 %v3675_v37 }
 0xa07   : > { %v2748_v27 = vpop.f32.mrf.mxu2 }
 0xa08   : > { %v2749_v30 = vadd.f32 %v3908_v41, %v2748_v27 }
 0xa0a   : > { %v2758_v4 = vadd.f32 %v2749_v30, %v4682_v7  ;;  %v3666_v30 = vld [vmem:[%s5268_s20 + $0x10] sm:$0xf] }
 0xa0c   : > { %2762 = vadd.xlane.f32.xlu1 %v2758_v4 }
 0xa0f   : > { %v2750_v51 = vpop.f32.mrf.mxu2 }
 0xa10   : > { %v2751_v45 = vadd.f32 %v3908_v41, %v2750_v51  ;;  %v3859_v51 = vld [vmem:[%s5268_s20 + $0x14] sm:$0xf] }
 0xa12   : > { %v2759_v21 = vadd.f32 %v2751_v45, %v4685_v8 }
 0xa14   : > { %2764 = vadd.xlane.f32.xlu0 %v2759_v21 }
 0xa51   : > { %v2753_v16 = vpop.f32.mrf.mxu2 }
 0xa52   : > { %v2754_v57 = vadd.f32 %v3908_v41, %v2753_v16 }
 0xa54   : > { %v2760_v0 = vadd.f32 %v2754_v57, %v4719_v23  ;;  %v3658_v57 = vld [vmem:[%s5268_s20] sm:$0xf] }
 0xa56   : > { %2766 = vadd.xlane.f32.xlu2 %v2760_v0 }
 0xa59   : > { %v2755_v10 = vpop.f32.mrf.mxu2 }
 0xa5a   : > { %v2756_v63 = vadd.f32 %v3908_v41, %v2755_v10  ;;  %v3676_v41 = vld [vmem:[%s5268_s20 + $0x28] sm:$0xf0]  ;;  %v3857_v10 = vld [vmem:[%s5268_s20 + $0x4] sm:$0xf] }
 0xa5b   : > { %v3679_v27 = vor.u32 %v3861_v28, %v3676_v41 }
 0xa5c   : > { %v2761_v9 = vadd.f32 %v2756_v63, %v4722_v50 }
 0xa5d   : > { %2970 = vmatpush.bf16.msra.mxu0 %v3679_v27 }
 0xa5e   : > { %2768 = vadd.xlane.f32.xlu1 %v2761_v9 }
 0xa7f   : > { %v2763_v15 = vpop.xlane.xlu1 %2762 }
 0xa80   : > { %v2770_v11 = vmul.f32 %v2763_v15, %v4599_v20 }
 0xa82   : > { %v5029_v7 = vsub.f32 %v2758_v4, %v2770_v11  ;;  %v3860_v4 = vld [vmem:[%s5268_s20 + $0x14] sm:$0xf0] }
 0xa83   : > { %v3667_v45 = vor.u32 %v3860_v4, %v3666_v30 }
 0xa84   : > { %v2778_v25 = vmul.f32 %v5029_v7, %v5029_v7 }
 0xa85   : > { %2952 = vmatpush.bf16.msra.mxu3 %v3667_v45 }
 0xa86   : > { %2782 = vadd.xlane.f32.xlu0 %v2778_v25 }
 0xa87   : > { %v2765_v8 = vpop.xlane.xlu0 %2764 }
 0xa88   : > { %v2771_v38 = vmul.f32 %v2765_v8, %v4599_v20 }
 0xa8a   : > { %v5034_v31 = vsub.f32 %v2759_v21, %v2771_v38  ;;  %v3668_v21 = vld [vmem:[%s5268_s20 + $0x18] sm:$0xf0] }
 0xa8b   : > { %v3671_v16 = vor.u32 %v3859_v51, %v3668_v21  ;;  %v3884_v21 = vld [vmem:[%s5270_s22 + $0x58] sm:$0xff] }
 0xa8c   : > { %v2779_v23 = vmul.f32 %v5034_v31, %v5034_v31 }
 0xa8d   : > { %2971 = vmatpush.bf16.msra.mxu0 %v3671_v16  ;;  %v3877_v16 = vld [vmem:[%s5270_s22 + $0x20] sm:$0xff] }
 0xa8e   : > { %2784 = vadd.xlane.f32.xlu2 %v2779_v23 }
 0xac9   : > { %v2767_v50 = vpop.xlane.xlu2 %2766 }
 0xaca   : > { %v2772_v62 = vmul.f32 %v2767_v50, %v4599_v20 }
 0xacc   : > { %v5039_v2 = vsub.f32 %v2760_v0, %v2772_v62  ;;  %v3858_v0 = vld [vmem:[%s5268_s20 + $0x4] sm:$0xf0] }
 0xacd   : > { %v3659_v63 = vor.u32 %v3858_v0, %v3658_v57  ;;  %v3882_v57 = vld [vmem:[%s5270_s22 + $0x48] sm:$0xff]  ;;  %v3875_v0 = vld [vmem:[%s5270_s22 + $0x10] sm:$0xff] }
 0xace   : > { %v2780_v36 = vmul.f32 %v5039_v2, %v5039_v2 }
 0xacf   : > { %2953 = vmatpush.bf16.msra.mxu3 %v3659_v63  ;;  %v3874_v63 = vld [vmem:[%s5270_s22 + $0x8] sm:$0xff] }
 0xad0   : > { %2786 = vadd.xlane.f32.xlu1 %v2780_v36 }
 0xad1   : > { %v2769_v43 = vpop.xlane.xlu1 %2768 }
 0xad2   : > { %v2773_v26 = vmul.f32 %v2769_v43, %v4599_v20 }
 0xad4   : > { %v5044_v3 = vsub.f32 %v2761_v9, %v2773_v26  ;;  %v3660_v9 = vld [vmem:[%s5268_s20 + $0x8] sm:$0xf0] }
 0xad5   : > { %v3663_v15 = vor.u32 %v3857_v10, %v3660_v9  ;;  %v3881_v10 = vld [vmem:[%s5270_s22 + $0x40] sm:$0xff] }
 0xad6   : > { %v2781_v32 = vmul.f32 %v5044_v3, %v5044_v3  ;;  %v3873_v9 = vld [vmem:[%s5270_s22] sm:$0xff] }
 0xad7   : > { %2972 = vmatpush.bf16.msra.mxu0 %v3663_v15  ;;  %v2860_v15 = vld [vmem:[%s5269_s21] sm:$0x3] }
 0xad8   : > { %2788 = vadd.xlane.f32.xlu0 %v2781_v32 }
 0xaf9   : > { %v2783_v11 = vpop.xlane.xlu0 %2782 }
 0xafa   : > { %v2790_v25 = vmul.f32 %v2783_v11, %v4599_v20 }
 0xafc   : > { %v2794_v8 = vadd.f32 1e-12, %v2790_v25  ;;  %v2863_v25 = vperm.slane %v2860_v15, 1 }
 0xafe   : > { %4048 = vrsqrt.f32 %v2794_v8  ;;  %vm2804_vm1 = vweird.f32 %v2794_v8 }
 0xb01   : > { %v2785_v38 = vpop.xlane.xlu2 %2784 }
 0xb02   : > { %v2791_v23 = vmul.f32 %v2785_v38, %v4599_v20 }
 0xb04   : > { %v4049_v50 = vpop.eup %4048  ;;  %v2795_v62 = vadd.f32 1e-12, %v2791_v23 }
 0xb05   : > { %v2799_v36 = vmul.f32 %v4049_v50, %v2794_v8  ;;  %vm2805_vm0 = vweird.f32 %v4049_v50 }
 0xb06   : > { %4050 = vrsqrt.f32 %v2795_v62  ;;  %vm2806_vm3 = vmor %vm2804_vm1, %vm2805_vm0  ;;  %vm2814_vm5 = vweird.f32 %v2795_v62 }
 0xb07   : > { %v2800_v43 = vmul.f32 %v4049_v50, %v2799_v36 }
 0xb09   : > { %v2801_v26 = vmul.f32 0.5, %v2800_v43 }
 0xb0b   : > { %v2802_v48 = vsub.f32 1.5, %v2801_v26 }
 0xb0c   : > { %v4051_v32 = vpop.eup %4050 }
 0xb0d   : > { %v2809_v33 = vmul.f32 %v4051_v32, %v2795_v62  ;;  %v2803_v44 = vmul.f32 %v4049_v50, %v2802_v48  ;;  %vm2815_vm2 = vweird.f32 %v4051_v32 }
 0xb0e   : > { %vm2816_vm6 = vmor %vm2814_vm5, %vm2815_vm2 }
 0xb0f   : > { %v2810_v17 = vmul.f32 %v4051_v32, %v2809_v33  ;;  %v2807_v49 = vsel %vm2806_vm3, %v4049_v50, %v2803_v44  ;;  %v2862_v50 = vperm.slane %v2860_v15, 0 }
 0xb10   : > { %v5147_v53 = vmul.f32 %v2807_v49, %v5029_v7  ;;  %v3880_v7 = vld [vmem:[%s5270_s22 + $0x38] sm:$0xff] }
 0xb11   : > { %v2811_v47 = vmul.f32 0.5, %v2810_v17  ;;  %3128 = vmatpush.bf16.msra.mxu1 %v3880_v7 }
 0xb13   : > { %v2812_v35 = vsub.f32 1.5, %v2811_v47 }
 0xb15   : > { %v2813_v54 = vmul.f32 %v4051_v32, %v2812_v35  ;;  %3129 = vmatpush.bf16.msra.mxu1 %v3879_v42 }
 0xb17   : > { %v2817_v61 = vsel %vm2816_vm6, %v4051_v32, %v2813_v54 }
 0xb18   : > { %v5150_v58 = vmul.f32 %v2817_v61, %v5034_v31  ;;  %v3887_v31 = vld [vmem:[%s5270_s22 + $0x70] sm:$0xff] }
 0xb19   : > { %3148 = vmatpush.bf16.msra.mxu2 %v3887_v31  ;;  %3130 = vmatpush.bf16.msra.mxu1 %v3878_v34 }
 0xb1a   : > { %v2842_v46 = vpack.c.bf16 %v5150_v58, %v5147_v53 }
 0xb1c   : > { %2954 = vmatmul.bf16.vlgmr.msra.gmra.mxu3 %v2842_v46  ;;  %2973 = vmatmul.bf16.vlgmr.msra.gmra.mxu0 %v2842_v46 }
 0xb1d   : > { %3149 = vmatpush.bf16.msra.mxu2 %v3886_v22  ;;  %3131 = vmatpush.bf16.msra.mxu1 %v3877_v16  ;;  %v3909_v22 = vld [vmem:[%s5298_s1] ss:$0 sm:$0xff] }
 0xb21   : > { %3150 = vmatpush.bf16.msra.mxu2 %v3885_v39 }
 0xb25   : > { %3151 = vmatpush.bf16.msra.mxu2 %v3884_v21 }
 0xb43   : > { %v2787_v14 = vpop.xlane.xlu1 %2786 }
 0xb44   : > { %v2792_v59 = vmul.f32 %v2787_v14, %v4599_v20 }
 0xb46   : > { %v2796_v40 = vadd.f32 1e-12, %v2792_v59 }
 0xb48   : > { %4052 = vrsqrt.f32 %v2796_v40  ;;  %vm2824_vm8 = vweird.f32 %v2796_v40 }
 0xb4b   : > { %v2789_v56 = vpop.xlane.xlu0 %2788 }
 0xb4c   : > { %v2793_v1 = vmul.f32 %v2789_v56, %v4599_v20 }
 0xb4e   : > { %v4053_v18 = vpop.eup %4052  ;;  %v2797_v6 = vadd.f32 1e-12, %v2793_v1 }
 0xb4f   : > { %v2819_v52 = vmul.f32 %v4053_v18, %v2796_v40  ;;  %vm2825_vm7 = vweird.f32 %v4053_v18 }
 0xb50   : > { %4054 = vrsqrt.f32 %v2797_v6  ;;  %vm2826_vm10 = vmor %vm2824_vm8, %vm2825_vm7  ;;  %vm2834_vm11 = vweird.f32 %v2797_v6 }
 0xb51   : > { %v2820_v5 = vmul.f32 %v4053_v18, %v2819_v52 }
 0xb53   : > { %v2821_v12 = vmul.f32 0.5, %v2820_v5 }
 0xb55   : > { %v2822_v13 = vsub.f32 1.5, %v2821_v12 }
 0xb56   : > { %v4055_v19 = vpop.eup %4054 }
 0xb57   : > { %v2829_v55 = vmul.f32 %v4055_v19, %v2797_v6  ;;  %v2823_v60 = vmul.f32 %v4053_v18, %v2822_v13  ;;  %vm2835_vm9 = vweird.f32 %v4055_v19 }
 0xb58   : > { %vm2836_vm12 = vmor %vm2834_vm11, %vm2835_vm9 }
 0xb59   : > { %v2830_v24 = vmul.f32 %v4055_v19, %v2829_v55  ;;  %v2827_v27 = vsel %vm2826_vm10, %v4053_v18, %v2823_v60 }
 0xb5a   : > { %v5178_v4 = vmul.f32 %v2827_v27, %v5039_v2  ;;  %v3883_v2 = vld [vmem:[%s5270_s22 + $0x50] sm:$0xff] }
 0xb5b   : > { %v2831_v28 = vmul.f32 0.5, %v2830_v24  ;;  %3152 = vmatpush.bf16.msra.mxu2 %v3883_v2 }
 0xb5d   : > { %v2832_v37 = vsub.f32 1.5, %v2831_v28 }
 0xb5f   : > { %v2833_v41 = vmul.f32 %v4055_v19, %v2832_v37  ;;  %3153 = vmatpush.bf16.msra.mxu2 %v3882_v57 }
 0xb61   : > { %v2837_v30 = vsel %vm2836_vm12, %v4055_v19, %v2833_v41 }
 0xb62   : > { %v5181_v51 = vmul.f32 %v2837_v30, %v5044_v3  ;;  %v3876_v3 = vld [vmem:[%s5270_s22 + $0x18] sm:$0xff] }
 0xb63   : > { %3132 = vmatpush.bf16.msra.mxu1 %v3876_v3  ;;  %3154 = vmatpush.bf16.msra.mxu2 %v3881_v10 }
 0xb64   : > { %v2843_v45 = vpack.c.bf16 %v5181_v51, %v5178_v4 }
 0xb66   : > { %2959 = vmatmul.bf16.gmra.mxu3 %v2843_v45  ;;  %2978 = vmatmul.bf16.gmra.mxu0 %v2843_v45 }
 0xb67   : > { %3133 = vmatpush.bf16.msra.mxu1 %v3875_v0 }
 0xb6b   : > { %3134 = vmatpush.bf16.msra.mxu1 %v3874_v63 }
 0xb6f   : > { %3135 = vmatpush.bf16.msra.mxu1 %v3873_v9 }
 0xb99   : > { %v2974_v11 = vpop.f32.mrf.mxu0 }
 0xb9a   : > { %v2975_v38 = vadd.f32 %v2974_v11, %v2863_v25 }
 0xb9c   : > { %v2985_v36 = vmax.f32 %v2975_v38, 0.0 }
 0xb9f   : > { %v2955_v8 = vpop.f32.mrf.mxu3 }
 0xba0   : > { %v2956_v26 = vadd.f32 %v2955_v8, %v2862_v50 }
 0xba1   : > { %v2976_v23 = vpop.f32.mrf.mxu0 }
 0xba2   : > { %v2977_v62 = vadd.f32 %v2976_v23, %v2863_v25  ;;  %v2984_v17 = vmax.f32 %v2956_v26, 0.0 }
 0xba4   : > { %v2987_v43 = vmax.f32 %v2977_v62, 0.0 }
 0xba6   : > { %v2993_v32 = vpack.c.bf16 %v2987_v43, %v2985_v36 }
 0xba7   : > { %v2957_v48 = vpop.f32.mrf.mxu3 }
 0xba8   : > { %v2958_v33 = vadd.f32 %v2957_v48, %v2862_v50  ;;  %3155 = vmatmul.bf16.vlgmr.msra.gmra.mxu2 %v2993_v32 }
 0xbaa   : > { %v2986_v44 = vmax.f32 %v2958_v33, 0.0 }
 0xbac   : > { %v2992_v47 = vpack.c.bf16 %v2986_v44, %v2984_v17 }
 0xbae   : > { %3136 = vmatmul.bf16.vlgmr.msra.gmra.mxu1 %v2992_v47 }
 0xbe3   : > { %v2979_v35 = vpop.f32.mrf.mxu0 }
 0xbe4   : > { %v2980_v54 = vadd.f32 %v2979_v35, %v2863_v25 }
 0xbe6   : > { %v2989_v14 = vmax.f32 %v2980_v54, 0.0 }
 0xbe9   : > { %v2960_v49 = vpop.f32.mrf.mxu3 }
 0xbea   : > { %v2961_v40 = vadd.f32 %v2960_v49, %v2862_v50 }
 0xbeb   : > { %v2981_v61 = vpop.f32.mrf.mxu0 }
 0xbec   : > { %v2982_v46 = vadd.f32 %v2981_v61, %v2863_v25  ;;  %v2988_v42 = vmax.f32 %v2961_v40, 0.0 }
 0xbee   : > { %v2991_v59 = vmax.f32 %v2982_v46, 0.0 }
 0xbf0   : > { %v2995_v29 = vpack.c.bf16 %v2991_v59, %v2989_v14 }
 0xbf1   : > { %v2962_v7 = vpop.f32.mrf.mxu3 }
 0xbf2   : > { %v2963_v31 = vadd.f32 %v2962_v7, %v2862_v50  ;;  %3160 = vmatmul.bf16.gmra.mxu2 %v2995_v29 }
 0xbf4   : > { %v2990_v56 = vmax.f32 %v2963_v31, 0.0 }
 0xbf6   : > { %v2994_v1 = vpack.c.bf16 %v2990_v56, %v2988_v42 }
 0xbf8   : > { %3141 = vmatmul.bf16.gmra.mxu1 %v2994_v1 }
 0xc2b   : > { %v3137_v34 = vpop.f32.mrf.mxu1  ;;  %v3156_v18 = vpop.f32.mrf.mxu2 }
 0xc2c   : > { %v3138_v6 = vadd.f32 %v3909_v22, %v3137_v34 }
 0xc2e   : > { %v3157_v52 = vadd.f32 %v3156_v18, %v3138_v6 }
 0xc30   : > { %v3166_v39 = vadd.f32 %v3157_v52, %v5147_v53 }
 0xc32   : > { %3170 = vadd.xlane.f32.xlu2 %v3166_v39 }
 0xc33   : > { %v3139_v5 = vpop.f32.mrf.mxu1  ;;  %v3158_v19 = vpop.f32.mrf.mxu2 }
 0xc34   : > { %v3140_v12 = vadd.f32 %v3909_v22, %v3139_v5 }
 0xc36   : > { %v3159_v13 = vadd.f32 %v3158_v19, %v3140_v12 }
 0xc38   : > { %v3167_v55 = vadd.f32 %v3159_v13, %v5150_v58 }
 0xc3a   : > { %3172 = vadd.xlane.f32.xlu1 %v3167_v55 }
 0xc75   : > { %v3142_v24 = vpop.f32.mrf.mxu1  ;;  %v3161_v60 = vpop.f32.mrf.mxu2 }
 0xc76   : > { %v3143_v28 = vadd.f32 %v3909_v22, %v3142_v24 }
 0xc78   : > { %v3162_v37 = vadd.f32 %v3161_v60, %v3143_v28 }
 0xc7a   : > { %v3168_v41 = vadd.f32 %v3162_v37, %v5178_v4 }
 0xc7c   : > { %3174 = vadd.xlane.f32.xlu0 %v3168_v41 }
 0xc7d   : > { %v3144_v27 = vpop.f32.mrf.mxu1  ;;  %v3163_v45 = vpop.f32.mrf.mxu2 }
 0xc7e   : > { %v3145_v30 = vadd.f32 %v3909_v22, %v3144_v27 }
 0xc80   : > { %v3164_v21 = vadd.f32 %v3163_v45, %v3145_v30 }
 0xc82   : > { %v3169_v53 = vadd.f32 %v3164_v21, %v5181_v51 }
 0xc84   : > { %3176 = vadd.xlane.f32.xlu2 %v3169_v53 }
 0xca5   : > { %v3171_v16 = vpop.xlane.xlu2 %3170 }
 0xca6   : > { %v3178_v2 = vmul.f32 %v3171_v16, %v4599_v20 }
 0xca8   : > { %v3182_v3 = vsub.f32 %v3166_v39, %v3178_v2 }
 0xcaa   : > { %v3186_v58 = vmul.f32 %v3182_v3, %v3182_v3 }
 0xcac   : > { %3190 = vadd.xlane.f32.xlu1 %v3186_v58 }
 0xcad   : > { %v3173_v57 = vpop.xlane.xlu1 %3172 }
 0xcae   : > { %v3179_v0 = vmul.f32 %v3173_v57, %v4599_v20 }
 0xcb0   : > { %v3183_v10 = vsub.f32 %v3167_v55, %v3179_v0 }
 0xcb2   : > { %v3187_v63 = vmul.f32 %v3183_v10, %v3183_v10 }
 0xcb4   : > { %3192 = vadd.xlane.f32.xlu0 %v3187_v63 }
 0xcef   : > { %v3175_v4 = vpop.xlane.xlu0 %3174 }
 0xcf0   : > { %v3180_v9 = vmul.f32 %v3175_v4, %v4599_v20 }
 0xcf2   : > { %v3184_v15 = vsub.f32 %v3168_v41, %v3180_v9 }
 0xcf4   : > { %v3188_v11 = vmul.f32 %v3184_v15, %v3184_v15 }
 0xcf6   : > { %3194 = vadd.xlane.f32.xlu2 %v3188_v11 }
 0xcf7   : > { %v3177_v51 = vpop.xlane.xlu2 %3176 }
 0xcf8   : > { %v3181_v25 = vmul.f32 %v3177_v51, %v4599_v20 }
 0xcfa   : > { %v5226_v8 = vsub.f32 %v3169_v53, %v3181_v25 }
 0xcfc   : > { %v3189_v38 = vmul.f32 %v5226_v8, %v5226_v8 }
 0xcfe   : > { %3196 = vadd.xlane.f32.xlu1 %v3189_v38 }
 0xd1f   : > { %v3191_v23 = vpop.xlane.xlu1 %3190 }
 0xd20   : > { %v3198_v50 = vmul.f32 %v3191_v23, %v4599_v20 }
 0xd22   : > { %v3202_v62 = vadd.f32 1e-12, %v3198_v50 }
 0xd24   : > { %4056 = vrsqrt.f32 %v3202_v62  ;;  %vm3212_vm14 = vweird.f32 %v3202_v62 }
 0xd27   : > { %v3193_v36 = vpop.xlane.xlu0 %3192 }
 0xd28   : > { %v3199_v43 = vmul.f32 %v3193_v36, %v4599_v20 }
 0xd2a   : > { %v4057_v26 = vpop.eup %4056  ;;  %v3203_v32 = vadd.f32 1e-12, %v3199_v43 }
 0xd2b   : > { %v3207_v48 = vmul.f32 %v4057_v26, %v3202_v62  ;;  %vm3213_vm13 = vweird.f32 %v4057_v26 }
 0xd2c   : > { %4058 = vrsqrt.f32 %v3203_v32  ;;  %vm3214_vm15 = vmor %vm3212_vm14, %vm3213_vm13  ;;  %vm3222_vm0 = vweird.f32 %v3203_v32 }
 0xd2d   : > { %v3208_v33 = vmul.f32 %v4057_v26, %v3207_v48 }
 0xd2f   : > { %v3209_v17 = vmul.f32 0.5, %v3208_v33 }
 0xd31   : > { %v3210_v44 = vsub.f32 1.5, %v3209_v17 }
 0xd32   : > { %v4059_v47 = vpop.eup %4058 }
 0xd33   : > { %v3211_v35 = vmul.f32 %v4057_v26, %v3210_v44  ;;  %v3217_v49 = vmul.f32 %v4059_v47, %v3203_v32  ;;  %vm3223_vm4 = vweird.f32 %v4059_v47 }
 0xd34   : > { %vm3224_vm1 = vmor %vm3222_vm0, %vm3223_vm4 }
 0xd35   : > { %v3215_v54 = vsel %vm3214_vm15, %v4057_v26, %v3211_v35  ;;  %v3218_v61 = vmul.f32 %v4059_v47, %v3217_v49 }
 0xd36   : > { %v3246_v46 = vmul.f32 %v3215_v54, %v3182_v3 }
 0xd37   : > { %v3219_v14 = vmul.f32 0.5, %v3218_v61 }
 0xd38   : > { %3250 = vst [vmem:[%s5236_s5] sm:$0xff] %v3246_v46 }
 0xd39   : > { %v3220_v59 = vsub.f32 1.5, %v3219_v14 }
 0xd3b   : > { %v3221_v40 = vmul.f32 %v4059_v47, %v3220_v59 }
 0xd3d   : > { %v3225_v29 = vsel %vm3224_vm1, %v4059_v47, %v3221_v40 }
 0xd3e   : > { %v3247_v7 = vmul.f32 %v3225_v29, %v3183_v10 }
 0xd40   : > { %3251 = vst [vmem:[%s5236_s5 + $0x8] sm:$0xff] %v3247_v7 }
 0xd69   : > { %v3195_v31 = vpop.xlane.xlu2 %3194 }
 0xd6a   : > { %v3200_v42 = vmul.f32 %v3195_v31, %v4599_v20 }
 0xd6c   : > { %v3204_v56 = vadd.f32 1e-12, %v3200_v42 }
 0xd6e   : > { %4060 = vrsqrt.f32 %v3204_v56  ;;  %vm3232_vm3 = vweird.f32 %v3204_v56 }
 0xd71   : > { %v3197_v1 = vpop.xlane.xlu1 %3196 }
 0xd72   : > { %v3201_v22 = vmul.f32 %v3197_v1, %v4599_v20 }
 0xd74   : > { %v4061_v34 = vpop.eup %4060  ;;  %v3205_v18 = vadd.f32 1e-12, %v3201_v22 }
 0xd75   : > { %v3227_v6 = vmul.f32 %v4061_v34, %v3204_v56  ;;  %vm3233_vm2 = vweird.f32 %v4061_v34 }
 0xd76   : > { %4062 = vrsqrt.f32 %v3205_v18  ;;  %vm3234_vm5 = vmor %vm3232_vm3, %vm3233_vm2  ;;  %vm3242_vm7 = vweird.f32 %v3205_v18 }
 0xd77   : > { %v3228_v52 = vmul.f32 %v4061_v34, %v3227_v6 }
 0xd79   : > { %v3229_v39 = vmul.f32 0.5, %v3228_v52 }
 0xd7b   : > { %v3230_v5 = vsub.f32 1.5, %v3229_v39 }
 0xd7c   : > { %v4063_v12 = vpop.eup %4062 }
 0xd7d   : > { %v3231_v19 = vmul.f32 %v4061_v34, %v3230_v5  ;;  %v3237_v13 = vmul.f32 %v4063_v12, %v3205_v18  ;;  %vm3243_vm6 = vweird.f32 %v4063_v12 }
 0xd7e   : > { %vm3244_vm8 = vmor %vm3242_vm7, %vm3243_vm6 }
 0xd7f   : > { %v3235_v55 = vsel %vm3234_vm5, %v4061_v34, %v3231_v19  ;;  %v3238_v24 = vmul.f32 %v4063_v12, %v3237_v13 }
 0xd80   : > { %v3248_v60 = vmul.f32 %v3235_v55, %v3184_v15 }
 0xd81   : > { %v3239_v28 = vmul.f32 0.5, %v3238_v24 }
 0xd82   : > { %3252 = vst [vmem:[%s5236_s5 + $0x10] sm:$0xff] %v3248_v60 }
 0xd83   : > { %v3240_v20 = vsub.f32 1.5, %v3239_v28 }
 0xd85   : > { %v3241_v37 = vmul.f32 %v4063_v12, %v3240_v20 }
 0xd87   : > { %v3245_v41 = vsel %vm3244_vm8, %v4063_v12, %v3241_v37 }
 0xd88   : > { %v3249_v27 = vmul.f32 %v3245_v41, %v5226_v8 }
 0xd8a   : > { %3253 = vst [vmem:[%s5236_s5 + $0x18] sm:$0xff] %v3249_v27 }
 0xd8b PF: > { %s5300_s25 = sld [smem:[#allocation3_spill]] }
 0xd91   : > { %s34_s5 = sadd.s32 1, %s5300_s25  }
 0xd92   : > { %p31_p4 = scmp.ge.s32.totalorder %s34_s5, 4  }
 0xd94   :  { %33 = sbr.rel (!%p31_p4) target bundleno = 12 (0xc), region = 155 }

</bundles_post_ra>
